<compile_context>
chip_gen: v7x
topology: tpu7x:2x2x1
jax: 0.10.0
libtpu: 0.0.40
codegen_flags: <defaults>
</compile_context>

<pallas_src>
import functools

import jax
import jax.numpy as jnp
from jax.experimental import pallas as pl
from jax.experimental.pallas import tpu as pltpu


# ----------------------------------------------------------------------------
# hardware-adaptive knobs
# ----------------------------------------------------------------------------

@functools.lru_cache(maxsize=None)
def _vmem_capacity_bytes():
    try:
        return int(pltpu.get_tpu_info().vmem_capacity_bytes)
    except Exception:
        return 64 << 20          # conservative default (v7x per-core VMEM)


def _vmem_limit_bytes():
    # Above the default scoped limit (16 MiB v5e / 32 MiB v6e+v7x) but with
    # headroom below physical so double-buffering stays alive.
    return int(min(_vmem_capacity_bytes() * 3 // 4, 100 << 20))


def _big_vmem():
    return _vmem_capacity_bytes() >= (96 << 20)     # v5e / v6e: 128 MiB


def _tile(dim, target, floor):
    """Largest tile <= target that divides `dim` and is a multiple of `floor`.

    Falls back to the full dimension (a full-extent block is always legal for
    the (8,128) rule).  TODO(synk): for very ragged dims (e.g. a vocab with no
    128-multiple divisor) pad the array to a tile multiple instead of relying
    on this fallback.
    """
    for t in range(min(target, dim), floor - 1, -1):
        if dim % t == 0 and t % floor == 0:
            return t
    return dim


# ----------------------------------------------------------------------------
# Pallas kernels
# ----------------------------------------------------------------------------

def _embed_gather_kernel(ids_ref, wte_ref, out_ref, sem):
    """Chunked embedding gather: per-row DMA from the HBM table into the
    output VMEM block, ids scalar-prefetched into SMEM."""
    c = pl.program_id(0)
    rows = out_ref.shape[0]

    def _start(r, carry):
        tok = ids_ref[c * rows + r]
        pltpu.make_async_copy(wte_ref.at[pl.ds(tok, 1), :],
                              out_ref.at[pl.ds(r, 1), :], sem).start()
        return carry

    jax.lax.fori_loop(0, rows, _start, 0)

    def _wait(r, carry):
        # every copy moves the same number of bytes -> wait once per row
        pltpu.make_async_copy(wte_ref.at[pl.ds(0, 1), :],
                              out_ref.at[pl.ds(0, 1), :], sem).wait()
        return carry

    jax.lax.fori_loop(0, rows, _wait, 0)


def _ln_qkv_kernel(x_ref, g_ref, b_ref, wq_ref, bq_ref, wk_ref, bk_ref,
                   wv_ref, bv_ref, q_ref, k_ref, v_ref, xn_sc, *, eps):
    """Fused LN1 + QKV projection; LN result cached across the column axis."""
    j = pl.program_id(1)

    @pl.when(j == 0)
    def _():
        x = x_ref[...].astype(jnp.float32)
        mean = jnp.mean(x, axis=-1, keepdims=True)
        xc = x - mean
        var = jnp.mean(xc * xc, axis=-1, keepdims=True)
        xn = (xc * jax.lax.rsqrt(var + eps)) * g_ref[...] + b_ref[...]
        xn_sc[...] = xn.astype(jnp.bfloat16)

    xn = xn_sc[...]
    q_ref[...] = (jnp.dot(xn, wq_ref[...], preferred_element_type=jnp.float32)
                  + bq_ref[...]).astype(q_ref.dtype)
    k_ref[...] = (jnp.dot(xn, wk_ref[...], preferred_element_type=jnp.float32)
                  + bk_ref[...]).astype(k_ref.dtype)
    v_ref[...] = (jnp.dot(xn, wv_ref[...], preferred_element_type=jnp.float32)
                  + bv_ref[...]).astype(v_ref.dtype)


def _flash_attn_kernel(len_ref, q_ref, k_ref, v_ref, o_ref,
                       m_sc, l_sc, acc_sc, *, n_head, scale):
    """Flash-style causal attention.  Heads are split inside the kernel; the
    accumulator is a lane-dense (tq, E) scratch; fully-masked upper-triangular
    KV tiles are skipped; key-padding via SMEM valid-lengths."""
    b = pl.program_id(0)
    qi = pl.program_id(1)
    ki = pl.program_id(2)
    tq = q_ref.shape[1]
    tk = k_ref.shape[1]
    e = q_ref.shape[2]
    dh = e // n_head

    @pl.when(ki == 0)
    def _():
        m_sc[...] = jnp.full(m_sc.shape, -jnp.inf, m_sc.dtype)
        l_sc[...] = jnp.zeros(l_sc.shape, l_sc.dtype)
        acc_sc[...] = jnp.zeros(acc_sc.shape, acc_sc.dtype)

    # Causal tile-skip: strictly upper-triangular KV tiles contribute nothing.
    @pl.when(ki * tk <= qi * tq + (tq - 1))
    def _():
        q = q_ref[0]                               # [tq, E] bf16
        k = k_ref[0]                               # [tk, E] bf16
        v = v_ref[0]                               # [tk, E] bf16
        length = len_ref[b]                        # SMEM scalar
        q_pos = qi * tq + jax.lax.broadcasted_iota(jnp.int32, (tq, tk), 0)
        k_pos = ki * tk + jax.lax.broadcasted_iota(jnp.int32, (tq, tk), 1)
        keep = (q_pos >= k_pos) & (k_pos < length)

        for h in range(n_head):
            sl = slice(h * dh, (h + 1) * dh)
            qh = q[:, sl]
            kh = k[:, sl]
            vh = v[:, sl]
            # q @ k^T (contract Dh of both operands, no explicit transpose)
            s = jax.lax.dot_general(qh, kh, (((1,), (1,)), ((), ())),
                                    preferred_element_type=jnp.float32) * scale
            s = jnp.where(keep, s, -1e9)

            m_prev = m_sc[h]                       # [tq, 1]
            m_new = jnp.maximum(m_prev, jnp.max(s, axis=-1, keepdims=True))
            alpha = jnp.exp(m_prev - m_new)
            p = jnp.exp(s - m_new)
            l_sc[h] = alpha * l_sc[h] + jnp.sum(p, axis=-1, keepdims=True)
            acc_sc[:, sl] = alpha * acc_sc[:, sl] + jnp.dot(
                p.astype(jnp.bfloat16), vh, preferred_element_type=jnp.float32)
            m_sc[h] = m_new

    @pl.when(ki == pl.num_programs(2) - 1)
    def _():
        for h in range(n_head):
            sl = slice(h * dh, (h + 1) * dh)
            inv_l = pl.reciprocal(l_sc[h], approx=True)
            acc_sc[:, sl] = acc_sc[:, sl] * inv_l
        o_ref[0] = acc_sc[...].astype(o_ref.dtype)   # single lane-dense store


def _matmul_bias_res_kernel(x_ref, w_ref, bias_ref, res_ref, o_ref):
    """out = residual + x @ W + bias  (attention out-projection + residual)."""
    y = jnp.dot(x_ref[...], w_ref[...],
                preferred_element_type=jnp.float32) + bias_ref[...]
    o_ref[...] = res_ref[...] + y


def _ln_mlp_res_kernel(x_ref, g_ref, b_ref, w1_ref, b1_ref, w2_ref, b2_ref,
                       o_ref, xn_sc, acc_ref, *, eps):
    """Fused LN2 + GELU MLP + residual; LN cached + accumulated over F tiles."""
    fj = pl.program_id(1)

    @pl.when(fj == 0)
    def _():
        x = x_ref[...].astype(jnp.float32)
        mean = jnp.mean(x, axis=-1, keepdims=True)
        xc = x - mean
        var = jnp.mean(xc * xc, axis=-1, keepdims=True)
        xn = (xc * jax.lax.rsqrt(var + eps)) * g_ref[...] + b_ref[...]
        xn_sc[...] = xn.astype(jnp.bfloat16)
        acc_ref[...] = jnp.zeros(acc_ref.shape, acc_ref.dtype)

    h1 = jnp.dot(xn_sc[...], w1_ref[...],
                 preferred_element_type=jnp.float32) + b1_ref[...]
    # TODO(synk): GELU flavour of the (unprovided) torch Block is unknown;
    # tanh approximation (GPT-2 style) is used here.
    h1 = jax.nn.gelu(h1, approximate=True)
    acc_ref[...] += jnp.dot(h1.astype(jnp.bfloat16), w2_ref[...],
                            preferred_element_type=jnp.float32)

    @pl.when(fj == pl.num_programs(1) - 1)
    def _():
        o_ref[...] = x_ref[...] + acc_ref[...] + b2_ref[...]


def _ln_matmul_kernel(x_ref, g_ref, b_ref, w_ref, o_ref, xn_sc, *, eps):
    """out = LayerNorm(x) @ W (bias-free lm_head); LN cached across columns."""
    j = pl.program_id(1)

    @pl.when(j == 0)
    def _():
        x = x_ref[...].astype(jnp.float32)
        mean = jnp.mean(x, axis=-1, keepdims=True)
        xc = x - mean
        var = jnp.mean(xc * xc, axis=-1, keepdims=True)
        xn = (xc * jax.lax.rsqrt(var + eps)) * g_ref[...] + b_ref[...]
        xn_sc[...] = xn.astype(jnp.bfloat16)

    o_ref[...] = jnp.dot(xn_sc[...], w_ref[...],
                         preferred_element_type=jnp.float32)


# ----------------------------------------------------------------------------
# pallas_call wrappers
# ----------------------------------------------------------------------------

def embed(tokens_flat, wte, *, chunk_target=256):
    bt = tokens_flat.shape[0]
    _, e = wte.shape
    chunk = _tile(bt, chunk_target, 8)
    return pl.pallas_call(
        _embed_gather_kernel,
        out_shape=jax.ShapeDtypeStruct((bt, e), wte.dtype),
        grid_spec=pltpu.PrefetchScalarGridSpec(
            num_scalar_prefetch=1,
            grid=(bt // chunk,),
            in_specs=[pl.BlockSpec(memory_space=pl.ANY)],
            out_specs=pl.BlockSpec((chunk, e), lambda c, ids: (c, 0)),
            scratch_shapes=[pltpu.SemaphoreType.DMA]),
        compiler_params=pltpu.CompilerParams(
            dimension_semantics=("parallel",),
            vmem_limit_bytes=_vmem_limit_bytes()),
    )(tokens_flat.astype(jnp.int32), wte)


def ln_qkv(x, g, b, wq, bq, wk, bk, wv, bv, *, eps=1e-5,
           tm_target=256, tn_target=512):
    n, e = x.shape
    m = wq.shape[1]
    tm = _tile(n, tm_target, 8)
    tn = _tile(m, tn_target, 128)
    shp = jax.ShapeDtypeStruct((n, m), jnp.bfloat16)
    qkv_spec = pl.BlockSpec((tm, tn), lambda i, j: (i, j))
    return pl.pallas_call(
        functools.partial(_ln_qkv_kernel, eps=eps),
        out_shape=(shp, shp, shp),
        grid=(n // tm, m // tn),
        in_specs=[pl.BlockSpec((tm, e), lambda i, j: (i, 0)),
                  pl.BlockSpec((1, e), lambda i, j: (0, 0)),
                  pl.BlockSpec((1, e), lambda i, j: (0, 0)),
                  pl.BlockSpec((e, tn), lambda i, j: (0, j)),
                  pl.BlockSpec((1, tn), lambda i, j: (0, j)),
                  pl.BlockSpec((e, tn), lambda i, j: (0, j)),
                  pl.BlockSpec((1, tn), lambda i, j: (0, j)),
                  pl.BlockSpec((e, tn), lambda i, j: (0, j)),
                  pl.BlockSpec((1, tn), lambda i, j: (0, j))],
        out_specs=(qkv_spec, qkv_spec, qkv_spec),
        scratch_shapes=[pltpu.VMEM((tm, e), jnp.bfloat16)],
        compiler_params=pltpu.CompilerParams(
            dimension_semantics=("parallel", "arbitrary"),
            vmem_limit_bytes=_vmem_limit_bytes()),
    )(x, g.reshape(1, e), b.reshape(1, e),
      wq, bq.reshape(1, m), wk, bk.reshape(1, m), wv, bv.reshape(1, m))


def flash_attention(q, k, v, lengths, n_head, *, tq_target=None, tk_target=256):
    if tq_target is None:
        tq_target = 512 if _big_vmem() else 256
    bsz, t, e = q.shape
    dh = e // n_head
    scale = 1.0 / (dh ** 0.5)
    tq = _tile(t, tq_target, 8)
    tk = _tile(t, tk_target, 128)
    return pl.pallas_call(
        functools.partial(_flash_attn_kernel, n_head=n_head, scale=scale),
        out_shape=jax.ShapeDtypeStruct((bsz, t, e), jnp.bfloat16),
        grid_spec=pltpu.PrefetchScalarGridSpec(
            num_scalar_prefetch=1,
            grid=(bsz, t // tq, t // tk),
            in_specs=[pl.BlockSpec((1, tq, e), lambda b, qi, ki, lens: (b, qi, 0)),
                      pl.BlockSpec((1, tk, e), lambda b, qi, ki, lens: (b, ki, 0)),
                      pl.BlockSpec((1, tk, e), lambda b, qi, ki, lens: (b, ki, 0))],
            out_specs=pl.BlockSpec((1, tq, e), lambda b, qi, ki, lens: (b, qi, 0)),
            scratch_shapes=[pltpu.VMEM((n_head, tq, 1), jnp.float32),
                            pltpu.VMEM((n_head, tq, 1), jnp.float32),
                            pltpu.VMEM((tq, e), jnp.float32)]),
        compiler_params=pltpu.CompilerParams(
            dimension_semantics=("parallel", "parallel", "arbitrary"),
            vmem_limit_bytes=_vmem_limit_bytes()),
    )(lengths, q, k, v)


def matmul_bias_residual(x, w, bias, res, *, tm_target=256, tn_target=512):
    n, kdim = x.shape
    m = w.shape[1]
    tm = _tile(n, tm_target, 8)
    tn = _tile(m, tn_target, 128)
    return pl.pallas_call(
        _matmul_bias_res_kernel,
        out_shape=jax.ShapeDtypeStruct((n, m), jnp.float32),
        grid=(n // tm, m // tn),
        in_specs=[pl.BlockSpec((tm, kdim), lambda i, j: (i, 0)),
                  pl.BlockSpec((kdim, tn), lambda i, j: (0, j)),
                  pl.BlockSpec((1, tn), lambda i, j: (0, j)),
                  pl.BlockSpec((tm, tn), lambda i, j: (i, j))],
        out_specs=pl.BlockSpec((tm, tn), lambda i, j: (i, j)),
        input_output_aliases={3: 0},            # residual buffer reused as output
        compiler_params=pltpu.CompilerParams(
            dimension_semantics=("parallel", "parallel"),
            vmem_limit_bytes=_vmem_limit_bytes()),
    )(x, w, bias.reshape(1, m), res)


def ln_mlp_residual(x, g, b, w1, b1, w2, b2, *, eps=1e-5,
                    tm_target=256, tf_target=None):
    if tf_target is None:
        tf_target = 1024 if _big_vmem() else 512
    n, e = x.shape
    f = w1.shape[1]
    tm = _tile(n, tm_target, 8)
    tf = _tile(f, tf_target, 128)
    return pl.pallas_call(
        functools.partial(_ln_mlp_res_kernel, eps=eps),
        out_shape=jax.ShapeDtypeStruct((n, e), jnp.float32),
        grid=(n // tm, f // tf),
        in_specs=[pl.BlockSpec((tm, e), lambda i, fj: (i, 0)),
                  pl.BlockSpec((1, e), lambda i, fj: (0, 0)),
                  pl.BlockSpec((1, e), lambda i, fj: (0, 0)),
                  pl.BlockSpec((e, tf), lambda i, fj: (0, fj)),
                  pl.BlockSpec((1, tf), lambda i, fj: (0, fj)),
                  pl.BlockSpec((tf, e), lambda i, fj: (fj, 0)),
                  pl.BlockSpec((1, e), lambda i, fj: (0, 0))],
        out_specs=pl.BlockSpec((tm, e), lambda i, fj: (i, 0)),
        scratch_shapes=[pltpu.VMEM((tm, e), jnp.bfloat16),
                        pltpu.VMEM((tm, e), jnp.float32)],
        compiler_params=pltpu.CompilerParams(
            dimension_semantics=("parallel", "arbitrary"),
            vmem_limit_bytes=_vmem_limit_bytes()),
    )(x, g.reshape(1, e), b.reshape(1, e), w1, b1.reshape(1, f),
      w2, b2.reshape(1, e))


def ln_matmul(x, g, b, w, *, eps=1e-5, tm_target=256, tn_target=None):
    if tn_target is None:
        tn_target = 1024 if _big_vmem() else 512
    n, e = x.shape
    m = w.shape[1]
    tm = _tile(n, tm_target, 8)
    tn = _tile(m, tn_target, 128)
    return pl.pallas_call(
        functools.partial(_ln_matmul_kernel, eps=eps),
        out_shape=jax.ShapeDtypeStruct((n, m), jnp.float32),
        grid=(n // tm, m // tn),
        in_specs=[pl.BlockSpec((tm, e), lambda i, j: (i, 0)),
                  pl.BlockSpec((1, e), lambda i, j: (0, 0)),
                  pl.BlockSpec((1, e), lambda i, j: (0, 0)),
                  pl.BlockSpec((e, tn), lambda i, j: (0, j))],
        out_specs=pl.BlockSpec((tm, tn), lambda i, j: (i, j)),
        scratch_shapes=[pltpu.VMEM((tm, e), jnp.bfloat16)],
        compiler_params=pltpu.CompilerParams(
            dimension_semantics=("parallel", "arbitrary"),
            vmem_limit_bytes=_vmem_limit_bytes()),
    )(x, g.reshape(1, e), b.reshape(1, e), w)


# ----------------------------------------------------------------------------
# Model (parameter init + forward / lm_forward)
# ----------------------------------------------------------------------------

def init_params(key, n_vocab, E, L, H, mlp_mult=4):
    v_align = (n_vocab + 63) // 64 * 64
    ks = jax.random.split(key, 2 + 8 * L)
    scale = 0.02
    params = {
        "wte": scale * jax.random.normal(ks[0], (v_align, E), jnp.float32),
        "lnf_g": jnp.ones((E,), jnp.float32),
        "lnf_b": jnp.zeros((E,), jnp.float32),
        # nn.Linear(E, V, bias=False) stored pre-transposed as [E, V], bf16
        "lm_head_w": (scale * jax.random.normal(ks[1], (E, v_align),
                                                jnp.float32)).astype(jnp.bfloat16),
        "layers": [],
    }
    F = mlp_mult * E
    for li in range(L):
        kk = ks[2 + 8 * li: 2 + 8 * (li + 1)]
        bf = lambda a: a.astype(jnp.bfloat16)
        params["layers"].append({
            "ln1_g": jnp.ones((E,), jnp.float32),
            "ln1_b": jnp.zeros((E,), jnp.float32),
            "wq": bf(scale * jax.random.normal(kk[0], (E, E), jnp.float32)),
            "wk": bf(scale * jax.random.normal(kk[1], (E, E), jnp.float32)),
            "wv": bf(scale * jax.random.normal(kk[2], (E, E), jnp.float32)),
            "bq": jnp.zeros((E,), jnp.float32),
            "bk": jnp.zeros((E,), jnp.float32),
            "bv": jnp.zeros((E,), jnp.float32),
            "proj_w": bf(scale * jax.random.normal(kk[3], (E, E), jnp.float32)),
            "proj_b": jnp.zeros((E,), jnp.float32),
            "ln2_g": jnp.ones((E,), jnp.float32),
            "ln2_b": jnp.zeros((E,), jnp.float32),
            "mlp_w1": bf(scale * jax.random.normal(kk[4], (E, F), jnp.float32)),
            "mlp_b1": jnp.zeros((F,), jnp.float32),
            "mlp_w2": bf(scale * jax.random.normal(kk[5], (F, E), jnp.float32)),
            "mlp_b2": jnp.zeros((E,), jnp.float32),
        })
    return params


def block_forward(p, h, n_head, lengths, B, T):
    E = h.shape[-1]
    # fused LN1 + QKV projection -> three separate lane-dense bf16 tensors
    q, k, v = ln_qkv(h, p["ln1_g"], p["ln1_b"],
                     p["wq"], p["bq"], p["wk"], p["bk"], p["wv"], p["bv"])
    q = q.reshape(B, T, E)
    k = k.reshape(B, T, E)
    v = v.reshape(B, T, E)
    a = flash_attention(q, k, v, lengths, n_head)          # [B, T, E] bf16
    a = a.reshape(B * T, E)
    # attention out-projection fused with residual add (residual aliased out)
    h = matmul_bias_residual(a, p["proj_w"], p["proj_b"], h)
    # fused LN2 + GELU MLP + residual, accumulated over F tiles
    h = ln_mlp_residual(h, p["ln2_g"], p["ln2_b"],
                        p["mlp_w1"], p["mlp_b1"], p["mlp_w2"], p["mlp_b2"])
    return h


def codify_forward(params, tokens, attention_mask=None,
                   past_key_values=None, use_cache=False, *, n_head):
    """Mirrors CodifyModel.forward: returns (hidden_states, presents)."""
    del past_key_values  # TODO(synk): KV-cache plumbing not modeled.
    B, T = tokens.shape
    E = params["wte"].shape[1]
    h = embed(tokens.reshape(-1), params["wte"])            # [B*T, E] f32

    if attention_mask is None:
        lengths = jnp.full((B,), T, jnp.int32)
    else:
        # TODO(synk): assumes the key-padding mask is a contiguous prefix.
        lengths = attention_mask.astype(jnp.int32).sum(axis=-1).astype(jnp.int32)

    for layer in params["layers"]:
        h = block_forward(layer, h, n_head, lengths, B, T)

    presents = () if use_cache else None
    return h.reshape(B, T, E), presents


def lm_forward(params, hidden_states):
    """Mirrors CodifyModel.lm_forward: LN -> /2 -> bias-free lm_head (fused).
    The /2.0 is folded into the LN affine params on the host."""
    B, T, E = hidden_states.shape
    V = params["lm_head_w"].shape[1]
    g = params["lnf_g"] * 0.5
    b = params["lnf_b"] * 0.5
    logits = ln_matmul(hidden_states.reshape(B * T, E), g, b,
                       params["lm_head_w"])
    return logits.reshape(B, T, V)


# ----------------------------------------------------------------------------
# Driver
# ----------------------------------------------------------------------------

if __name__ == "__main__":
    B, T = 2, 8
    E, L, H, n_vocab = 128, 2, 4, 100

    root = jax.random.PRNGKey(0)
    k_params, k_tok = jax.random.split(root)

    params = init_params(k_params, n_vocab=n_vocab, E=E, L=L, H=H)
    tokens = jax.random.randint(k_tok, (B, T), 0, n_vocab, dtype=jnp.int32)
    attention_mask = jnp.ones((B, T), dtype=jnp.int32)

    fwd = jax.jit(functools.partial(codify_forward, n_head=H))
    lmf = jax.jit(lm_forward)

    hidden, presents = fwd(params, tokens, attention_mask)
    logits = lmf(params, hidden)

    jax.block_until_ready((hidden, logits))
    v_align = (n_vocab + 63) // 64 * 64
    assert hidden.shape == (B, T, E)
    assert logits.shape == (B, T, v_align)
    assert bool(jnp.all(jnp.isfinite(hidden)))
    assert bool(jnp.all(jnp.isfinite(logits)))
    print("KERNEL_OK")
</pallas_src>

<mosaic_0001>
module attributes {stable_mosaic.version = 11 : i64} {
  func.func @_embed_gather_kernel(%arg0: i32, %arg1: memref<16xi32, #tpu.memory_space<smem>>, %arg2: memref<128x128xf32, #tpu.memory_space<any>>, %arg3: memref<16x128xf32, #tpu.memory_space<vmem>>, %arg4: memref<!tpu.dma_semaphore, #tpu.memory_space<semaphore_mem>>) attributes {dimension_semantics = [#tpu.dimension_semantics<parallel>], iteration_bounds = array<i64: 1>, scalar_prefetch = 1 : i64, scratch_operands = 1 : i64, tpu.core_type = #tpu.core_type<tc>, window_params = [{}, {transform_indices = @transform_1, window_bounds = array<i64: 16, 128>}]} {
    %c0_i32 = arith.constant 0 : i32
    %c16_i32 = arith.constant 16 : i32
    %0 = arith.addi %c0_i32, %c16_i32 : i32
    %c1_i32 = arith.constant 1 : i32
    scf.for %arg5 = %c0_i32 to %0 step %c1_i32  : i32 {
      %c16_i32_4 = arith.constant 16 : i32
      %2 = arith.muli %arg0, %c16_i32_4 : i32
      %3 = arith.addi %2, %arg5 : i32
      %4 = arith.index_cast %3 : i32 to index
      %5 = memref.load %arg1[%4] : memref<16xi32, #tpu.memory_space<smem>>
      %c0_i32_5 = arith.constant 0 : i32
      %6 = tpu.memref_slice %arg2[%5, %c0_i32_5] : memref<128x128xf32, #tpu.memory_space<any>> -> memref<1x128xf32, #tpu.memory_space<any>>
      %c0_i32_6 = arith.constant 0 : i32
      %7 = tpu.memref_slice %arg3[%arg5, %c0_i32_6] : memref<16x128xf32, #tpu.memory_space<vmem>> -> memref<1x128xf32, #tpu.memory_space<vmem>>
      tpu.enqueue_dma source(%6 : memref<1x128xf32, #tpu.memory_space<any>>) target(%7 : memref<1x128xf32, #tpu.memory_space<vmem>>) target_semaphore(%arg4 : memref<!tpu.dma_semaphore, #tpu.memory_space<semaphore_mem>>)
    }
    %c16_i32_0 = arith.constant 16 : i32
    %c0_i32_1 = arith.constant 0 : i32
    %c16_i32_2 = arith.constant 16 : i32
    %1 = arith.addi %c0_i32_1, %c16_i32_2 : i32
    %c1_i32_3 = arith.constant 1 : i32
    scf.for %arg5 = %c0_i32_1 to %1 step %c1_i32_3  : i32 {
      %c0_i32_4 = arith.constant 0 : i32
      %c0_i32_5 = arith.constant 0 : i32
      %2 = tpu.memref_slice %arg2[%c0_i32_4, %c0_i32_5] : memref<128x128xf32, #tpu.memory_space<any>> -> memref<1x128xf32, #tpu.memory_space<any>>
      %c0_i32_6 = arith.constant 0 : i32
      %c0_i32_7 = arith.constant 0 : i32
      %3 = tpu.memref_slice %arg3[%c0_i32_6, %c0_i32_7] : memref<16x128xf32, #tpu.memory_space<vmem>> -> memref<1x128xf32, #tpu.memory_space<vmem>>
      tpu.wait_dma2 semaphore(%arg4 : memref<!tpu.dma_semaphore, #tpu.memory_space<semaphore_mem>>) src(%2 : memref<1x128xf32, #tpu.memory_space<any>>) dst(%3 : memref<1x128xf32, #tpu.memory_space<vmem>>)
    }
    return
  }
  func.func @transform_1(%arg0: i32, %arg1: memref<16xi32, #tpu.memory_space<smem>>) -> (i32, i32) {
    %c0_i32 = arith.constant 0 : i32
    %c0_i32_0 = arith.constant 0 : i32
    return %arg0, %c0_i32 : i32, i32
  }
}

module attributes {stable_mosaic.version = 11 : i64} {
  func.func @_ln_qkv_kernel(%arg0: i32, %arg1: i32, %arg2: memref<16x128xf32, #tpu.memory_space<vmem>>, %arg3: memref<1x128xf32, #tpu.memory_space<vmem>>, %arg4: memref<1x128xf32, #tpu.memory_space<vmem>>, %arg5: memref<128x128xbf16, #tpu.memory_space<vmem>>, %arg6: memref<1x128xf32, #tpu.memory_space<vmem>>, %arg7: memref<128x128xbf16, #tpu.memory_space<vmem>>, %arg8: memref<1x128xf32, #tpu.memory_space<vmem>>, %arg9: memref<128x128xbf16, #tpu.memory_space<vmem>>, %arg10: memref<1x128xf32, #tpu.memory_space<vmem>>, %arg11: memref<16x128xbf16, #tpu.memory_space<vmem>>, %arg12: memref<16x128xbf16, #tpu.memory_space<vmem>>, %arg13: memref<16x128xbf16, #tpu.memory_space<vmem>>, %arg14: memref<16x128xbf16, #tpu.memory_space<vmem>>) attributes {dimension_semantics = [#tpu.dimension_semantics<parallel>, #tpu.dimension_semantics<arbitrary>], iteration_bounds = array<i64: 1, 1>, scalar_prefetch = 0 : i64, scratch_operands = 1 : i64, tpu.core_type = #tpu.core_type<tc>, window_params = [{transform_indices = @transform_0, window_bounds = array<i64: 16, 128>}, {pipeline_mode = #tpu.pipeline_mode<synchronous>, transform_indices = @transform_1, window_bounds = array<i64: 1, 128>}, {pipeline_mode = #tpu.pipeline_mode<synchronous>, transform_indices = @transform_2, window_bounds = array<i64: 1, 128>}, {transform_indices = @transform_3, window_bounds = array<i64: 128, 128>}, {transform_indices = @transform_4, window_bounds = array<i64: 1, 128>}, {transform_indices = @transform_5, window_bounds = array<i64: 128, 128>}, {transform_indices = @transform_6, window_bounds = array<i64: 1, 128>}, {transform_indices = @transform_7, window_bounds = array<i64: 128, 128>}, {transform_indices = @transform_8, window_bounds = array<i64: 1, 128>}, {transform_indices = @transform_9, window_bounds = array<i64: 16, 128>}, {transform_indices = @transform_10, window_bounds = array<i64: 16, 128>}, {transform_indices = @transform_11, window_bounds = array<i64: 16, 128>}]} {
    %c0_i32 = arith.constant 0 : i32
    %0 = arith.cmpi eq, %arg1, %c0_i32 : i32
    %1 = arith.extui %0 : i1 to i32
    %c0_i32_0 = arith.constant 0 : i32
    %2 = arith.cmpi ne, %1, %c0_i32_0 : i32
    scf.if %2 {
      %c0_22 = arith.constant 0 : index
      %c0_23 = arith.constant 0 : index
      %25 = vector.load %arg2[%c0_22, %c0_23] : memref<16x128xf32, #tpu.memory_space<vmem>>, vector<16x128xf32>
      %cst_24 = arith.constant dense<0.000000e+00> : vector<16xf32>
      %26 = vector.multi_reduction <add>, %25, %cst_24 [1] : vector<16x128xf32> to vector<16xf32>
      %27 = vector.shape_cast %26 : vector<16xf32> to vector<16x1xf32>
      %cst_25 = arith.constant 1.280000e+02 : f32
      %28 = vector.broadcast %cst_25 : f32 to vector<16x1xf32>
      %29 = arith.divf %27, %28 : vector<16x1xf32>
      %30 = vector.broadcast %29 : vector<16x1xf32> to vector<16x128xf32>
      %31 = arith.subf %25, %30 : vector<16x128xf32>
      %32 = arith.mulf %31, %31 : vector<16x128xf32>
      %cst_26 = arith.constant dense<0.000000e+00> : vector<16xf32>
      %33 = vector.multi_reduction <add>, %32, %cst_26 [1] : vector<16x128xf32> to vector<16xf32>
      %34 = vector.shape_cast %33 : vector<16xf32> to vector<16x1xf32>
      %cst_27 = arith.constant 1.280000e+02 : f32
      %35 = vector.broadcast %cst_27 : f32 to vector<16x1xf32>
      %36 = arith.divf %34, %35 : vector<16x1xf32>
      %cst_28 = arith.constant 9.99999974E-6 : f32
      %37 = vector.broadcast %cst_28 : f32 to vector<16x1xf32>
      %38 = arith.addf %36, %37 : vector<16x1xf32>
      %39 = math.rsqrt %38 : vector<16x1xf32>
      %40 = vector.broadcast %39 : vector<16x1xf32> to vector<16x128xf32>
      %41 = arith.mulf %31, %40 : vector<16x128xf32>
      %c0_29 = arith.constant 0 : index
      %c0_30 = arith.constant 0 : index
      %42 = vector.load %arg3[%c0_29, %c0_30] : memref<1x128xf32, #tpu.memory_space<vmem>>, vector<1x128xf32>
      %43 = vector.broadcast %42 : vector<1x128xf32> to vector<16x128xf32>
      %44 = arith.mulf %41, %43 : vector<16x128xf32>
      %c0_31 = arith.constant 0 : index
      %c0_32 = arith.constant 0 : index
      %45 = vector.load %arg4[%c0_31, %c0_32] : memref<1x128xf32, #tpu.memory_space<vmem>>, vector<1x128xf32>
      %46 = vector.broadcast %45 : vector<1x128xf32> to vector<16x128xf32>
      %47 = arith.addf %44, %46 : vector<16x128xf32>
      %48 = arith.truncf %47 : vector<16x128xf32> to vector<16x128xbf16>
      %c0_33 = arith.constant 0 : index
      %c0_34 = arith.constant 0 : index
      %49 = vector.load %arg14[%c0_33, %c0_34] : memref<16x128xbf16, #tpu.memory_space<vmem>>, vector<16x128xbf16>
      tpu.vector_store %arg14[%c0_33, %c0_34], %48 {strides = array<i32>} : memref<16x128xbf16, #tpu.memory_space<vmem>>, vector<16x128xbf16>,
    } else {
    }
    %c0 = arith.constant 0 : index
    %c0_1 = arith.constant 0 : index
    %3 = vector.load %arg14[%c0, %c0_1] : memref<16x128xbf16, #tpu.memory_space<vmem>>, vector<16x128xbf16>
    %c0_2 = arith.constant 0 : index
    %c0_3 = arith.constant 0 : index
    %4 = vector.load %arg5[%c0_2, %c0_3] : memref<128x128xbf16, #tpu.memory_space<vmem>>, vector<128x128xbf16>
    %cst = arith.constant dense<0.000000e+00> : vector<16x128xf32>
    %5 = tpu.matmul %3, %4, %cst {dimension_numbers = #tpu.dot_dimension_numbers<[1], [0], [0], [1], [0, 0, 1, 1], [], []>} : vector<16x128xbf16>, vector<128x128xbf16>, vector<16x128xf32> -> vector<16x128xf32>
    %c0_4 = arith.constant 0 : index
    %c0_5 = arith.constant 0 : index
    %6 = vector.load %arg6[%c0_4, %c0_5] : memref<1x128xf32, #tpu.memory_space<vmem>>, vector<1x128xf32>
    %7 = vector.broadcast %6 : vector<1x128xf32> to vector<16x128xf32>
    %8 = arith.addf %5, %7 : vector<16x128xf32>
    %9 = arith.truncf %8 : vector<16x128xf32> to vector<16x128xbf16>
    %c0_6 = arith.constant 0 : index
    %c0_7 = arith.constant 0 : index
    %10 = vector.load %arg11[%c0_6, %c0_7] : memref<16x128xbf16, #tpu.memory_space<vmem>>, vector<16x128xbf16>
    tpu.vector_store %arg11[%c0_6, %c0_7], %9 {strides = array<i32>} : memref<16x128xbf16, #tpu.memory_space<vmem>>, vector<16x128xbf16>,
    %c0_8 = arith.constant 0 : index
    %c0_9 = arith.constant 0 : index
    %11 = vector.load %arg7[%c0_8, %c0_9] : memref<128x128xbf16, #tpu.memory_space<vmem>>, vector<128x128xbf16>
    %cst_10 = arith.constant dense<0.000000e+00> : vector<16x128xf32>
    %12 = tpu.matmul %3, %11, %cst_10 {dimension_numbers = #tpu.dot_dimension_numbers<[1], [0], [0], [1], [0, 0, 1, 1], [], []>} : vector<16x128xbf16>, vector<128x128xbf16>, vector<16x128xf32> -> vector<16x128xf32>
    %c0_11 = arith.constant 0 : index
    %c0_12 = arith.constant 0 : index
    %13 = vector.load %arg8[%c0_11, %c0_12] : memref<1x128xf32, #tpu.memory_space<vmem>>, vector<1x128xf32>
    %14 = vector.broadcast %13 : vector<1x128xf32> to vector<16x128xf32>
    %15 = arith.addf %12, %14 : vector<16x128xf32>
    %16 = arith.truncf %15 : vector<16x128xf32> to vector<16x128xbf16>
    %c0_13 = arith.constant 0 : index
    %c0_14 = arith.constant 0 : index
    %17 = vector.load %arg12[%c0_13, %c0_14] : memref<16x128xbf16, #tpu.memory_space<vmem>>, vector<16x128xbf16>
    tpu.vector_store %arg12[%c0_13, %c0_14], %16 {strides = array<i32>} : memref<16x128xbf16, #tpu.memory_space<vmem>>, vector<16x128xbf16>,
    %c0_15 = arith.constant 0 : index
    %c0_16 = arith.constant 0 : index
    %18 = vector.load %arg9[%c0_15, %c0_16] : memref<128x128xbf16, #tpu.memory_space<vmem>>, vector<128x128xbf16>
    %cst_17 = arith.constant dense<0.000000e+00> : vector<16x128xf32>
    %19 = tpu.matmul %3, %18, %cst_17 {dimension_numbers = #tpu.dot_dimension_numbers<[1], [0], [0], [1], [0, 0, 1, 1], [], []>} : vector<16x128xbf16>, vector<128x128xbf16>, vector<16x128xf32> -> vector<16x128xf32>
    %c0_18 = arith.constant 0 : index
    %c0_19 = arith.constant 0 : index
    %20 = vector.load %arg10[%c0_18, %c0_19] : memref<1x128xf32, #tpu.memory_space<vmem>>, vector<1x128xf32>
    %21 = vector.broadcast %20 : vector<1x128xf32> to vector<16x128xf32>
    %22 = arith.addf %19, %21 : vector<16x128xf32>
    %23 = arith.truncf %22 : vector<16x128xf32> to vector<16x128xbf16>
    %c0_20 = arith.constant 0 : index
    %c0_21 = arith.constant 0 : index
    %24 = vector.load %arg13[%c0_20, %c0_21] : memref<16x128xbf16, #tpu.memory_space<vmem>>, vector<16x128xbf16>
    tpu.vector_store %arg13[%c0_20, %c0_21], %23 {strides = array<i32>} : memref<16x128xbf16, #tpu.memory_space<vmem>>, vector<16x128xbf16>,
    return
  }
  func.func @transform_0(%arg0: i32, %arg1: i32) -> (i32, i32) {
    %c0_i32 = arith.constant 0 : i32
    %c0_i32_0 = arith.constant 0 : i32
    return %arg0, %c0_i32 : i32, i32
  }
  func.func @transform_1(%arg0: i32, %arg1: i32) -> (i32, i32) {
    %c0_i32 = arith.constant 0 : i32
    %c0_i32_0 = arith.constant 0 : i32
    %c0_i32_1 = arith.constant 0 : i32
    return %c0_i32, %c0_i32_0 : i32, i32
  }
  func.func @transform_2(%arg0: i32, %arg1: i32) -> (i32, i32) {
    %c0_i32 = arith.constant 0 : i32
    %c0_i32_0 = arith.constant 0 : i32
    %c0_i32_1 = arith.constant 0 : i32
    return %c0_i32, %c0_i32_0 : i32, i32
  }
  func.func @transform_3(%arg0: i32, %arg1: i32) -> (i32, i32) {
    %c0_i32 = arith.constant 0 : i32
    %c0_i32_0 = arith.constant 0 : i32
    return %c0_i32, %arg1 : i32, i32
  }
  func.func @transform_4(%arg0: i32, %arg1: i32) -> (i32, i32) {
    %c0_i32 = arith.constant 0 : i32
    %c0_i32_0 = arith.constant 0 : i32
    return %c0_i32, %arg1 : i32, i32
  }
  func.func @transform_5(%arg0: i32, %arg1: i32) -> (i32, i32) {
    %c0_i32 = arith.constant 0 : i32
    %c0_i32_0 = arith.constant 0 : i32
    return %c0_i32, %arg1 : i32, i32
  }
  func.func @transform_6(%arg0: i32, %arg1: i32) -> (i32, i32) {
    %c0_i32 = arith.constant 0 : i32
    %c0_i32_0 = arith.constant 0 : i32
    return %c0_i32, %arg1 : i32, i32
  }
  func.func @transform_7(%arg0: i32, %arg1: i32) -> (i32, i32) {
    %c0_i32 = arith.constant 0 : i32
    %c0_i32_0 = arith.constant 0 : i32
    return %c0_i32, %arg1 : i32, i32
  }
  func.func @transform_8(%arg0: i32, %arg1: i32) -> (i32, i32) {
    %c0_i32 = arith.constant 0 : i32
    %c0_i32_0 = arith.constant 0 : i32
    return %c0_i32, %arg1 : i32, i32
  }
  func.func @transform_9(%arg0: i32, %arg1: i32) -> (i32, i32) {
    %c0_i32 = arith.constant 0 : i32
    return %arg0, %arg1 : i32, i32
  }
  func.func @transform_10(%arg0: i32, %arg1: i32) -> (i32, i32) {
    %c0_i32 = arith.constant 0 : i32
    return %arg0, %arg1 : i32, i32
  }
  func.func @transform_11(%arg0: i32, %arg1: i32) -> (i32, i32) {
    %c0_i32 = arith.constant 0 : i32
    return %arg0, %arg1 : i32, i32
  }
}

module attributes {stable_mosaic.version = 11 : i64} {
  func.func @_matmul_bias_res_kernel(%arg0: i32, %arg1: i32, %arg2: memref<16x128xbf16, #tpu.memory_space<vmem>>, %arg3: memref<128x128xbf16, #tpu.memory_space<vmem>>, %arg4: memref<1x128xf32, #tpu.memory_space<vmem>>, %arg5: memref<16x128xf32, #tpu.memory_space<vmem>>, %arg6: memref<16x128xf32, #tpu.memory_space<vmem>>) attributes {dimension_semantics = [#tpu.dimension_semantics<parallel>, #tpu.dimension_semantics<parallel>], iteration_bounds = array<i64: 1, 1>, scalar_prefetch = 0 : i64, scratch_operands = 0 : i64, tpu.core_type = #tpu.core_type<tc>, window_params = [{transform_indices = @transform_0, window_bounds = array<i64: 16, 128>}, {transform_indices = @transform_1, window_bounds = array<i64: 128, 128>}, {transform_indices = @transform_2, window_bounds = array<i64: 1, 128>}, {transform_indices = @transform_3, window_bounds = array<i64: 16, 128>}, {transform_indices = @transform_4, window_bounds = array<i64: 16, 128>}]} {
    %c0 = arith.constant 0 : index
    %c0_0 = arith.constant 0 : index
    %0 = vector.load %arg2[%c0, %c0_0] : memref<16x128xbf16, #tpu.memory_space<vmem>>, vector<16x128xbf16>
    %c0_1 = arith.constant 0 : index
    %c0_2 = arith.constant 0 : index
    %1 = vector.load %arg3[%c0_1, %c0_2] : memref<128x128xbf16, #tpu.memory_space<vmem>>, vector<128x128xbf16>
    %cst = arith.constant dense<0.000000e+00> : vector<16x128xf32>
    %2 = tpu.matmul %0, %1, %cst {dimension_numbers = #tpu.dot_dimension_numbers<[1], [0], [0], [1], [0, 0, 1, 1], [], []>} : vector<16x128xbf16>, vector<128x128xbf16>, vector<16x128xf32> -> vector<16x128xf32>
    %c0_3 = arith.constant 0 : index
    %c0_4 = arith.constant 0 : index
    %3 = vector.load %arg4[%c0_3, %c0_4] : memref<1x128xf32, #tpu.memory_space<vmem>>, vector<1x128xf32>
    %4 = vector.broadcast %3 : vector<1x128xf32> to vector<16x128xf32>
    %5 = arith.addf %2, %4 : vector<16x128xf32>
    %c0_5 = arith.constant 0 : index
    %c0_6 = arith.constant 0 : index
    %6 = vector.load %arg5[%c0_5, %c0_6] : memref<16x128xf32, #tpu.memory_space<vmem>>, vector<16x128xf32>
    %7 = arith.addf %6, %5 : vector<16x128xf32>
    %c0_7 = arith.constant 0 : index
    %c0_8 = arith.constant 0 : index
    %8 = vector.load %arg6[%c0_7, %c0_8] : memref<16x128xf32, #tpu.memory_space<vmem>>, vector<16x128xf32>
    tpu.vector_store %arg6[%c0_7, %c0_8], %7 {strides = array<i32>} : memref<16x128xf32, #tpu.memory_space<vmem>>, vector<16x128xf32>,
    return
  }
  func.func @transform_0(%arg0: i32, %arg1: i32) -> (i32, i32) {
    %c0_i32 = arith.constant 0 : i32
    %c0_i32_0 = arith.constant 0 : i32
    return %arg0, %c0_i32 : i32, i32
  }
  func.func @transform_1(%arg0: i32, %arg1: i32) -> (i32, i32) {
    %c0_i32 = arith.constant 0 : i32
    %c0_i32_0 = arith.constant 0 : i32
    return %c0_i32, %arg1 : i32, i32
  }
  func.func @transform_2(%arg0: i32, %arg1: i32) -> (i32, i32) {
    %c0_i32 = arith.constant 0 : i32
    %c0_i32_0 = arith.constant 0 : i32
    return %c0_i32, %arg1 : i32, i32
  }
  func.func @transform_3(%arg0: i32, %arg1: i32) -> (i32, i32) {
    %c0_i32 = arith.constant 0 : i32
    return %arg0, %arg1 : i32, i32
  }
  func.func @transform_4(%arg0: i32, %arg1: i32) -> (i32, i32) {
    %c0_i32 = arith.constant 0 : i32
    return %arg0, %arg1 : i32, i32
  }
}

module attributes {stable_mosaic.version = 11 : i64} {
  func.func @_flash_attn_kernel(%arg0: i32, %arg1: i32, %arg2: i32, %arg3: memref<2xi32, #tpu.memory_space<smem>>, %arg4: memref<1x8x128xbf16, #tpu.memory_space<vmem>>, %arg5: memref<1x8x128xbf16, #tpu.memory_space<vmem>>, %arg6: memref<1x8x128xbf16, #tpu.memory_space<vmem>>, %arg7: memref<1x8x128xbf16, #tpu.memory_space<vmem>>, %arg8: memref<4x8x1xf32, #tpu.memory_space<vmem>>, %arg9: memref<4x8x1xf32, #tpu.memory_space<vmem>>, %arg10: memref<8x128xf32, #tpu.memory_space<vmem>>) attributes {dimension_semantics = [#tpu.dimension_semantics<parallel>, #tpu.dimension_semantics<parallel>, #tpu.dimension_semantics<arbitrary>], iteration_bounds = array<i64: 2, 1, 1>, scalar_prefetch = 1 : i64, scratch_operands = 3 : i64, tpu.core_type = #tpu.core_type<tc>, window_params = [{transform_indices = @transform_0, window_bounds = array<i64: 1, 8, 128>}, {transform_indices = @transform_1, window_bounds = array<i64: 1, 8, 128>}, {transform_indices = @transform_2, window_bounds = array<i64: 1, 8, 128>}, {transform_indices = @transform_3, window_bounds = array<i64: 1, 8, 128>}]} {
    %c0_i32 = arith.constant 0 : i32
    %0 = arith.cmpi eq, %arg2, %c0_i32 : i32
    %1 = arith.extui %0 : i1 to i32
    %c0_i32_0 = arith.constant 0 : i32
    %2 = arith.cmpi ne, %1, %c0_i32_0 : i32
    scf.if %2 {
      %cst = arith.constant 0xFF800000 : f32
      %12 = vector.broadcast %cst : f32 to vector<4x8x1xf32>
      %c0 = arith.constant 0 : index
      %c0_5 = arith.constant 0 : index
      %c0_6 = arith.constant 0 : index
      %13 = vector.load %arg8[%c0, %c0_5, %c0_6] : memref<4x8x1xf32, #tpu.memory_space<vmem>>, vector<4x8x1xf32>
      tpu.vector_store %arg8[%c0, %c0_5, %c0_6], %12 {strides = array<i32>} : memref<4x8x1xf32, #tpu.memory_space<vmem>>, vector<4x8x1xf32>,
      %cst_7 = arith.constant 0.000000e+00 : f32
      %14 = vector.broadcast %cst_7 : f32 to vector<4x8x1xf32>
      %c0_8 = arith.constant 0 : index
      %c0_9 = arith.constant 0 : index
      %c0_10 = arith.constant 0 : index
      %15 = vector.load %arg9[%c0_8, %c0_9, %c0_10] : memref<4x8x1xf32, #tpu.memory_space<vmem>>, vector<4x8x1xf32>
      tpu.vector_store %arg9[%c0_8, %c0_9, %c0_10], %14 {strides = array<i32>} : memref<4x8x1xf32, #tpu.memory_space<vmem>>, vector<4x8x1xf32>,
      %cst_11 = arith.constant 0.000000e+00 : f32
      %16 = vector.broadcast %cst_11 : f32 to vector<8x128xf32>
      %c0_12 = arith.constant 0 : index
      %c0_13 = arith.constant 0 : index
      %17 = vector.load %arg10[%c0_12, %c0_13] : memref<8x128xf32, #tpu.memory_space<vmem>>, vector<8x128xf32>
      tpu.vector_store %arg10[%c0_12, %c0_13], %16 {strides = array<i32>} : memref<8x128xf32, #tpu.memory_space<vmem>>, vector<8x128xf32>,
    } else {
    }
    %c8_i32 = arith.constant 8 : i32
    %3 = arith.muli %arg2, %c8_i32 : i32
    %c8_i32_1 = arith.constant 8 : i32
    %4 = arith.muli %arg1, %c8_i32_1 : i32
    %c7_i32 = arith.constant 7 : i32
    %5 = arith.addi %4, %c7_i32 : i32
    %6 = arith.cmpi sle, %3, %5 : i32
    %7 = arith.extui %6 : i1 to i32
    %c0_i32_2 = arith.constant 0 : i32
    %8 = arith.cmpi ne, %7, %c0_i32_2 : i32
    scf.if %8 {
      %c0 = arith.constant 0 : index
      %c0_5 = arith.constant 0 : index
      %c0_6 = arith.constant 0 : index
      %12 = vector.load %arg4[%c0, %c0_5, %c0_6] : memref<1x8x128xbf16, #tpu.memory_space<vmem>>, vector<1x8x128xbf16>
      %13 = vector.shape_cast %12 : vector<1x8x128xbf16> to vector<8x128xbf16>
      %c0_7 = arith.constant 0 : index
      %c0_8 = arith.constant 0 : index
      %c0_9 = arith.constant 0 : index
      %14 = vector.load %arg5[%c0_7, %c0_8, %c0_9] : memref<1x8x128xbf16, #tpu.memory_space<vmem>>, vector<1x8x128xbf16>
      %15 = vector.shape_cast %14 : vector<1x8x128xbf16> to vector<8x128xbf16>
      %c0_10 = arith.constant 0 : index
      %c0_11 = arith.constant 0 : index
      %c0_12 = arith.constant 0 : index
      %16 = vector.load %arg6[%c0_10, %c0_11, %c0_12] : memref<1x8x128xbf16, #tpu.memory_space<vmem>>, vector<1x8x128xbf16>
      %17 = vector.shape_cast %16 : vector<1x8x128xbf16> to vector<8x128xbf16>
      %18 = arith.index_cast %arg0 : i32 to index
      %19 = memref.load %arg3[%18] : memref<2xi32, #tpu.memory_space<smem>>
      %c8_i32_13 = arith.constant 8 : i32
      %20 = arith.muli %arg1, %c8_i32_13 : i32
      %21 = tpu.iota {dimensions = array<i32: 0>} : vector<8x8xi32>
      %22 = vector.broadcast %20 : i32 to vector<8x8xi32>
      %23 = arith.addi %22, %21 : vector<8x8xi32>
      %c8_i32_14 = arith.constant 8 : i32
      %24 = arith.muli %arg2, %c8_i32_14 : i32
      %25 = tpu.iota {dimensions = array<i32: 1>} : vector<8x8xi32>
      %26 = vector.broadcast %24 : i32 to vector<8x8xi32>
      %27 = arith.addi %26, %25 : vector<8x8xi32>
      %28 = arith.cmpi sge, %23, %27 : vector<8x8xi32>
      %29 = vector.broadcast %19 : i32 to vector<8x8xi32>
      %30 = arith.cmpi slt, %27, %29 : vector<8x8xi32>
      %31 = arith.andi %28, %30 : vector<8x8xi1>
      %32 = vector.extract_strided_slice %13 {offsets = [0, 0], sizes = [8, 32], strides = [1, 1]} : vector<8x128xbf16> to vector<8x32xbf16>
      %33 = vector.extract_strided_slice %15 {offsets = [0, 0], sizes = [8, 32], strides = [1, 1]} : vector<8x128xbf16> to vector<8x32xbf16>
      %34 = vector.extract_strided_slice %17 {offsets = [0, 0], sizes = [8, 32], strides = [1, 1]} : vector<8x128xbf16> to vector<8x32xbf16>
      %cst = arith.constant dense<0.000000e+00> : vector<8x8xf32>
      %35 = tpu.matmul %32, %33, %cst {dimension_numbers = #tpu.dot_dimension_numbers<[1], [1], [0], [0], [0, 0, 1, 0], [], []>} : vector<8x32xbf16>, vector<8x32xbf16>, vector<8x8xf32> -> vector<8x8xf32>
      %cst_15 = arith.constant 0.176776692 : f32
      %36 = vector.broadcast %cst_15 : f32 to vector<8x8xf32>
      %37 = arith.mulf %35, %36 : vector<8x8xf32>
      %cst_16 = arith.constant -1.000000e+09 : f32
      %38 = vector.broadcast %cst_16 : f32 to vector<8x8xf32>
      %39 = arith.select %31, %37, %38 : vector<8x8xi1>, vector<8x8xf32>
      %c0_17 = arith.constant 0 : index
      %c0_18 = arith.constant 0 : index
      %c0_19 = arith.constant 0 : index
      %40 = vector.load %arg8[%c0_17, %c0_18, %c0_19] : memref<4x8x1xf32, #tpu.memory_space<vmem>>, vector<1x8x1xf32>
      %41 = vector.shape_cast %40 : vector<1x8x1xf32> to vector<8x1xf32>
      %cst_20 = arith.constant dense<0xFF800000> : vector<8xf32>
      %42 = vector.multi_reduction <maximumf>, %39, %cst_20 [1] : vector<8x8xf32> to vector<8xf32>
      %43 = vector.shape_cast %42 : vector<8xf32> to vector<8x1xf32>
      %44 = arith.maximumf %41, %43 : vector<8x1xf32>
      %45 = arith.subf %41, %44 : vector<8x1xf32>
      %46 = math.exp %45 : vector<8x1xf32>
      %47 = vector.broadcast %44 : vector<8x1xf32> to vector<8x8xf32>
      %48 = arith.subf %39, %47 : vector<8x8xf32>
      %49 = math.exp %48 : vector<8x8xf32>
      %c0_21 = arith.constant 0 : index
      %c0_22 = arith.constant 0 : index
      %c0_23 = arith.constant 0 : index
      %50 = vector.load %arg9[%c0_21, %c0_22, %c0_23] : memref<4x8x1xf32, #tpu.memory_space<vmem>>, vector<1x8x1xf32>
      %51 = vector.shape_cast %50 : vector<1x8x1xf32> to vector<8x1xf32>
      %52 = arith.mulf %46, %51 : vector<8x1xf32>
      %cst_24 = arith.constant dense<0.000000e+00> : vector<8xf32>
      %53 = vector.multi_reduction <add>, %49, %cst_24 [1] : vector<8x8xf32> to vector<8xf32>
      %54 = vector.shape_cast %53 : vector<8xf32> to vector<8x1xf32>
      %55 = arith.addf %52, %54 : vector<8x1xf32>
      %c0_25 = arith.constant 0 : index
      %c0_26 = arith.constant 0 : index
      %c0_27 = arith.constant 0 : index
      %56 = vector.load %arg9[%c0_25, %c0_26, %c0_27] : memref<4x8x1xf32, #tpu.memory_space<vmem>>, vector<1x8x1xf32>
      %57 = vector.shape_cast %56 : vector<1x8x1xf32> to vector<8x1xf32>
      %58 = vector.shape_cast %55 : vector<8x1xf32> to vector<1x8x1xf32>
      tpu.vector_store %arg9[%c0_25, %c0_26, %c0_27], %58 {strides = array<i32>} : memref<4x8x1xf32, #tpu.memory_space<vmem>>, vector<1x8x1xf32>,
      %c0_28 = arith.constant 0 : index
      %c0_29 = arith.constant 0 : index
      %59 = vector.load %arg10[%c0_28, %c0_29] : memref<8x128xf32, #tpu.memory_space<vmem>>, vector<8x32xf32>
      %60 = vector.broadcast %46 : vector<8x1xf32> to vector<8x32xf32>
      %61 = arith.mulf %60, %59 : vector<8x32xf32>
      %62 = arith.truncf %49 : vector<8x8xf32> to vector<8x8xbf16>
      %cst_30 = arith.constant dense<0.000000e+00> : vector<8x32xf32>
      %63 = tpu.matmul %62, %34, %cst_30 {dimension_numbers = #tpu.dot_dimension_numbers<[1], [0], [0], [1], [0, 0, 1, 1], [], []>} : vector<8x8xbf16>, vector<8x32xbf16>, vector<8x32xf32> -> vector<8x32xf32>
      %64 = arith.addf %61, %63 : vector<8x32xf32>
      %c0_31 = arith.constant 0 : index
      %c0_32 = arith.constant 0 : index
      %65 = vector.load %arg10[%c0_31, %c0_32] : memref<8x128xf32, #tpu.memory_space<vmem>>, vector<8x32xf32>
      tpu.vector_store %arg10[%c0_31, %c0_32], %64 {strides = array<i32>} : memref<8x128xf32, #tpu.memory_space<vmem>>, vector<8x32xf32>,
      %c0_33 = arith.constant 0 : index
      %c0_34 = arith.constant 0 : index
      %c0_35 = arith.constant 0 : index
      %66 = vector.load %arg8[%c0_33, %c0_34, %c0_35] : memref<4x8x1xf32, #tpu.memory_space<vmem>>, vector<1x8x1xf32>
      %67 = vector.shape_cast %66 : vector<1x8x1xf32> to vector<8x1xf32>
      %68 = vector.shape_cast %44 : vector<8x1xf32> to vector<1x8x1xf32>
      tpu.vector_store %arg8[%c0_33, %c0_34, %c0_35], %68 {strides = array<i32>} : memref<4x8x1xf32, #tpu.memory_space<vmem>>, vector<1x8x1xf32>,
      %69 = vector.extract_strided_slice %13 {offsets = [0, 32], sizes = [8, 32], strides = [1, 1]} : vector<8x128xbf16> to vector<8x32xbf16>
      %70 = vector.extract_strided_slice %15 {offsets = [0, 32], sizes = [8, 32], strides = [1, 1]} : vector<8x128xbf16> to vector<8x32xbf16>
      %71 = vector.extract_strided_slice %17 {offsets = [0, 32], sizes = [8, 32], strides = [1, 1]} : vector<8x128xbf16> to vector<8x32xbf16>
      %cst_36 = arith.constant dense<0.000000e+00> : vector<8x8xf32>
      %72 = tpu.matmul %69, %70, %cst_36 {dimension_numbers = #tpu.dot_dimension_numbers<[1], [1], [0], [0], [0, 0, 1, 0], [], []>} : vector<8x32xbf16>, vector<8x32xbf16>, vector<8x8xf32> -> vector<8x8xf32>
      %cst_37 = arith.constant 0.176776692 : f32
      %73 = vector.broadcast %cst_37 : f32 to vector<8x8xf32>
      %74 = arith.mulf %72, %73 : vector<8x8xf32>
      %cst_38 = arith.constant -1.000000e+09 : f32
      %75 = vector.broadcast %cst_38 : f32 to vector<8x8xf32>
      %76 = arith.select %31, %74, %75 : vector<8x8xi1>, vector<8x8xf32>
      %c1 = arith.constant 1 : index
      %c0_39 = arith.constant 0 : index
      %c0_40 = arith.constant 0 : index
      %77 = vector.load %arg8[%c1, %c0_39, %c0_40] : memref<4x8x1xf32, #tpu.memory_space<vmem>>, vector<1x8x1xf32>
      %78 = vector.shape_cast %77 : vector<1x8x1xf32> to vector<8x1xf32>
      %cst_41 = arith.constant dense<0xFF800000> : vector<8xf32>
      %79 = vector.multi_reduction <maximumf>, %76, %cst_41 [1] : vector<8x8xf32> to vector<8xf32>
      %80 = vector.shape_cast %79 : vector<8xf32> to vector<8x1xf32>
      %81 = arith.maximumf %78, %80 : vector<8x1xf32>
      %82 = arith.subf %78, %81 : vector<8x1xf32>
      %83 = math.exp %82 : vector<8x1xf32>
      %84 = vector.broadcast %81 : vector<8x1xf32> to vector<8x8xf32>
      %85 = arith.subf %76, %84 : vector<8x8xf32>
      %86 = math.exp %85 : vector<8x8xf32>
      %c1_42 = arith.constant 1 : index
      %c0_43 = arith.constant 0 : index
      %c0_44 = arith.constant 0 : index
      %87 = vector.load %arg9[%c1_42, %c0_43, %c0_44] : memref<4x8x1xf32, #tpu.memory_space<vmem>>, vector<1x8x1xf32>
      %88 = vector.shape_cast %87 : vector<1x8x1xf32> to vector<8x1xf32>
      %89 = arith.mulf %83, %88 : vector<8x1xf32>
      %cst_45 = arith.constant dense<0.000000e+00> : vector<8xf32>
      %90 = vector.multi_reduction <add>, %86, %cst_45 [1] : vector<8x8xf32> to vector<8xf32>
      %91 = vector.shape_cast %90 : vector<8xf32> to vector<8x1xf32>
      %92 = arith.addf %89, %91 : vector<8x1xf32>
      %c1_46 = arith.constant 1 : index
      %c0_47 = arith.constant 0 : index
      %c0_48 = arith.constant 0 : index
      %93 = vector.load %arg9[%c1_46, %c0_47, %c0_48] : memref<4x8x1xf32, #tpu.memory_space<vmem>>, vector<1x8x1xf32>
      %94 = vector.shape_cast %93 : vector<1x8x1xf32> to vector<8x1xf32>
      %95 = vector.shape_cast %92 : vector<8x1xf32> to vector<1x8x1xf32>
      tpu.vector_store %arg9[%c1_46, %c0_47, %c0_48], %95 {strides = array<i32>} : memref<4x8x1xf32, #tpu.memory_space<vmem>>, vector<1x8x1xf32>,
      %c0_49 = arith.constant 0 : index
      %c32 = arith.constant 32 : index
      %96 = vector.load %arg10[%c0_49, %c32] : memref<8x128xf32, #tpu.memory_space<vmem>>, vector<8x32xf32>
      %97 = vector.broadcast %83 : vector<8x1xf32> to vector<8x32xf32>
      %98 = arith.mulf %97, %96 : vector<8x32xf32>
      %99 = arith.truncf %86 : vector<8x8xf32> to vector<8x8xbf16>
      %cst_50 = arith.constant dense<0.000000e+00> : vector<8x32xf32>
      %100 = tpu.matmul %99, %71, %cst_50 {dimension_numbers = #tpu.dot_dimension_numbers<[1], [0], [0], [1], [0, 0, 1, 1], [], []>} : vector<8x8xbf16>, vector<8x32xbf16>, vector<8x32xf32> -> vector<8x32xf32>
      %101 = arith.addf %98, %100 : vector<8x32xf32>
      %c0_51 = arith.constant 0 : index
      %c32_52 = arith.constant 32 : index
      %102 = vector.load %arg10[%c0_51, %c32_52] : memref<8x128xf32, #tpu.memory_space<vmem>>, vector<8x32xf32>
      tpu.vector_store %arg10[%c0_51, %c32_52], %101 {strides = array<i32>} : memref<8x128xf32, #tpu.memory_space<vmem>>, vector<8x32xf32>,
      %c1_53 = arith.constant 1 : index
      %c0_54 = arith.constant 0 : index
      %c0_55 = arith.constant 0 : index
      %103 = vector.load %arg8[%c1_53, %c0_54, %c0_55] : memref<4x8x1xf32, #tpu.memory_space<vmem>>, vector<1x8x1xf32>
      %104 = vector.shape_cast %103 : vector<1x8x1xf32> to vector<8x1xf32>
      %105 = vector.shape_cast %81 : vector<8x1xf32> to vector<1x8x1xf32>
      tpu.vector_store %arg8[%c1_53, %c0_54, %c0_55], %105 {strides = array<i32>} : memref<4x8x1xf32, #tpu.memory_space<vmem>>, vector<1x8x1xf32>,
      %106 = vector.extract_strided_slice %13 {offsets = [0, 64], sizes = [8, 32], strides = [1, 1]} : vector<8x128xbf16> to vector<8x32xbf16>
      %107 = vector.extract_strided_slice %15 {offsets = [0, 64], sizes = [8, 32], strides = [1, 1]} : vector<8x128xbf16> to vector<8x32xbf16>
      %108 = vector.extract_strided_slice %17 {offsets = [0, 64], sizes = [8, 32], strides = [1, 1]} : vector<8x128xbf16> to vector<8x32xbf16>
      %cst_56 = arith.constant dense<0.000000e+00> : vector<8x8xf32>
      %109 = tpu.matmul %106, %107, %cst_56 {dimension_numbers = #tpu.dot_dimension_numbers<[1], [1], [0], [0], [0, 0, 1, 0], [], []>} : vector<8x32xbf16>, vector<8x32xbf16>, vector<8x8xf32> -> vector<8x8xf32>
      %cst_57 = arith.constant 0.176776692 : f32
      %110 = vector.broadcast %cst_57 : f32 to vector<8x8xf32>
      %111 = arith.mulf %109, %110 : vector<8x8xf32>
      %cst_58 = arith.constant -1.000000e+09 : f32
      %112 = vector.broadcast %cst_58 : f32 to vector<8x8xf32>
      %113 = arith.select %31, %111, %112 : vector<8x8xi1>, vector<8x8xf32>
      %c2 = arith.constant 2 : index
      %c0_59 = arith.constant 0 : index
      %c0_60 = arith.constant 0 : index
      %114 = vector.load %arg8[%c2, %c0_59, %c0_60] : memref<4x8x1xf32, #tpu.memory_space<vmem>>, vector<1x8x1xf32>
      %115 = vector.shape_cast %114 : vector<1x8x1xf32> to vector<8x1xf32>
      %cst_61 = arith.constant dense<0xFF800000> : vector<8xf32>
      %116 = vector.multi_reduction <maximumf>, %113, %cst_61 [1] : vector<8x8xf32> to vector<8xf32>
      %117 = vector.shape_cast %116 : vector<8xf32> to vector<8x1xf32>
      %118 = arith.maximumf %115, %117 : vector<8x1xf32>
      %119 = arith.subf %115, %118 : vector<8x1xf32>
      %120 = math.exp %119 : vector<8x1xf32>
      %121 = vector.broadcast %118 : vector<8x1xf32> to vector<8x8xf32>
      %122 = arith.subf %113, %121 : vector<8x8xf32>
      %123 = math.exp %122 : vector<8x8xf32>
      %c2_62 = arith.constant 2 : index
      %c0_63 = arith.constant 0 : index
      %c0_64 = arith.constant 0 : index
      %124 = vector.load %arg9[%c2_62, %c0_63, %c0_64] : memref<4x8x1xf32, #tpu.memory_space<vmem>>, vector<1x8x1xf32>
      %125 = vector.shape_cast %124 : vector<1x8x1xf32> to vector<8x1xf32>
      %126 = arith.mulf %120, %125 : vector<8x1xf32>
      %cst_65 = arith.constant dense<0.000000e+00> : vector<8xf32>
      %127 = vector.multi_reduction <add>, %123, %cst_65 [1] : vector<8x8xf32> to vector<8xf32>
      %128 = vector.shape_cast %127 : vector<8xf32> to vector<8x1xf32>
      %129 = arith.addf %126, %128 : vector<8x1xf32>
      %c2_66 = arith.constant 2 : index
      %c0_67 = arith.constant 0 : index
      %c0_68 = arith.constant 0 : index
      %130 = vector.load %arg9[%c2_66, %c0_67, %c0_68] : memref<4x8x1xf32, #tpu.memory_space<vmem>>, vector<1x8x1xf32>
      %131 = vector.shape_cast %130 : vector<1x8x1xf32> to vector<8x1xf32>
      %132 = vector.shape_cast %129 : vector<8x1xf32> to vector<1x8x1xf32>
      tpu.vector_store %arg9[%c2_66, %c0_67, %c0_68], %132 {strides = array<i32>} : memref<4x8x1xf32, #tpu.memory_space<vmem>>, vector<1x8x1xf32>,
      %c0_69 = arith.constant 0 : index
      %c64 = arith.constant 64 : index
      %133 = vector.load %arg10[%c0_69, %c64] : memref<8x128xf32, #tpu.memory_space<vmem>>, vector<8x32xf32>
      %134 = vector.broadcast %120 : vector<8x1xf32> to vector<8x32xf32>
      %135 = arith.mulf %134, %133 : vector<8x32xf32>
      %136 = arith.truncf %123 : vector<8x8xf32> to vector<8x8xbf16>
      %cst_70 = arith.constant dense<0.000000e+00> : vector<8x32xf32>
      %137 = tpu.matmul %136, %108, %cst_70 {dimension_numbers = #tpu.dot_dimension_numbers<[1], [0], [0], [1], [0, 0, 1, 1], [], []>} : vector<8x8xbf16>, vector<8x32xbf16>, vector<8x32xf32> -> vector<8x32xf32>
      %138 = arith.addf %135, %137 : vector<8x32xf32>
      %c0_71 = arith.constant 0 : index
      %c64_72 = arith.constant 64 : index
      %139 = vector.load %arg10[%c0_71, %c64_72] : memref<8x128xf32, #tpu.memory_space<vmem>>, vector<8x32xf32>
      tpu.vector_store %arg10[%c0_71, %c64_72], %138 {strides = array<i32>} : memref<8x128xf32, #tpu.memory_space<vmem>>, vector<8x32xf32>,
      %c2_73 = arith.constant 2 : index
      %c0_74 = arith.constant 0 : index
      %c0_75 = arith.constant 0 : index
      %140 = vector.load %arg8[%c2_73, %c0_74, %c0_75] : memref<4x8x1xf32, #tpu.memory_space<vmem>>, vector<1x8x1xf32>
      %141 = vector.shape_cast %140 : vector<1x8x1xf32> to vector<8x1xf32>
      %142 = vector.shape_cast %118 : vector<8x1xf32> to vector<1x8x1xf32>
      tpu.vector_store %arg8[%c2_73, %c0_74, %c0_75], %142 {strides = array<i32>} : memref<4x8x1xf32, #tpu.memory_space<vmem>>, vector<1x8x1xf32>,
      %143 = vector.extract_strided_slice %13 {offsets = [0, 96], sizes = [8, 32], strides = [1, 1]} : vector<8x128xbf16> to vector<8x32xbf16>
      %144 = vector.extract_strided_slice %15 {offsets = [0, 96], sizes = [8, 32], strides = [1, 1]} : vector<8x128xbf16> to vector<8x32xbf16>
      %145 = vector.extract_strided_slice %17 {offsets = [0, 96], sizes = [8, 32], strides = [1, 1]} : vector<8x128xbf16> to vector<8x32xbf16>
      %cst_76 = arith.constant dense<0.000000e+00> : vector<8x8xf32>
      %146 = tpu.matmul %143, %144, %cst_76 {dimension_numbers = #tpu.dot_dimension_numbers<[1], [1], [0], [0], [0, 0, 1, 0], [], []>} : vector<8x32xbf16>, vector<8x32xbf16>, vector<8x8xf32> -> vector<8x8xf32>
      %cst_77 = arith.constant 0.176776692 : f32
      %147 = vector.broadcast %cst_77 : f32 to vector<8x8xf32>
      %148 = arith.mulf %146, %147 : vector<8x8xf32>
      %cst_78 = arith.constant -1.000000e+09 : f32
      %149 = vector.broadcast %cst_78 : f32 to vector<8x8xf32>
      %150 = arith.select %31, %148, %149 : vector<8x8xi1>, vector<8x8xf32>
      %c3 = arith.constant 3 : index
      %c0_79 = arith.constant 0 : index
      %c0_80 = arith.constant 0 : index
      %151 = vector.load %arg8[%c3, %c0_79, %c0_80] : memref<4x8x1xf32, #tpu.memory_space<vmem>>, vector<1x8x1xf32>
      %152 = vector.shape_cast %151 : vector<1x8x1xf32> to vector<8x1xf32>
      %cst_81 = arith.constant dense<0xFF800000> : vector<8xf32>
      %153 = vector.multi_reduction <maximumf>, %150, %cst_81 [1] : vector<8x8xf32> to vector<8xf32>
      %154 = vector.shape_cast %153 : vector<8xf32> to vector<8x1xf32>
      %155 = arith.maximumf %152, %154 : vector<8x1xf32>
      %156 = arith.subf %152, %155 : vector<8x1xf32>
      %157 = math.exp %156 : vector<8x1xf32>
      %158 = vector.broadcast %155 : vector<8x1xf32> to vector<8x8xf32>
      %159 = arith.subf %150, %158 : vector<8x8xf32>
      %160 = math.exp %159 : vector<8x8xf32>
      %c3_82 = arith.constant 3 : index
      %c0_83 = arith.constant 0 : index
      %c0_84 = arith.constant 0 : index
      %161 = vector.load %arg9[%c3_82, %c0_83, %c0_84] : memref<4x8x1xf32, #tpu.memory_space<vmem>>, vector<1x8x1xf32>
      %162 = vector.shape_cast %161 : vector<1x8x1xf32> to vector<8x1xf32>
      %163 = arith.mulf %157, %162 : vector<8x1xf32>
      %cst_85 = arith.constant dense<0.000000e+00> : vector<8xf32>
      %164 = vector.multi_reduction <add>, %160, %cst_85 [1] : vector<8x8xf32> to vector<8xf32>
      %165 = vector.shape_cast %164 : vector<8xf32> to vector<8x1xf32>
      %166 = arith.addf %163, %165 : vector<8x1xf32>
      %c3_86 = arith.constant 3 : index
      %c0_87 = arith.constant 0 : index
      %c0_88 = arith.constant 0 : index
      %167 = vector.load %arg9[%c3_86, %c0_87, %c0_88] : memref<4x8x1xf32, #tpu.memory_space<vmem>>, vector<1x8x1xf32>
      %168 = vector.shape_cast %167 : vector<1x8x1xf32> to vector<8x1xf32>
      %169 = vector.shape_cast %166 : vector<8x1xf32> to vector<1x8x1xf32>
      tpu.vector_store %arg9[%c3_86, %c0_87, %c0_88], %169 {strides = array<i32>} : memref<4x8x1xf32, #tpu.memory_space<vmem>>, vector<1x8x1xf32>,
      %c0_89 = arith.constant 0 : index
      %c96 = arith.constant 96 : index
      %170 = vector.load %arg10[%c0_89, %c96] : memref<8x128xf32, #tpu.memory_space<vmem>>, vector<8x32xf32>
      %171 = vector.broadcast %157 : vector<8x1xf32> to vector<8x32xf32>
      %172 = arith.mulf %171, %170 : vector<8x32xf32>
      %173 = arith.truncf %160 : vector<8x8xf32> to vector<8x8xbf16>
      %cst_90 = arith.constant dense<0.000000e+00> : vector<8x32xf32>
      %174 = tpu.matmul %173, %145, %cst_90 {dimension_numbers = #tpu.dot_dimension_numbers<[1], [0], [0], [1], [0, 0, 1, 1], [], []>} : vector<8x8xbf16>, vector<8x32xbf16>, vector<8x32xf32> -> vector<8x32xf32>
      %175 = arith.addf %172, %174 : vector<8x32xf32>
      %c0_91 = arith.constant 0 : index
      %c96_92 = arith.constant 96 : index
      %176 = vector.load %arg10[%c0_91, %c96_92] : memref<8x128xf32, #tpu.memory_space<vmem>>, vector<8x32xf32>
      tpu.vector_store %arg10[%c0_91, %c96_92], %175 {strides = array<i32>} : memref<8x128xf32, #tpu.memory_space<vmem>>, vector<8x32xf32>,
      %c3_93 = arith.constant 3 : index
      %c0_94 = arith.constant 0 : index
      %c0_95 = arith.constant 0 : index
      %177 = vector.load %arg8[%c3_93, %c0_94, %c0_95] : memref<4x8x1xf32, #tpu.memory_space<vmem>>, vector<1x8x1xf32>
      %178 = vector.shape_cast %177 : vector<1x8x1xf32> to vector<8x1xf32>
      %179 = vector.shape_cast %155 : vector<8x1xf32> to vector<1x8x1xf32>
      tpu.vector_store %arg8[%c3_93, %c0_94, %c0_95], %179 {strides = array<i32>} : memref<4x8x1xf32, #tpu.memory_space<vmem>>, vector<1x8x1xf32>,
    } else {
    }
    %c0_i32_3 = arith.constant 0 : i32
    %9 = arith.cmpi eq, %arg2, %c0_i32_3 : i32
    %10 = arith.extui %9 : i1 to i32
    %c0_i32_4 = arith.constant 0 : i32
    %11 = arith.cmpi ne, %10, %c0_i32_4 : i32
    scf.if %11 {
      %c0 = arith.constant 0 : index
      %c0_5 = arith.constant 0 : index
      %c0_6 = arith.constant 0 : index
      %12 = vector.load %arg9[%c0, %c0_5, %c0_6] : memref<4x8x1xf32, #tpu.memory_space<vmem>>, vector<1x8x1xf32>
      %13 = vector.shape_cast %12 : vector<1x8x1xf32> to vector<8x1xf32>
      %14 = tpu.reciprocal %13 {approx = true} : vector<8x1xf32> -> vector<8x1xf32>
      %c0_7 = arith.constant 0 : index
      %c0_8 = arith.constant 0 : index
      %15 = vector.load %arg10[%c0_7, %c0_8] : memref<8x128xf32, #tpu.memory_space<vmem>>, vector<8x32xf32>
      %16 = vector.broadcast %14 : vector<8x1xf32> to vector<8x32xf32>
      %17 = arith.mulf %15, %16 : vector<8x32xf32>
      %c0_9 = arith.constant 0 : index
      %c0_10 = arith.constant 0 : index
      %18 = vector.load %arg10[%c0_9, %c0_10] : memref<8x128xf32, #tpu.memory_space<vmem>>, vector<8x32xf32>
      tpu.vector_store %arg10[%c0_9, %c0_10], %17 {strides = array<i32>} : memref<8x128xf32, #tpu.memory_space<vmem>>, vector<8x32xf32>,
      %c1 = arith.constant 1 : index
      %c0_11 = arith.constant 0 : index
      %c0_12 = arith.constant 0 : index
      %19 = vector.load %arg9[%c1, %c0_11, %c0_12] : memref<4x8x1xf32, #tpu.memory_space<vmem>>, vector<1x8x1xf32>
      %20 = vector.shape_cast %19 : vector<1x8x1xf32> to vector<8x1xf32>
      %21 = tpu.reciprocal %20 {approx = true} : vector<8x1xf32> -> vector<8x1xf32>
      %c0_13 = arith.constant 0 : index
      %c32 = arith.constant 32 : index
      %22 = vector.load %arg10[%c0_13, %c32] : memref<8x128xf32, #tpu.memory_space<vmem>>, vector<8x32xf32>
      %23 = vector.broadcast %21 : vector<8x1xf32> to vector<8x32xf32>
      %24 = arith.mulf %22, %23 : vector<8x32xf32>
      %c0_14 = arith.constant 0 : index
      %c32_15 = arith.constant 32 : index
      %25 = vector.load %arg10[%c0_14, %c32_15] : memref<8x128xf32, #tpu.memory_space<vmem>>, vector<8x32xf32>
      tpu.vector_store %arg10[%c0_14, %c32_15], %24 {strides = array<i32>} : memref<8x128xf32, #tpu.memory_space<vmem>>, vector<8x32xf32>,
      %c2 = arith.constant 2 : index
      %c0_16 = arith.constant 0 : index
      %c0_17 = arith.constant 0 : index
      %26 = vector.load %arg9[%c2, %c0_16, %c0_17] : memref<4x8x1xf32, #tpu.memory_space<vmem>>, vector<1x8x1xf32>
      %27 = vector.shape_cast %26 : vector<1x8x1xf32> to vector<8x1xf32>
      %28 = tpu.reciprocal %27 {approx = true} : vector<8x1xf32> -> vector<8x1xf32>
      %c0_18 = arith.constant 0 : index
      %c64 = arith.constant 64 : index
      %29 = vector.load %arg10[%c0_18, %c64] : memref<8x128xf32, #tpu.memory_space<vmem>>, vector<8x32xf32>
      %30 = vector.broadcast %28 : vector<8x1xf32> to vector<8x32xf32>
      %31 = arith.mulf %29, %30 : vector<8x32xf32>
      %c0_19 = arith.constant 0 : index
      %c64_20 = arith.constant 64 : index
      %32 = vector.load %arg10[%c0_19, %c64_20] : memref<8x128xf32, #tpu.memory_space<vmem>>, vector<8x32xf32>
      tpu.vector_store %arg10[%c0_19, %c64_20], %31 {strides = array<i32>} : memref<8x128xf32, #tpu.memory_space<vmem>>, vector<8x32xf32>,
      %c3 = arith.constant 3 : index
      %c0_21 = arith.constant 0 : index
      %c0_22 = arith.constant 0 : index
      %33 = vector.load %arg9[%c3, %c0_21, %c0_22] : memref<4x8x1xf32, #tpu.memory_space<vmem>>, vector<1x8x1xf32>
      %34 = vector.shape_cast %33 : vector<1x8x1xf32> to vector<8x1xf32>
      %35 = tpu.reciprocal %34 {approx = true} : vector<8x1xf32> -> vector<8x1xf32>
      %c0_23 = arith.constant 0 : index
      %c96 = arith.constant 96 : index
      %36 = vector.load %arg10[%c0_23, %c96] : memref<8x128xf32, #tpu.memory_space<vmem>>, vector<8x32xf32>
      %37 = vector.broadcast %35 : vector<8x1xf32> to vector<8x32xf32>
      %38 = arith.mulf %36, %37 : vector<8x32xf32>
      %c0_24 = arith.constant 0 : index
      %c96_25 = arith.constant 96 : index
      %39 = vector.load %arg10[%c0_24, %c96_25] : memref<8x128xf32, #tpu.memory_space<vmem>>, vector<8x32xf32>
      tpu.vector_store %arg10[%c0_24, %c96_25], %38 {strides = array<i32>} : memref<8x128xf32, #tpu.memory_space<vmem>>, vector<8x32xf32>,
      %c0_26 = arith.constant 0 : index
      %c0_27 = arith.constant 0 : index
      %40 = vector.load %arg10[%c0_26, %c0_27] : memref<8x128xf32, #tpu.memory_space<vmem>>, vector<8x128xf32>
      %41 = arith.truncf %40 : vector<8x128xf32> to vector<8x128xbf16>
      %c0_28 = arith.constant 0 : index
      %c0_29 = arith.constant 0 : index
      %c0_30 = arith.constant 0 : index
      %42 = vector.load %arg7[%c0_28, %c0_29, %c0_30] : memref<1x8x128xbf16, #tpu.memory_space<vmem>>, vector<1x8x128xbf16>
      %43 = vector.shape_cast %42 : vector<1x8x128xbf16> to vector<8x128xbf16>
      %44 = vector.shape_cast %41 : vector<8x128xbf16> to vector<1x8x128xbf16>
      tpu.vector_store %arg7[%c0_28, %c0_29, %c0_30], %44 {strides = array<i32>} : memref<1x8x128xbf16, #tpu.memory_space<vmem>>, vector<1x8x128xbf16>,
    } else {
    }
    return
  }
  func.func @transform_0(%arg0: i32, %arg1: i32, %arg2: i32, %arg3: memref<2xi32, #tpu.memory_space<smem>>) -> (i32, i32, i32) {
    %c0_i32 = arith.constant 0 : i32
    %c0_i32_0 = arith.constant 0 : i32
    return %arg0, %arg1, %c0_i32 : i32, i32, i32
  }
  func.func @transform_1(%arg0: i32, %arg1: i32, %arg2: i32, %arg3: memref<2xi32, #tpu.memory_space<smem>>) -> (i32, i32, i32) {
    %c0_i32 = arith.constant 0 : i32
    %c0_i32_0 = arith.constant 0 : i32
    return %arg0, %arg2, %c0_i32 : i32, i32, i32
  }
  func.func @transform_2(%arg0: i32, %arg1: i32, %arg2: i32, %arg3: memref<2xi32, #tpu.memory_space<smem>>) -> (i32, i32, i32) {
    %c0_i32 = arith.constant 0 : i32
    %c0_i32_0 = arith.constant 0 : i32
    return %arg0, %arg2, %c0_i32 : i32, i32, i32
  }
  func.func @transform_3(%arg0: i32, %arg1: i32, %arg2: i32, %arg3: memref<2xi32, #tpu.memory_space<smem>>) -> (i32, i32, i32) {
    %c0_i32 = arith.constant 0 : i32
    %c0_i32_0 = arith.constant 0 : i32
    return %arg0, %arg1, %c0_i32 : i32, i32, i32
  }
}

module attributes {stable_mosaic.version = 11 : i64} {
  func.func @_ln_mlp_res_kernel(%arg0: i32, %arg1: i32, %arg2: memref<16x128xf32, #tpu.memory_space<vmem>>, %arg3: memref<1x128xf32, #tpu.memory_space<vmem>>, %arg4: memref<1x128xf32, #tpu.memory_space<vmem>>, %arg5: memref<128x512xbf16, #tpu.memory_space<vmem>>, %arg6: memref<1x512xf32, #tpu.memory_space<vmem>>, %arg7: memref<512x128xbf16, #tpu.memory_space<vmem>>, %arg8: memref<1x128xf32, #tpu.memory_space<vmem>>, %arg9: memref<16x128xf32, #tpu.memory_space<vmem>>, %arg10: memref<16x128xbf16, #tpu.memory_space<vmem>>, %arg11: memref<16x128xf32, #tpu.memory_space<vmem>>) attributes {dimension_semantics = [#tpu.dimension_semantics<parallel>, #tpu.dimension_semantics<arbitrary>], iteration_bounds = array<i64: 1, 1>, scalar_prefetch = 0 : i64, scratch_operands = 2 : i64, tpu.core_type = #tpu.core_type<tc>, window_params = [{transform_indices = @transform_0, window_bounds = array<i64: 16, 128>}, {pipeline_mode = #tpu.pipeline_mode<synchronous>, transform_indices = @transform_1, window_bounds = array<i64: 1, 128>}, {pipeline_mode = #tpu.pipeline_mode<synchronous>, transform_indices = @transform_2, window_bounds = array<i64: 1, 128>}, {transform_indices = @transform_3, window_bounds = array<i64: 128, 512>}, {transform_indices = @transform_4, window_bounds = array<i64: 1, 512>}, {transform_indices = @transform_5, window_bounds = array<i64: 512, 128>}, {pipeline_mode = #tpu.pipeline_mode<synchronous>, transform_indices = @transform_6, window_bounds = array<i64: 1, 128>}, {transform_indices = @transform_7, window_bounds = array<i64: 16, 128>}]} {
    %c0_i32 = arith.constant 0 : i32
    %0 = arith.cmpi eq, %arg1, %c0_i32 : i32
    %1 = arith.extui %0 : i1 to i32
    %c0_i32_0 = arith.constant 0 : i32
    %2 = arith.cmpi ne, %1, %c0_i32_0 : i32
    scf.if %2 {
      %c0_19 = arith.constant 0 : index
      %c0_20 = arith.constant 0 : index
      %31 = vector.load %arg2[%c0_19, %c0_20] : memref<16x128xf32, #tpu.memory_space<vmem>>, vector<16x128xf32>
      %cst_21 = arith.constant dense<0.000000e+00> : vector<16xf32>
      %32 = vector.multi_reduction <add>, %31, %cst_21 [1] : vector<16x128xf32> to vector<16xf32>
      %33 = vector.shape_cast %32 : vector<16xf32> to vector<16x1xf32>
      %cst_22 = arith.constant 1.280000e+02 : f32
      %34 = vector.broadcast %cst_22 : f32 to vector<16x1xf32>
      %35 = arith.divf %33, %34 : vector<16x1xf32>
      %36 = vector.broadcast %35 : vector<16x1xf32> to vector<16x128xf32>
      %37 = arith.subf %31, %36 : vector<16x128xf32>
      %38 = arith.mulf %37, %37 : vector<16x128xf32>
      %cst_23 = arith.constant dense<0.000000e+00> : vector<16xf32>
      %39 = vector.multi_reduction <add>, %38, %cst_23 [1] : vector<16x128xf32> to vector<16xf32>
      %40 = vector.shape_cast %39 : vector<16xf32> to vector<16x1xf32>
      %cst_24 = arith.constant 1.280000e+02 : f32
      %41 = vector.broadcast %cst_24 : f32 to vector<16x1xf32>
      %42 = arith.divf %40, %41 : vector<16x1xf32>
      %cst_25 = arith.constant 9.99999974E-6 : f32
      %43 = vector.broadcast %cst_25 : f32 to vector<16x1xf32>
      %44 = arith.addf %42, %43 : vector<16x1xf32>
      %45 = math.rsqrt %44 : vector<16x1xf32>
      %46 = vector.broadcast %45 : vector<16x1xf32> to vector<16x128xf32>
      %47 = arith.mulf %37, %46 : vector<16x128xf32>
      %c0_26 = arith.constant 0 : index
      %c0_27 = arith.constant 0 : index
      %48 = vector.load %arg3[%c0_26, %c0_27] : memref<1x128xf32, #tpu.memory_space<vmem>>, vector<1x128xf32>
      %49 = vector.broadcast %48 : vector<1x128xf32> to vector<16x128xf32>
      %50 = arith.mulf %47, %49 : vector<16x128xf32>
      %c0_28 = arith.constant 0 : index
      %c0_29 = arith.constant 0 : index
      %51 = vector.load %arg4[%c0_28, %c0_29] : memref<1x128xf32, #tpu.memory_space<vmem>>, vector<1x128xf32>
      %52 = vector.broadcast %51 : vector<1x128xf32> to vector<16x128xf32>
      %53 = arith.addf %50, %52 : vector<16x128xf32>
      %54 = arith.truncf %53 : vector<16x128xf32> to vector<16x128xbf16>
      %c0_30 = arith.constant 0 : index
      %c0_31 = arith.constant 0 : index
      %55 = vector.load %arg10[%c0_30, %c0_31] : memref<16x128xbf16, #tpu.memory_space<vmem>>, vector<16x128xbf16>
      tpu.vector_store %arg10[%c0_30, %c0_31], %54 {strides = array<i32>} : memref<16x128xbf16, #tpu.memory_space<vmem>>, vector<16x128xbf16>,
      %cst_32 = arith.constant 0.000000e+00 : f32
      %56 = vector.broadcast %cst_32 : f32 to vector<16x128xf32>
      %c0_33 = arith.constant 0 : index
      %c0_34 = arith.constant 0 : index
      %57 = vector.load %arg11[%c0_33, %c0_34] : memref<16x128xf32, #tpu.memory_space<vmem>>, vector<16x128xf32>
      tpu.vector_store %arg11[%c0_33, %c0_34], %56 {strides = array<i32>} : memref<16x128xf32, #tpu.memory_space<vmem>>, vector<16x128xf32>,
    } else {
    }
    %c0 = arith.constant 0 : index
    %c0_1 = arith.constant 0 : index
    %3 = vector.load %arg10[%c0, %c0_1] : memref<16x128xbf16, #tpu.memory_space<vmem>>, vector<16x128xbf16>
    %c0_2 = arith.constant 0 : index
    %c0_3 = arith.constant 0 : index
    %4 = vector.load %arg5[%c0_2, %c0_3] : memref<128x512xbf16, #tpu.memory_space<vmem>>, vector<128x512xbf16>
    %cst = arith.constant dense<0.000000e+00> : vector<16x512xf32>
    %5 = tpu.matmul %3, %4, %cst {dimension_numbers = #tpu.dot_dimension_numbers<[1], [0], [0], [1], [0, 0, 1, 1], [], []>} : vector<16x128xbf16>, vector<128x512xbf16>, vector<16x512xf32> -> vector<16x512xf32>
    %c0_4 = arith.constant 0 : index
    %c0_5 = arith.constant 0 : index
    %6 = vector.load %arg6[%c0_4, %c0_5] : memref<1x512xf32, #tpu.memory_space<vmem>>, vector<1x512xf32>
    %7 = vector.broadcast %6 : vector<1x512xf32> to vector<16x512xf32>
    %8 = arith.addf %5, %7 : vector<16x512xf32>
    %9 = arith.mulf %8, %8 : vector<16x512xf32>
    %10 = arith.mulf %8, %9 : vector<16x512xf32>
    %cst_6 = arith.constant 4.471500e-02 : f32
    %11 = vector.broadcast %cst_6 : f32 to vector<16x512xf32>
    %12 = arith.mulf %11, %10 : vector<16x512xf32>
    %13 = arith.addf %8, %12 : vector<16x512xf32>
    %cst_7 = arith.constant 0.797884583 : f32
    %14 = vector.broadcast %cst_7 : f32 to vector<16x512xf32>
    %15 = arith.mulf %14, %13 : vector<16x512xf32>
    %16 = math.tanh %15 : vector<16x512xf32>
    %cst_8 = arith.constant 1.000000e+00 : f32
    %17 = vector.broadcast %cst_8 : f32 to vector<16x512xf32>
    %18 = arith.addf %17, %16 : vector<16x512xf32>
    %cst_9 = arith.constant 5.000000e-01 : f32
    %19 = vector.broadcast %cst_9 : f32 to vector<16x512xf32>
    %20 = arith.mulf %19, %18 : vector<16x512xf32>
    %21 = arith.mulf %8, %20 : vector<16x512xf32>
    %c0_10 = arith.constant 0 : index
    %c0_11 = arith.constant 0 : index
    %22 = vector.load %arg11[%c0_10, %c0_11] : memref<16x128xf32, #tpu.memory_space<vmem>>, vector<16x128xf32>
    %23 = arith.truncf %21 : vector<16x512xf32> to vector<16x512xbf16>
    %c0_12 = arith.constant 0 : index
    %c0_13 = arith.constant 0 : index
    %24 = vector.load %arg7[%c0_12, %c0_13] : memref<512x128xbf16, #tpu.memory_space<vmem>>, vector<512x128xbf16>
    %cst_14 = arith.constant dense<0.000000e+00> : vector<16x128xf32>
    %25 = tpu.matmul %23, %24, %cst_14 {dimension_numbers = #tpu.dot_dimension_numbers<[1], [0], [0], [1], [0, 0, 1, 1], [], []>} : vector<16x512xbf16>, vector<512x128xbf16>, vector<16x128xf32> -> vector<16x128xf32>
    %26 = arith.addf %22, %25 : vector<16x128xf32>
    %c0_15 = arith.constant 0 : index
    %c0_16 = arith.constant 0 : index
    %27 = vector.load %arg11[%c0_15, %c0_16] : memref<16x128xf32, #tpu.memory_space<vmem>>, vector<16x128xf32>
    tpu.vector_store %arg11[%c0_15, %c0_16], %26 {strides = array<i32>} : memref<16x128xf32, #tpu.memory_space<vmem>>, vector<16x128xf32>,
    %c0_i32_17 = arith.constant 0 : i32
    %28 = arith.cmpi eq, %arg1, %c0_i32_17 : i32
    %29 = arith.extui %28 : i1 to i32
    %c0_i32_18 = arith.constant 0 : i32
    %30 = arith.cmpi ne, %29, %c0_i32_18 : i32
    scf.if %30 {
      %c0_19 = arith.constant 0 : index
      %c0_20 = arith.constant 0 : index
      %31 = vector.load %arg2[%c0_19, %c0_20] : memref<16x128xf32, #tpu.memory_space<vmem>>, vector<16x128xf32>
      %c0_21 = arith.constant 0 : index
      %c0_22 = arith.constant 0 : index
      %32 = vector.load %arg11[%c0_21, %c0_22] : memref<16x128xf32, #tpu.memory_space<vmem>>, vector<16x128xf32>
      %33 = arith.addf %31, %32 : vector<16x128xf32>
      %c0_23 = arith.constant 0 : index
      %c0_24 = arith.constant 0 : index
      %34 = vector.load %arg8[%c0_23, %c0_24] : memref<1x128xf32, #tpu.memory_space<vmem>>, vector<1x128xf32>
      %35 = vector.broadcast %34 : vector<1x128xf32> to vector<16x128xf32>
      %36 = arith.addf %33, %35 : vector<16x128xf32>
      %c0_25 = arith.constant 0 : index
      %c0_26 = arith.constant 0 : index
      %37 = vector.load %arg9[%c0_25, %c0_26] : memref<16x128xf32, #tpu.memory_space<vmem>>, vector<16x128xf32>
      tpu.vector_store %arg9[%c0_25, %c0_26], %36 {strides = array<i32>} : memref<16x128xf32, #tpu.memory_space<vmem>>, vector<16x128xf32>,
    } else {
    }
    return
  }
  func.func @transform_0(%arg0: i32, %arg1: i32) -> (i32, i32) {
    %c0_i32 = arith.constant 0 : i32
    %c0_i32_0 = arith.constant 0 : i32
    return %arg0, %c0_i32 : i32, i32
  }
  func.func @transform_1(%arg0: i32, %arg1: i32) -> (i32, i32) {
    %c0_i32 = arith.constant 0 : i32
    %c0_i32_0 = arith.constant 0 : i32
    %c0_i32_1 = arith.constant 0 : i32
    return %c0_i32, %c0_i32_0 : i32, i32
  }
  func.func @transform_2(%arg0: i32, %arg1: i32) -> (i32, i32) {
    %c0_i32 = arith.constant 0 : i32
    %c0_i32_0 = arith.constant 0 : i32
    %c0_i32_1 = arith.constant 0 : i32
    return %c0_i32, %c0_i32_0 : i32, i32
  }
  func.func @transform_3(%arg0: i32, %arg1: i32) -> (i32, i32) {
    %c0_i32 = arith.constant 0 : i32
    %c0_i32_0 = arith.constant 0 : i32
    return %c0_i32, %arg1 : i32, i32
  }
  func.func @transform_4(%arg0: i32, %arg1: i32) -> (i32, i32) {
    %c0_i32 = arith.constant 0 : i32
    %c0_i32_0 = arith.constant 0 : i32
    return %c0_i32, %arg1 : i32, i32
  }
  func.func @transform_5(%arg0: i32, %arg1: i32) -> (i32, i32) {
    %c0_i32 = arith.constant 0 : i32
    %c0_i32_0 = arith.constant 0 : i32
    return %arg1, %c0_i32 : i32, i32
  }
  func.func @transform_6(%arg0: i32, %arg1: i32) -> (i32, i32) {
    %c0_i32 = arith.constant 0 : i32
    %c0_i32_0 = arith.constant 0 : i32
    %c0_i32_1 = arith.constant 0 : i32
    return %c0_i32, %c0_i32_0 : i32, i32
  }
  func.func @transform_7(%arg0: i32, %arg1: i32) -> (i32, i32) {
    %c0_i32 = arith.constant 0 : i32
    %c0_i32_0 = arith.constant 0 : i32
    return %arg0, %c0_i32 : i32, i32
  }
}

module attributes {stable_mosaic.version = 11 : i64} {
  func.func @_matmul_bias_res_kernel(%arg0: i32, %arg1: i32, %arg2: memref<16x128xbf16, #tpu.memory_space<vmem>>, %arg3: memref<128x128xbf16, #tpu.memory_space<vmem>>, %arg4: memref<1x128xf32, #tpu.memory_space<vmem>>, %arg5: memref<16x128xf32, #tpu.memory_space<vmem>>, %arg6: memref<16x128xf32, #tpu.memory_space<vmem>>) attributes {dimension_semantics = [#tpu.dimension_semantics<parallel>, #tpu.dimension_semantics<parallel>], iteration_bounds = array<i64: 1, 1>, scalar_prefetch = 0 : i64, scratch_operands = 0 : i64, tpu.core_type = #tpu.core_type<tc>, window_params = [{transform_indices = @transform_0, window_bounds = array<i64: 16, 128>}, {transform_indices = @transform_1, window_bounds = array<i64: 128, 128>}, {transform_indices = @transform_2, window_bounds = array<i64: 1, 128>}, {transform_indices = @transform_3, window_bounds = array<i64: 16, 128>}, {transform_indices = @transform_4, window_bounds = array<i64: 16, 128>}]} {
    %c0 = arith.constant 0 : index
    %c0_0 = arith.constant 0 : index
    %0 = vector.load %arg2[%c0, %c0_0] : memref<16x128xbf16, #tpu.memory_space<vmem>>, vector<16x128xbf16>
    %c0_1 = arith.constant 0 : index
    %c0_2 = arith.constant 0 : index
    %1 = vector.load %arg3[%c0_1, %c0_2] : memref<128x128xbf16, #tpu.memory_space<vmem>>, vector<128x128xbf16>
    %cst = arith.constant dense<0.000000e+00> : vector<16x128xf32>
    %2 = tpu.matmul %0, %1, %cst {dimension_numbers = #tpu.dot_dimension_numbers<[1], [0], [0], [1], [0, 0, 1, 1], [], []>} : vector<16x128xbf16>, vector<128x128xbf16>, vector<16x128xf32> -> vector<16x128xf32>
    %c0_3 = arith.constant 0 : index
    %c0_4 = arith.constant 0 : index
    %3 = vector.load %arg4[%c0_3, %c0_4] : memref<1x128xf32, #tpu.memory_space<vmem>>, vector<1x128xf32>
    %4 = vector.broadcast %3 : vector<1x128xf32> to vector<16x128xf32>
    %5 = arith.addf %2, %4 : vector<16x128xf32>
    %c0_5 = arith.constant 0 : index
    %c0_6 = arith.constant 0 : index
    %6 = vector.load %arg5[%c0_5, %c0_6] : memref<16x128xf32, #tpu.memory_space<vmem>>, vector<16x128xf32>
    %7 = arith.addf %6, %5 : vector<16x128xf32>
    %c0_7 = arith.constant 0 : index
    %c0_8 = arith.constant 0 : index
    %8 = vector.load %arg6[%c0_7, %c0_8] : memref<16x128xf32, #tpu.memory_space<vmem>>, vector<16x128xf32>
    tpu.vector_store %arg6[%c0_7, %c0_8], %7 {strides = array<i32>} : memref<16x128xf32, #tpu.memory_space<vmem>>, vector<16x128xf32>,
    return
  }
  func.func @transform_0(%arg0: i32, %arg1: i32) -> (i32, i32) {
    %c0_i32 = arith.constant 0 : i32
    %c0_i32_0 = arith.constant 0 : i32
    return %arg0, %c0_i32 : i32, i32
  }
  func.func @transform_1(%arg0: i32, %arg1: i32) -> (i32, i32) {
    %c0_i32 = arith.constant 0 : i32
    %c0_i32_0 = arith.constant 0 : i32
    return %c0_i32, %arg1 : i32, i32
  }
  func.func @transform_2(%arg0: i32, %arg1: i32) -> (i32, i32) {
    %c0_i32 = arith.constant 0 : i32
    %c0_i32_0 = arith.constant 0 : i32
    return %c0_i32, %arg1 : i32, i32
  }
  func.func @transform_3(%arg0: i32, %arg1: i32) -> (i32, i32) {
    %c0_i32 = arith.constant 0 : i32
    return %arg0, %arg1 : i32, i32
  }
  func.func @transform_4(%arg0: i32, %arg1: i32) -> (i32, i32) {
    %c0_i32 = arith.constant 0 : i32
    return %arg0, %arg1 : i32, i32
  }
}

module attributes {stable_mosaic.version = 11 : i64} {
  func.func @_ln_qkv_kernel(%arg0: i32, %arg1: i32, %arg2: memref<16x128xf32, #tpu.memory_space<vmem>>, %arg3: memref<1x128xf32, #tpu.memory_space<vmem>>, %arg4: memref<1x128xf32, #tpu.memory_space<vmem>>, %arg5: memref<128x128xbf16, #tpu.memory_space<vmem>>, %arg6: memref<1x128xf32, #tpu.memory_space<vmem>>, %arg7: memref<128x128xbf16, #tpu.memory_space<vmem>>, %arg8: memref<1x128xf32, #tpu.memory_space<vmem>>, %arg9: memref<128x128xbf16, #tpu.memory_space<vmem>>, %arg10: memref<1x128xf32, #tpu.memory_space<vmem>>, %arg11: memref<16x128xbf16, #tpu.memory_space<vmem>>, %arg12: memref<16x128xbf16, #tpu.memory_space<vmem>>, %arg13: memref<16x128xbf16, #tpu.memory_space<vmem>>, %arg14: memref<16x128xbf16, #tpu.memory_space<vmem>>) attributes {dimension_semantics = [#tpu.dimension_semantics<parallel>, #tpu.dimension_semantics<arbitrary>], iteration_bounds = array<i64: 1, 1>, scalar_prefetch = 0 : i64, scratch_operands = 1 : i64, tpu.core_type = #tpu.core_type<tc>, window_params = [{transform_indices = @transform_0, window_bounds = array<i64: 16, 128>}, {pipeline_mode = #tpu.pipeline_mode<synchronous>, transform_indices = @transform_1, window_bounds = array<i64: 1, 128>}, {pipeline_mode = #tpu.pipeline_mode<synchronous>, transform_indices = @transform_2, window_bounds = array<i64: 1, 128>}, {transform_indices = @transform_3, window_bounds = array<i64: 128, 128>}, {transform_indices = @transform_4, window_bounds = array<i64: 1, 128>}, {transform_indices = @transform_5, window_bounds = array<i64: 128, 128>}, {transform_indices = @transform_6, window_bounds = array<i64: 1, 128>}, {transform_indices = @transform_7, window_bounds = array<i64: 128, 128>}, {transform_indices = @transform_8, window_bounds = array<i64: 1, 128>}, {transform_indices = @transform_9, window_bounds = array<i64: 16, 128>}, {transform_indices = @transform_10, window_bounds = array<i64: 16, 128>}, {transform_indices = @transform_11, window_bounds = array<i64: 16, 128>}]} {
    %c0_i32 = arith.constant 0 : i32
    %0 = arith.cmpi eq, %arg1, %c0_i32 : i32
    %1 = arith.extui %0 : i1 to i32
    %c0_i32_0 = arith.constant 0 : i32
    %2 = arith.cmpi ne, %1, %c0_i32_0 : i32
    scf.if %2 {
      %c0_22 = arith.constant 0 : index
      %c0_23 = arith.constant 0 : index
      %25 = vector.load %arg2[%c0_22, %c0_23] : memref<16x128xf32, #tpu.memory_space<vmem>>, vector<16x128xf32>
      %cst_24 = arith.constant dense<0.000000e+00> : vector<16xf32>
      %26 = vector.multi_reduction <add>, %25, %cst_24 [1] : vector<16x128xf32> to vector<16xf32>
      %27 = vector.shape_cast %26 : vector<16xf32> to vector<16x1xf32>
      %cst_25 = arith.constant 1.280000e+02 : f32
      %28 = vector.broadcast %cst_25 : f32 to vector<16x1xf32>
      %29 = arith.divf %27, %28 : vector<16x1xf32>
      %30 = vector.broadcast %29 : vector<16x1xf32> to vector<16x128xf32>
      %31 = arith.subf %25, %30 : vector<16x128xf32>
      %32 = arith.mulf %31, %31 : vector<16x128xf32>
      %cst_26 = arith.constant dense<0.000000e+00> : vector<16xf32>
      %33 = vector.multi_reduction <add>, %32, %cst_26 [1] : vector<16x128xf32> to vector<16xf32>
      %34 = vector.shape_cast %33 : vector<16xf32> to vector<16x1xf32>
      %cst_27 = arith.constant 1.280000e+02 : f32
      %35 = vector.broadcast %cst_27 : f32 to vector<16x1xf32>
      %36 = arith.divf %34, %35 : vector<16x1xf32>
      %cst_28 = arith.constant 9.99999974E-6 : f32
      %37 = vector.broadcast %cst_28 : f32 to vector<16x1xf32>
      %38 = arith.addf %36, %37 : vector<16x1xf32>
      %39 = math.rsqrt %38 : vector<16x1xf32>
      %40 = vector.broadcast %39 : vector<16x1xf32> to vector<16x128xf32>
      %41 = arith.mulf %31, %40 : vector<16x128xf32>
      %c0_29 = arith.constant 0 : index
      %c0_30 = arith.constant 0 : index
      %42 = vector.load %arg3[%c0_29, %c0_30] : memref<1x128xf32, #tpu.memory_space<vmem>>, vector<1x128xf32>
      %43 = vector.broadcast %42 : vector<1x128xf32> to vector<16x128xf32>
      %44 = arith.mulf %41, %43 : vector<16x128xf32>
      %c0_31 = arith.constant 0 : index
      %c0_32 = arith.constant 0 : index
      %45 = vector.load %arg4[%c0_31, %c0_32] : memref<1x128xf32, #tpu.memory_space<vmem>>, vector<1x128xf32>
      %46 = vector.broadcast %45 : vector<1x128xf32> to vector<16x128xf32>
      %47 = arith.addf %44, %46 : vector<16x128xf32>
      %48 = arith.truncf %47 : vector<16x128xf32> to vector<16x128xbf16>
      %c0_33 = arith.constant 0 : index
      %c0_34 = arith.constant 0 : index
      %49 = vector.load %arg14[%c0_33, %c0_34] : memref<16x128xbf16, #tpu.memory_space<vmem>>, vector<16x128xbf16>
      tpu.vector_store %arg14[%c0_33, %c0_34], %48 {strides = array<i32>} : memref<16x128xbf16, #tpu.memory_space<vmem>>, vector<16x128xbf16>,
    } else {
    }
    %c0 = arith.constant 0 : index
    %c0_1 = arith.constant 0 : index
    %3 = vector.load %arg14[%c0, %c0_1] : memref<16x128xbf16, #tpu.memory_space<vmem>>, vector<16x128xbf16>
    %c0_2 = arith.constant 0 : index
    %c0_3 = arith.constant 0 : index
    %4 = vector.load %arg5[%c0_2, %c0_3] : memref<128x128xbf16, #tpu.memory_space<vmem>>, vector<128x128xbf16>
    %cst = arith.constant dense<0.000000e+00> : vector<16x128xf32>
    %5 = tpu.matmul %3, %4, %cst {dimension_numbers = #tpu.dot_dimension_numbers<[1], [0], [0], [1], [0, 0, 1, 1], [], []>} : vector<16x128xbf16>, vector<128x128xbf16>, vector<16x128xf32> -> vector<16x128xf32>
    %c0_4 = arith.constant 0 : index
    %c0_5 = arith.constant 0 : index
    %6 = vector.load %arg6[%c0_4, %c0_5] : memref<1x128xf32, #tpu.memory_space<vmem>>, vector<1x128xf32>
    %7 = vector.broadcast %6 : vector<1x128xf32> to vector<16x128xf32>
    %8 = arith.addf %5, %7 : vector<16x128xf32>
    %9 = arith.truncf %8 : vector<16x128xf32> to vector<16x128xbf16>
    %c0_6 = arith.constant 0 : index
    %c0_7 = arith.constant 0 : index
    %10 = vector.load %arg11[%c0_6, %c0_7] : memref<16x128xbf16, #tpu.memory_space<vmem>>, vector<16x128xbf16>
    tpu.vector_store %arg11[%c0_6, %c0_7], %9 {strides = array<i32>} : memref<16x128xbf16, #tpu.memory_space<vmem>>, vector<16x128xbf16>,
    %c0_8 = arith.constant 0 : index
    %c0_9 = arith.constant 0 : index
    %11 = vector.load %arg7[%c0_8, %c0_9] : memref<128x128xbf16, #tpu.memory_space<vmem>>, vector<128x128xbf16>
    %cst_10 = arith.constant dense<0.000000e+00> : vector<16x128xf32>
    %12 = tpu.matmul %3, %11, %cst_10 {dimension_numbers = #tpu.dot_dimension_numbers<[1], [0], [0], [1], [0, 0, 1, 1], [], []>} : vector<16x128xbf16>, vector<128x128xbf16>, vector<16x128xf32> -> vector<16x128xf32>
    %c0_11 = arith.constant 0 : index
    %c0_12 = arith.constant 0 : index
    %13 = vector.load %arg8[%c0_11, %c0_12] : memref<1x128xf32, #tpu.memory_space<vmem>>, vector<1x128xf32>
    %14 = vector.broadcast %13 : vector<1x128xf32> to vector<16x128xf32>
    %15 = arith.addf %12, %14 : vector<16x128xf32>
    %16 = arith.truncf %15 : vector<16x128xf32> to vector<16x128xbf16>
    %c0_13 = arith.constant 0 : index
    %c0_14 = arith.constant 0 : index
    %17 = vector.load %arg12[%c0_13, %c0_14] : memref<16x128xbf16, #tpu.memory_space<vmem>>, vector<16x128xbf16>
    tpu.vector_store %arg12[%c0_13, %c0_14], %16 {strides = array<i32>} : memref<16x128xbf16, #tpu.memory_space<vmem>>, vector<16x128xbf16>,
    %c0_15 = arith.constant 0 : index
    %c0_16 = arith.constant 0 : index
    %18 = vector.load %arg9[%c0_15, %c0_16] : memref<128x128xbf16, #tpu.memory_space<vmem>>, vector<128x128xbf16>
    %cst_17 = arith.constant dense<0.000000e+00> : vector<16x128xf32>
    %19 = tpu.matmul %3, %18, %cst_17 {dimension_numbers = #tpu.dot_dimension_numbers<[1], [0], [0], [1], [0, 0, 1, 1], [], []>} : vector<16x128xbf16>, vector<128x128xbf16>, vector<16x128xf32> -> vector<16x128xf32>
    %c0_18 = arith.constant 0 : index
    %c0_19 = arith.constant 0 : index
    %20 = vector.load %arg10[%c0_18, %c0_19] : memref<1x128xf32, #tpu.memory_space<vmem>>, vector<1x128xf32>
    %21 = vector.broadcast %20 : vector<1x128xf32> to vector<16x128xf32>
    %22 = arith.addf %19, %21 : vector<16x128xf32>
    %23 = arith.truncf %22 : vector<16x128xf32> to vector<16x128xbf16>
    %c0_20 = arith.constant 0 : index
    %c0_21 = arith.constant 0 : index
    %24 = vector.load %arg13[%c0_20, %c0_21] : memref<16x128xbf16, #tpu.memory_space<vmem>>, vector<16x128xbf16>
    tpu.vector_store %arg13[%c0_20, %c0_21], %23 {strides = array<i32>} : memref<16x128xbf16, #tpu.memory_space<vmem>>, vector<16x128xbf16>,
    return
  }
  func.func @transform_0(%arg0: i32, %arg1: i32) -> (i32, i32) {
    %c0_i32 = arith.constant 0 : i32
    %c0_i32_0 = arith.constant 0 : i32
    return %arg0, %c0_i32 : i32, i32
  }
  func.func @transform_1(%arg0: i32, %arg1: i32) -> (i32, i32) {
    %c0_i32 = arith.constant 0 : i32
    %c0_i32_0 = arith.constant 0 : i32
    %c0_i32_1 = arith.constant 0 : i32
    return %c0_i32, %c0_i32_0 : i32, i32
  }
  func.func @transform_2(%arg0: i32, %arg1: i32) -> (i32, i32) {
    %c0_i32 = arith.constant 0 : i32
    %c0_i32_0 = arith.constant 0 : i32
    %c0_i32_1 = arith.constant 0 : i32
    return %c0_i32, %c0_i32_0 : i32, i32
  }
  func.func @transform_3(%arg0: i32, %arg1: i32) -> (i32, i32) {
    %c0_i32 = arith.constant 0 : i32
    %c0_i32_0 = arith.constant 0 : i32
    return %c0_i32, %arg1 : i32, i32
  }
  func.func @transform_4(%arg0: i32, %arg1: i32) -> (i32, i32) {
    %c0_i32 = arith.constant 0 : i32
    %c0_i32_0 = arith.constant 0 : i32
    return %c0_i32, %arg1 : i32, i32
  }
  func.func @transform_5(%arg0: i32, %arg1: i32) -> (i32, i32) {
    %c0_i32 = arith.constant 0 : i32
    %c0_i32_0 = arith.constant 0 : i32
    return %c0_i32, %arg1 : i32, i32
  }
  func.func @transform_6(%arg0: i32, %arg1: i32) -> (i32, i32) {
    %c0_i32 = arith.constant 0 : i32
    %c0_i32_0 = arith.constant 0 : i32
    return %c0_i32, %arg1 : i32, i32
  }
  func.func @transform_7(%arg0: i32, %arg1: i32) -> (i32, i32) {
    %c0_i32 = arith.constant 0 : i32
    %c0_i32_0 = arith.constant 0 : i32
    return %c0_i32, %arg1 : i32, i32
  }
  func.func @transform_8(%arg0: i32, %arg1: i32) -> (i32, i32) {
    %c0_i32 = arith.constant 0 : i32
    %c0_i32_0 = arith.constant 0 : i32
    return %c0_i32, %arg1 : i32, i32
  }
  func.func @transform_9(%arg0: i32, %arg1: i32) -> (i32, i32) {
    %c0_i32 = arith.constant 0 : i32
    return %arg0, %arg1 : i32, i32
  }
  func.func @transform_10(%arg0: i32, %arg1: i32) -> (i32, i32) {
    %c0_i32 = arith.constant 0 : i32
    return %arg0, %arg1 : i32, i32
  }
  func.func @transform_11(%arg0: i32, %arg1: i32) -> (i32, i32) {
    %c0_i32 = arith.constant 0 : i32
    return %arg0, %arg1 : i32, i32
  }
}

module attributes {stable_mosaic.version = 11 : i64} {
  func.func @_ln_mlp_res_kernel(%arg0: i32, %arg1: i32, %arg2: memref<16x128xf32, #tpu.memory_space<vmem>>, %arg3: memref<1x128xf32, #tpu.memory_space<vmem>>, %arg4: memref<1x128xf32, #tpu.memory_space<vmem>>, %arg5: memref<128x512xbf16, #tpu.memory_space<vmem>>, %arg6: memref<1x512xf32, #tpu.memory_space<vmem>>, %arg7: memref<512x128xbf16, #tpu.memory_space<vmem>>, %arg8: memref<1x128xf32, #tpu.memory_space<vmem>>, %arg9: memref<16x128xf32, #tpu.memory_space<vmem>>, %arg10: memref<16x128xbf16, #tpu.memory_space<vmem>>, %arg11: memref<16x128xf32, #tpu.memory_space<vmem>>) attributes {dimension_semantics = [#tpu.dimension_semantics<parallel>, #tpu.dimension_semantics<arbitrary>], iteration_bounds = array<i64: 1, 1>, scalar_prefetch = 0 : i64, scratch_operands = 2 : i64, tpu.core_type = #tpu.core_type<tc>, window_params = [{transform_indices = @transform_0, window_bounds = array<i64: 16, 128>}, {pipeline_mode = #tpu.pipeline_mode<synchronous>, transform_indices = @transform_1, window_bounds = array<i64: 1, 128>}, {pipeline_mode = #tpu.pipeline_mode<synchronous>, transform_indices = @transform_2, window_bounds = array<i64: 1, 128>}, {transform_indices = @transform_3, window_bounds = array<i64: 128, 512>}, {transform_indices = @transform_4, window_bounds = array<i64: 1, 512>}, {transform_indices = @transform_5, window_bounds = array<i64: 512, 128>}, {pipeline_mode = #tpu.pipeline_mode<synchronous>, transform_indices = @transform_6, window_bounds = array<i64: 1, 128>}, {transform_indices = @transform_7, window_bounds = array<i64: 16, 128>}]} {
    %c0_i32 = arith.constant 0 : i32
    %0 = arith.cmpi eq, %arg1, %c0_i32 : i32
    %1 = arith.extui %0 : i1 to i32
    %c0_i32_0 = arith.constant 0 : i32
    %2 = arith.cmpi ne, %1, %c0_i32_0 : i32
    scf.if %2 {
      %c0_19 = arith.constant 0 : index
      %c0_20 = arith.constant 0 : index
      %31 = vector.load %arg2[%c0_19, %c0_20] : memref<16x128xf32, #tpu.memory_space<vmem>>, vector<16x128xf32>
      %cst_21 = arith.constant dense<0.000000e+00> : vector<16xf32>
      %32 = vector.multi_reduction <add>, %31, %cst_21 [1] : vector<16x128xf32> to vector<16xf32>
      %33 = vector.shape_cast %32 : vector<16xf32> to vector<16x1xf32>
      %cst_22 = arith.constant 1.280000e+02 : f32
      %34 = vector.broadcast %cst_22 : f32 to vector<16x1xf32>
      %35 = arith.divf %33, %34 : vector<16x1xf32>
      %36 = vector.broadcast %35 : vector<16x1xf32> to vector<16x128xf32>
      %37 = arith.subf %31, %36 : vector<16x128xf32>
      %38 = arith.mulf %37, %37 : vector<16x128xf32>
      %cst_23 = arith.constant dense<0.000000e+00> : vector<16xf32>
      %39 = vector.multi_reduction <add>, %38, %cst_23 [1] : vector<16x128xf32> to vector<16xf32>
      %40 = vector.shape_cast %39 : vector<16xf32> to vector<16x1xf32>
      %cst_24 = arith.constant 1.280000e+02 : f32
      %41 = vector.broadcast %cst_24 : f32 to vector<16x1xf32>
      %42 = arith.divf %40, %41 : vector<16x1xf32>
      %cst_25 = arith.constant 9.99999974E-6 : f32
      %43 = vector.broadcast %cst_25 : f32 to vector<16x1xf32>
      %44 = arith.addf %42, %43 : vector<16x1xf32>
      %45 = math.rsqrt %44 : vector<16x1xf32>
      %46 = vector.broadcast %45 : vector<16x1xf32> to vector<16x128xf32>
      %47 = arith.mulf %37, %46 : vector<16x128xf32>
      %c0_26 = arith.constant 0 : index
      %c0_27 = arith.constant 0 : index
      %48 = vector.load %arg3[%c0_26, %c0_27] : memref<1x128xf32, #tpu.memory_space<vmem>>, vector<1x128xf32>
      %49 = vector.broadcast %48 : vector<1x128xf32> to vector<16x128xf32>
      %50 = arith.mulf %47, %49 : vector<16x128xf32>
      %c0_28 = arith.constant 0 : index
      %c0_29 = arith.constant 0 : index
      %51 = vector.load %arg4[%c0_28, %c0_29] : memref<1x128xf32, #tpu.memory_space<vmem>>, vector<1x128xf32>
      %52 = vector.broadcast %51 : vector<1x128xf32> to vector<16x128xf32>
      %53 = arith.addf %50, %52 : vector<16x128xf32>
      %54 = arith.truncf %53 : vector<16x128xf32> to vector<16x128xbf16>
      %c0_30 = arith.constant 0 : index
      %c0_31 = arith.constant 0 : index
      %55 = vector.load %arg10[%c0_30, %c0_31] : memref<16x128xbf16, #tpu.memory_space<vmem>>, vector<16x128xbf16>
      tpu.vector_store %arg10[%c0_30, %c0_31], %54 {strides = array<i32>} : memref<16x128xbf16, #tpu.memory_space<vmem>>, vector<16x128xbf16>,
      %cst_32 = arith.constant 0.000000e+00 : f32
      %56 = vector.broadcast %cst_32 : f32 to vector<16x128xf32>
      %c0_33 = arith.constant 0 : index
      %c0_34 = arith.constant 0 : index
      %57 = vector.load %arg11[%c0_33, %c0_34] : memref<16x128xf32, #tpu.memory_space<vmem>>, vector<16x128xf32>
      tpu.vector_store %arg11[%c0_33, %c0_34], %56 {strides = array<i32>} : memref<16x128xf32, #tpu.memory_space<vmem>>, vector<16x128xf32>,
    } else {
    }
    %c0 = arith.constant 0 : index
    %c0_1 = arith.constant 0 : index
    %3 = vector.load %arg10[%c0, %c0_1] : memref<16x128xbf16, #tpu.memory_space<vmem>>, vector<16x128xbf16>
    %c0_2 = arith.constant 0 : index
    %c0_3 = arith.constant 0 : index
    %4 = vector.load %arg5[%c0_2, %c0_3] : memref<128x512xbf16, #tpu.memory_space<vmem>>, vector<128x512xbf16>
    %cst = arith.constant dense<0.000000e+00> : vector<16x512xf32>
    %5 = tpu.matmul %3, %4, %cst {dimension_numbers = #tpu.dot_dimension_numbers<[1], [0], [0], [1], [0, 0, 1, 1], [], []>} : vector<16x128xbf16>, vector<128x512xbf16>, vector<16x512xf32> -> vector<16x512xf32>
    %c0_4 = arith.constant 0 : index
    %c0_5 = arith.constant 0 : index
    %6 = vector.load %arg6[%c0_4, %c0_5] : memref<1x512xf32, #tpu.memory_space<vmem>>, vector<1x512xf32>
    %7 = vector.broadcast %6 : vector<1x512xf32> to vector<16x512xf32>
    %8 = arith.addf %5, %7 : vector<16x512xf32>
    %9 = arith.mulf %8, %8 : vector<16x512xf32>
    %10 = arith.mulf %8, %9 : vector<16x512xf32>
    %cst_6 = arith.constant 4.471500e-02 : f32
    %11 = vector.broadcast %cst_6 : f32 to vector<16x512xf32>
    %12 = arith.mulf %11, %10 : vector<16x512xf32>
    %13 = arith.addf %8, %12 : vector<16x512xf32>
    %cst_7 = arith.constant 0.797884583 : f32
    %14 = vector.broadcast %cst_7 : f32 to vector<16x512xf32>
    %15 = arith.mulf %14, %13 : vector<16x512xf32>
    %16 = math.tanh %15 : vector<16x512xf32>
    %cst_8 = arith.constant 1.000000e+00 : f32
    %17 = vector.broadcast %cst_8 : f32 to vector<16x512xf32>
    %18 = arith.addf %17, %16 : vector<16x512xf32>
    %cst_9 = arith.constant 5.000000e-01 : f32
    %19 = vector.broadcast %cst_9 : f32 to vector<16x512xf32>
    %20 = arith.mulf %19, %18 : vector<16x512xf32>
    %21 = arith.mulf %8, %20 : vector<16x512xf32>
    %c0_10 = arith.constant 0 : index
    %c0_11 = arith.constant 0 : index
    %22 = vector.load %arg11[%c0_10, %c0_11] : memref<16x128xf32, #tpu.memory_space<vmem>>, vector<16x128xf32>
    %23 = arith.truncf %21 : vector<16x512xf32> to vector<16x512xbf16>
    %c0_12 = arith.constant 0 : index
    %c0_13 = arith.constant 0 : index
    %24 = vector.load %arg7[%c0_12, %c0_13] : memref<512x128xbf16, #tpu.memory_space<vmem>>, vector<512x128xbf16>
    %cst_14 = arith.constant dense<0.000000e+00> : vector<16x128xf32>
    %25 = tpu.matmul %23, %24, %cst_14 {dimension_numbers = #tpu.dot_dimension_numbers<[1], [0], [0], [1], [0, 0, 1, 1], [], []>} : vector<16x512xbf16>, vector<512x128xbf16>, vector<16x128xf32> -> vector<16x128xf32>
    %26 = arith.addf %22, %25 : vector<16x128xf32>
    %c0_15 = arith.constant 0 : index
    %c0_16 = arith.constant 0 : index
    %27 = vector.load %arg11[%c0_15, %c0_16] : memref<16x128xf32, #tpu.memory_space<vmem>>, vector<16x128xf32>
    tpu.vector_store %arg11[%c0_15, %c0_16], %26 {strides = array<i32>} : memref<16x128xf32, #tpu.memory_space<vmem>>, vector<16x128xf32>,
    %c0_i32_17 = arith.constant 0 : i32
    %28 = arith.cmpi eq, %arg1, %c0_i32_17 : i32
    %29 = arith.extui %28 : i1 to i32
    %c0_i32_18 = arith.constant 0 : i32
    %30 = arith.cmpi ne, %29, %c0_i32_18 : i32
    scf.if %30 {
      %c0_19 = arith.constant 0 : index
      %c0_20 = arith.constant 0 : index
      %31 = vector.load %arg2[%c0_19, %c0_20] : memref<16x128xf32, #tpu.memory_space<vmem>>, vector<16x128xf32>
      %c0_21 = arith.constant 0 : index
      %c0_22 = arith.constant 0 : index
      %32 = vector.load %arg11[%c0_21, %c0_22] : memref<16x128xf32, #tpu.memory_space<vmem>>, vector<16x128xf32>
      %33 = arith.addf %31, %32 : vector<16x128xf32>
      %c0_23 = arith.constant 0 : index
      %c0_24 = arith.constant 0 : index
      %34 = vector.load %arg8[%c0_23, %c0_24] : memref<1x128xf32, #tpu.memory_space<vmem>>, vector<1x128xf32>
      %35 = vector.broadcast %34 : vector<1x128xf32> to vector<16x128xf32>
      %36 = arith.addf %33, %35 : vector<16x128xf32>
      %c0_25 = arith.constant 0 : index
      %c0_26 = arith.constant 0 : index
      %37 = vector.load %arg9[%c0_25, %c0_26] : memref<16x128xf32, #tpu.memory_space<vmem>>, vector<16x128xf32>
      tpu.vector_store %arg9[%c0_25, %c0_26], %36 {strides = array<i32>} : memref<16x128xf32, #tpu.memory_space<vmem>>, vector<16x128xf32>,
    } else {
    }
    return
  }
  func.func @transform_0(%arg0: i32, %arg1: i32) -> (i32, i32) {
    %c0_i32 = arith.constant 0 : i32
    %c0_i32_0 = arith.constant 0 : i32
    return %arg0, %c0_i32 : i32, i32
  }
  func.func @transform_1(%arg0: i32, %arg1: i32) -> (i32, i32) {
    %c0_i32 = arith.constant 0 : i32
    %c0_i32_0 = arith.constant 0 : i32
    %c0_i32_1 = arith.constant 0 : i32
    return %c0_i32, %c0_i32_0 : i32, i32
  }
  func.func @transform_2(%arg0: i32, %arg1: i32) -> (i32, i32) {
    %c0_i32 = arith.constant 0 : i32
    %c0_i32_0 = arith.constant 0 : i32
    %c0_i32_1 = arith.constant 0 : i32
    return %c0_i32, %c0_i32_0 : i32, i32
  }
  func.func @transform_3(%arg0: i32, %arg1: i32) -> (i32, i32) {
    %c0_i32 = arith.constant 0 : i32
    %c0_i32_0 = arith.constant 0 : i32
    return %c0_i32, %arg1 : i32, i32
  }
  func.func @transform_4(%arg0: i32, %arg1: i32) -> (i32, i32) {
    %c0_i32 = arith.constant 0 : i32
    %c0_i32_0 = arith.constant 0 : i32
    return %c0_i32, %arg1 : i32, i32
  }
  func.func @transform_5(%arg0: i32, %arg1: i32) -> (i32, i32) {
    %c0_i32 = arith.constant 0 : i32
    %c0_i32_0 = arith.constant 0 : i32
    return %arg1, %c0_i32 : i32, i32
  }
  func.func @transform_6(%arg0: i32, %arg1: i32) -> (i32, i32) {
    %c0_i32 = arith.constant 0 : i32
    %c0_i32_0 = arith.constant 0 : i32
    %c0_i32_1 = arith.constant 0 : i32
    return %c0_i32, %c0_i32_0 : i32, i32
  }
  func.func @transform_7(%arg0: i32, %arg1: i32) -> (i32, i32) {
    %c0_i32 = arith.constant 0 : i32
    %c0_i32_0 = arith.constant 0 : i32
    return %arg0, %c0_i32 : i32, i32
  }
}

</mosaic_0001>

<bundles_post_ra>
// kernel: codify_forward.9
= control target key start
LH: loop header
LB: loop body
LE: loop exit
PB: predicated region body
PF: predicated region fallthrough
CT: control target
= control target key end

     0   :  { %s184_s0 = inlined_call_operand.vmem [shape: s32[16], index: 0, kind: input, shape index: {}]   ;;  %s185_s1 = inlined_call_operand.vmem [shape: f32[128,128], index: 1, kind: input, shape index: {}]   ;;  %s186_s2 = inlined_call_operand.vmem [shape: f32[16,128], index: 2, kind: output, shape index: {}]  }
   0x1   :  { %s7_s11 = sshll.u32 %s184_s0, 4  ;;  %s8_s11 = int_to_ptr.vmem [resolvable:$true] %s7_s11 }
   0x2   :  { %s127_s12 = scalar_lea.vmem %s8_s11, 16  ;;  %p132_p1 = scmp.lt.s32.totalorder %s8_s11, %s8_s11 }
   0x3   :  { %p128_p0 = scmp.ne.s32.totalorder %s8_s11, %s127_s12  ;;  %p133_p2 = scmp.lt.s32.totalorder %s127_s12, %s127_s12 }
   0x5   :  { %p134_p3 = por %p133_p2, %p132_p1 }
   0x7   :  { %p135_p4 = pnand %p134_p3, %p128_p0 }
   0x9   :  { %138 = shalt.err (!%p135_p4)  }
   0xa   :  { %s159_s13 = smov [#allocation4]  }
   0xb   :  { %10 = dma.vmem_to_smem %s8_s11, 16, %s159_s13, [#allocation3] }
   0xc   :  { %147 = dma.done.wait [#allocation3], 16 }
   0xd   :  { %148 = vsyncadd [#allocation3], 4294967280 }
   0xe   :  { %12 = sfence }
   0xf   :  { %s151_s14 = smov 0  }
  0x10 LB: > { %s21_s15 = sld [smem:[#allocation4 + %s153_s14]]  ;;  %s23_s17 = scalar_lea.vmem %s186_s2, %s153_s14  ;;  %s153_s14 = sphi %s151_s14, %s18_s14  }
  0x16   : > { %s22_s20 = scalar_lea.vmem %s185_s1, %s21_s15 }
  0x17   : > { %v41_v0 = vld [vmem:[%s22_s20] sm:$0x1] }
  0x18   : > { %42 = vst [vmem:[%s23_s17] sm:$0x1] %v41_v0 }
  0x19   : > { %67 = vsyncadd [#allocation2], 16  ;;  %s18_s14 = sadd.s32 1, %s153_s14  }
  0x1a   : > { %p15_p5 = scmp.ge.s32.totalorder %s18_s14, 16  }
  0x1b   :  { %s155_s21 = smov (%p15_p5), 0  }
  0x1c   :  { %17 = sbr.rel (!%p15_p5) target bundleno = 16 (0x10), region = 76 }
  0x23 LB: > { %149 = dma.done.wait [#allocation2], 16  ;;  %s157_s21 = sphi %s155_s21, %s73_s21  }
  0x24   : > { %150 = vsyncadd [#allocation2], 4294967280  ;;  %s73_s21 = sadd.s32 1, %s157_s21  }
  0x25   : > { %p70_p6 = scmp.ge.s32.totalorder %s73_s21, 16  }
  0x27   :  { %72 = sbr.rel (!%p70_p6) target bundleno = 35 (0x23), region = 87 }
  0x2e   :  { %81 = vsyncmov [#allocation2] }
  0x31   :  { %s82_s22 = vpop.sfrf %81 }
  0x32   :  { %p109_p7 = scmp.ne.s32.totalorder %s82_s22, 0 }
  0x34   :  { %86 = shalt.err (%p109_p7)  }

// kernel: codify_forward.12
= control target key start
LH: loop header
LB: loop body
LE: loop exit
PB: predicated region body
PF: predicated region fallthrough
CT: control target
= control target key end

     0   :  { %9 = vsyncpa [#allocation3], 0  ;;  %s240_s15 = smov [#allocation2]   ;;  %s300_s0 = inlined_call_operand.vmem [shape: bf16[16,128], index: 0, kind: input, shape index: {}]   ;;  %s301_s1 = inlined_call_operand.hbm [shape: bf16[128,128], index: 1, kind: input, shape index: {}]   ;;  %s302_s2 = inlined_call_operand.vmem [shape: f32[1,128], index: 2, kind: input, shape index: {}]   ;;  %s303_s3 = inlined_call_operand.vmem [shape: f32[16,128], index: 3, kind: input, shape index: {}, may-alias: {3,4}]   ;;  %s304_s4 = inlined_call_operand.vmem [shape: f32[16,128], index: 4, kind: output, shape index: {}, may-alias: {3,4}]  }
   0x1   :  { %s17_s16 = sshll.u32 %s240_s15, 4  ;;  %s216_s19 = scalar_lea.hbm %s301_s1, 1024  ;;  %s18_s16 = int_to_ptr.vmem [resolvable:$true] %s17_s16 }
   0x2   :  { %p217_p0 = scmp.ne.s32.totalorder %s301_s1, %s216_s19  ;;  %p220_p1 = scmp.lt.u32.totalorder %s216_s19, %s301_s1 }
   0x4   :  { %p222_p2 = pnand %p220_p1, %p217_p0 }
   0x6   :  { %225 = shalt.err (!%p222_p2)
}
   0x7   :  { %s226_s24 = scalar_lea.vmem %s18_s16, 1024  ;;  %p231_p4 = scmp.lt.s32.totalorder %s18_s16, %s18_s16 }
   0x8   :  { %p227_p3 = scmp.ne.s32.totalorder %s18_s16, %s226_s24  ;;  %p232_p5 = scmp.lt.s32.totalorder %s226_s24, %s226_s24 }
   0xa   :  { %p233_p6 = por %p232_p5, %p231_p4 }
   0xc   :  { %p234_p7 = pnand %p233_p6, %p227_p3 }
   0xe   :  { %237 = shalt.err (!%p234_p7)
}
   0xf   :  { %s241_s25 = smov 64   ;;  %s242_s26 = smov 4  }
  0x10   :  { %23 = dma.hbm_to_vmem [thread:$0]  %s301_s1, 1024, %s18_s16, [#allocation3], %s241_s25, %s241_s25, %s242_s26  }
  0x11   :  { %238 = dma.done.wait [#allocation3], 1024  }
  0x12   :  { %239 = vsyncadd [#allocation3], 4294966272  ;;  %v243_v0 = vmov 0.0   ;;  %vm244_vm0 = vmmov 0   ;;  %v207_v1 = vld [vmem:[#allocation2] sm:$0xff]   ;;  %v208_v2 = vld [vmem:[#allocation2 + $0x8] sm:$0xff]  }
  0x13   :  { %182 = vmatprep.subr.bf16.mxu0 %v243_v0  ;;  %198 = vmatprep.mubr.msk.bf16.mxu0 %vm244_vm0, %v243_v0  ;;  %v209_v3 = vld [vmem:[#allocation2 + $0x10] sm:$0xff]   ;;  %v210_v4 = vld [vmem:[#allocation2 + $0x18] sm:$0xff]   ;;  %v211_v5 = vld [vmem:[#allocation2 + $0x20] sm:$0xff]  }
  0x14   :  { %183 = vmatpush3.bf16.msra.mxu0 %v207_v1  ;;  %v212_v6 = vld [vmem:[#allocation2 + $0x28] sm:$0xff]   ;;  %v213_v7 = vld [vmem:[#allocation2 + $0x30] sm:$0xff]   ;;  %v214_v8 = vld [vmem:[#allocation2 + $0x38] sm:$0xff]  }
  0x15   :  { %184 = vmatprep.subr.bf16.mxu0 %v243_v0  ;;  %v215_v9 = vld [vmem:[%s300_s0] sm:$0xff]   ;;  %v153_v16 = vld [vmem:[%s303_s3 + $0x8] sm:$0xff] }
  0x16   :  { %v163_v10 = vld [vmem:[%s302_s2] ss:$0 sm:$0xff] }
  0x17   :  { %v152_v12 = vld [vmem:[%s303_s3] sm:$0xff] }
  0x18   :  { %185 = vmatpush3.bf16.msra.mxu0 %v208_v2 }
  0x19   :  { %186 = vmatprep.subr.bf16.mxu0 %v243_v0 }
  0x1c   :  { %187 = vmatpush3.bf16.msra.mxu0 %v209_v3 }
  0x1d   :  { %188 = vmatprep.subr.bf16.mxu0 %v243_v0 }
  0x20   :  { %189 = vmatpush3.bf16.msra.mxu0 %v210_v4 }
  0x21   :  { %190 = vmatprep.subr.bf16.mxu0 %v243_v0 }
  0x24   :  { %191 = vmatpush3.bf16.msra.mxu0 %v211_v5 }
  0x25   :  { %192 = vmatprep.subr.bf16.mxu0 %v243_v0 }
  0x28   :  { %193 = vmatpush3.bf16.msra.mxu0 %v212_v6 }
  0x29   :  { %194 = vmatprep.subr.bf16.mxu0 %v243_v0 }
  0x2c   :  { %195 = vmatpush3.bf16.msra.mxu0 %v213_v7 }
  0x2d   :  { %196 = vmatprep.subr.bf16.mxu0 %v243_v0 }
  0x30   :  { %197 = vmatpush3.bf16.msra.mxu0 %v214_v8 }
  0x33   :  { %199 = vmatmul.mubr.bf16.vlgmr.msra.gmra.mrb[0].mxu0 %v215_v9 }
 0x106   :  { %v145_v11 = vpop.f32.mrb[0].mxu0 }
 0x107   :  { %v146_v13 = vadd.f32 %v163_v10, %v145_v11  ;;  %v200_v14 = vpop.f32.mrb[1].mxu0 }
 0x108   :  { %v148_v15 = vpop.f32.mrb[2].mxu0 }
 0x109   :  { %v154_v17 = vadd.f32 %v152_v12, %v146_v13  ;;  %v149_v18 = vadd.f32 %v163_v10, %v148_v15  ;;  %v201_v19 = vpop.f32.mrb[3].mxu0 }
 0x10b   :  { %156 = vst [vmem:[%s304_s4] sm:$0xff] %v154_v17  ;;  %v155_v20 = vadd.f32 %v153_v16, %v149_v18 }
 0x10d   :  { %157 = vst [vmem:[%s304_s4 + $0x8] sm:$0xff] %v155_v20 }
 0x10e   :  { %162 = vsyncpa [#allocation3], 1 }

// kernel: codify_forward.10
= control target key start
LH: loop header
LB: loop body
LE: loop exit
PB: predicated region body
PF: predicated region fallthrough
CT: control target
= control target key end

     0   :  { %17 = vsyncpa [#allocation4], 0  ;;  %s893_s0 = inlined_call_operand.vmem [shape: f32[16,128], index: 0, kind: input, shape index: {}]   ;;  %s894_s1 = inlined_call_operand.vmem [shape: f32[1,128], index: 1, kind: input, shape index: {}]   ;;  %s895_s2 = inlined_call_operand.vmem [shape: f32[1,128], index: 2, kind: input, shape index: {}]   ;;  %s896_s3 = inlined_call_operand.vmem [shape: bf16[128,128], index: 3, kind: input, shape index: {}]   ;;  %s897_s4 = inlined_call_operand.vmem [shape: f32[1,128], index: 4, kind: input, shape index: {}]   ;;  %s898_s5 = inlined_call_operand.hbm [shape: bf16[128,128], index: 5, kind: input, shape index: {}]   ;;  %s899_s6 = inlined_call_operand.vmem [shape: f32[1,128], index: 6, kind: input, shape index: {}]   ;;  %s900_s7 = inlined_call_operand.hbm [shape: bf16[128,128], index: 7, kind: input, shape index: {}]   ;;  %s901_s8 = inlined_call_operand.vmem [shape: f32[1,128], index: 8, kind: input, shape index: {}]   ;;  %s902_s9 = inlined_call_operand.vmem [shape: bf16[16,128], index: 9, kind: output, shape index: {0}]   ;;  %s903_s10 = inlined_call_operand.vmem [shape: bf16[16,128], index: 10, kind: output, shape index: {1}]   ;;  %s904_s11 = inlined_call_operand.vmem [shape: bf16[16,128], index: 11, kind: output, shape index: {2}]  }
   0x1   :  { %18 = vsyncpa [#allocation6], 0  ;;  %s719_s17 = smov [#allocation3]   ;;  %s671_s21 = scalar_lea.hbm %s898_s5, 1024 }
   0x2   :  { %s34_s18 = sshll.u32 %s719_s17, 4  ;;  %p672_p0 = scmp.ne.s32.totalorder %s898_s5, %s671_s21  ;;  %s35_s18 = int_to_ptr.vmem [resolvable:$true] %s34_s18 }
   0x3   :  { %p675_p1 = scmp.lt.u32.totalorder %s671_s21, %s898_s5 }
   0x5   :  { %p677_p2 = pnand %p675_p1, %p672_p0 }
   0x7   :  { %680 = shalt.err (!%p677_p2)
}
   0x8   :  { %s681_s26 = scalar_lea.vmem %s35_s18, 1024  ;;  %p686_p4 = scmp.lt.s32.totalorder %s35_s18, %s35_s18 }
   0x9   :  { %p682_p3 = scmp.ne.s32.totalorder %s35_s18, %s681_s26  ;;  %p687_p5 = scmp.lt.s32.totalorder %s681_s26, %s681_s26 }
   0xb   :  { %p688_p6 = por %p687_p5, %p686_p4 }
   0xd   :  { %p689_p7 = pnand %p688_p6, %p682_p3 }
   0xf   :  { %692 = shalt.err (!%p689_p7)
}
  0x10   :  { %s720_s27 = smov 64   ;;  %s721_s28 = smov 4  }
  0x11   :  { %40 = dma.hbm_to_vmem [thread:$0]  %s898_s5, 1024, %s35_s18, [#allocation4], %s720_s27, %s720_s27, %s721_s28  }
  0x12   :  { %s722_s12 = smov [#allocation5]   ;;  %s693_s16 = scalar_lea.hbm %s900_s7, 1024 }
  0x13   :  { %s48_s13 = sshll.u32 %s722_s12, 4  ;;  %p694_p8 = scmp.ne.s32.totalorder %s900_s7, %s693_s16  ;;  %s49_s13 = int_to_ptr.vmem [resolvable:$true] %s48_s13 }
  0x14   :  { %p697_p9 = scmp.lt.u32.totalorder %s693_s16, %s900_s7 }
  0x16   :  { %p699_p10 = pnand %p697_p9, %p694_p8 }
  0x18   :  { %702 = shalt.err (!%p699_p10)
}
  0x19   :  { %s703_s22 = scalar_lea.vmem %s49_s13, 1024  ;;  %p708_p12 = scmp.lt.s32.totalorder %s49_s13, %s49_s13 }
  0x1a   :  { %p704_p11 = scmp.ne.s32.totalorder %s49_s13, %s703_s22  ;;  %p709_p13 = scmp.lt.s32.totalorder %s703_s22, %s703_s22 }
  0x1c   :  { %p710_p0 = por %p709_p13, %p708_p12 }
  0x1e   :  { %p711_p1 = pnand %p710_p0, %p704_p11 }
  0x20   :  { %714 = shalt.err (!%p711_p1)
}
  0x21   :  { %54 = dma.hbm_to_vmem [thread:$0]  %s900_s7, 1024, %s49_s13, [#allocation6], %s720_s27, %s720_s27, %s721_s28  }
  0x22   :  { %715 = dma.done.wait [#allocation4], 1024  }
  0x23   :  { %716 = vsyncadd [#allocation4], 4294966272 }
  0x24   :  { %717 = dma.done.wait [#allocation6], 1024  }
  0x25   :  { %718 = vsyncadd [#allocation6], 4294966272  ;;  %v68_v0 = vld [vmem:[%s893_s0] sm:$0xff]  ;;  %v69_v1 = vld [vmem:[%s893_s0 + $0x8] sm:$0xff]  ;;  %v723_v4 = vmov 0.0   ;;  %vm724_vm0 = vmmov 0  }
  0x26   :  { %70 = vadd.xlane.f32.xlu0 %v68_v0  ;;  %v643_v2 = vld [vmem:[%s896_s3] sm:$0xff]   ;;  %577 = vmatprep.subr.bf16.mxu0 %v723_v4  ;;  %v645_v5 = vld [vmem:[%s896_s3 + $0x8] sm:$0xff]   ;;  %v647_v15 = vld [vmem:[%s896_s3 + $0x10] sm:$0xff]  }
  0x27   :  { %v644_v3 = vld [vmem:[#allocation3] sm:$0xff]   ;;  %597 = vmatprep.subr.bf16.mxu1 %v723_v4  ;;  %578 = vmatpush3.bf16.msra.mxu0 %v643_v2  ;;  %v646_v14 = vld [vmem:[#allocation3 + $0x8] sm:$0xff]   ;;  %v648_v16 = vld [vmem:[#allocation3 + $0x10] sm:$0xff]  }
  0x28   :  { %598 = vmatpush3.bf16.msra.mxu1 %v644_v3  ;;  %579 = vmatprep.subr.bf16.mxu0 %v723_v4  ;;  %v649_v17 = vld [vmem:[%s896_s3 + $0x18] sm:$0xff]   ;;  %v651_v19 = vld [vmem:[%s896_s3 + $0x20] sm:$0xff]   ;;  %v653_v21 = vld [vmem:[%s896_s3 + $0x28] sm:$0xff]  }
  0x29   :  { %599 = vmatprep.subr.bf16.mxu1 %v723_v4  ;;  %v650_v18 = vld [vmem:[#allocation3 + $0x18] sm:$0xff]   ;;  %v652_v20 = vld [vmem:[#allocation3 + $0x20] sm:$0xff]   ;;  %593 = vmatprep.mubr.msk.bf16.mxu0 %vm724_vm0, %v723_v4  ;;  %v654_v22 = vld [vmem:[#allocation3 + $0x28] sm:$0xff]  }
  0x2a   :  { %72 = vadd.xlane.f32.xlu0 %v69_v1  ;;  %613 = vmatprep.mubr.msk.bf16.mxu1 %vm724_vm0, %v723_v4  ;;  %v655_v23 = vld [vmem:[%s896_s3 + $0x30] sm:$0xff]   ;;  %v657_v25 = vld [vmem:[%s896_s3 + $0x38] sm:$0xff]   ;;  %v494_v35 = vld [vmem:[%s894_s1] ss:$0 sm:$0xff] }
  0x2b   :  { %580 = vmatpush3.bf16.msra.mxu0 %v645_v5  ;;  %v656_v24 = vld [vmem:[#allocation3 + $0x30] sm:$0xff]   ;;  %v658_v26 = vld [vmem:[#allocation3 + $0x38] sm:$0xff]   ;;  %v495_v39 = vld [vmem:[%s895_s2] ss:$0 sm:$0xff] }
  0x2c   :  { %581 = vmatprep.subr.bf16.mxu0 %v723_v4  ;;  %600 = vmatpush3.bf16.msra.mxu1 %v646_v14  ;;  %v659_v43 = vld [vmem:[#allocation5] sm:$0xff]   ;;  %v660_v45 = vld [vmem:[#allocation5 + $0x8] sm:$0xff]   ;;  %v661_v46 = vld [vmem:[#allocation5 + $0x10] sm:$0xff]  }
  0x2d   :  { %601 = vmatprep.subr.bf16.mxu1 %v723_v4  ;;  %v662_v47 = vld [vmem:[#allocation5 + $0x18] sm:$0xff]   ;;  %v663_v48 = vld [vmem:[#allocation5 + $0x20] sm:$0xff]   ;;  %v664_v49 = vld [vmem:[#allocation5 + $0x28] sm:$0xff]  }
  0x2e   :  { %v665_v50 = vld [vmem:[#allocation5 + $0x30] sm:$0xff]   ;;  %v666_v51 = vld [vmem:[#allocation5 + $0x38] sm:$0xff]   ;;  %v496_v52 = vld [vmem:[%s897_s4] ss:$0 sm:$0xff] }
  0x2f   :  { %582 = vmatpush3.bf16.msra.mxu0 %v647_v15  ;;  %v507_v54 = vld [vmem:[%s899_s6] ss:$0 sm:$0xff] }
  0x30   :  { %602 = vmatpush3.bf16.msra.mxu1 %v648_v16  ;;  %583 = vmatprep.subr.bf16.mxu0 %v723_v4 }
  0x31   :  { %603 = vmatprep.subr.bf16.mxu1 %v723_v4 }
  0x33   :  { %584 = vmatpush3.bf16.msra.mxu0 %v649_v17 }
  0x34   :  { %604 = vmatpush3.bf16.msra.mxu1 %v650_v18  ;;  %585 = vmatprep.subr.bf16.mxu0 %v723_v4 }
  0x35   :  { %605 = vmatprep.subr.bf16.mxu1 %v723_v4 }
  0x37   :  { %586 = vmatpush3.bf16.msra.mxu0 %v651_v19 }
  0x38   :  { %606 = vmatpush3.bf16.msra.mxu1 %v652_v20  ;;  %587 = vmatprep.subr.bf16.mxu0 %v723_v4 }
  0x39   :  { %607 = vmatprep.subr.bf16.mxu1 %v723_v4 }
  0x3b   :  { %588 = vmatpush3.bf16.msra.mxu0 %v653_v21 }
  0x3c   :  { %608 = vmatpush3.bf16.msra.mxu1 %v654_v22  ;;  %589 = vmatprep.subr.bf16.mxu0 %v723_v4 }
  0x3d   :  { %609 = vmatprep.subr.bf16.mxu1 %v723_v4 }
  0x3f   :  { %590 = vmatpush3.bf16.msra.mxu0 %v655_v23 }
  0x40   :  { %610 = vmatpush3.bf16.msra.mxu1 %v656_v24  ;;  %591 = vmatprep.subr.bf16.mxu0 %v723_v4 }
  0x41   :  { %611 = vmatprep.subr.bf16.mxu1 %v723_v4 }
  0x43   :  { %592 = vmatpush3.bf16.msra.mxu0 %v657_v25 }
  0x44   :  { %612 = vmatpush3.bf16.msra.mxu1 %v658_v26  ;;  %617 = vmatprep.subr.bf16.mxu0 %v723_v4 }
  0xb3   :  { %v71_v6 = vpop.xlane.xlu0 %70 }
  0xb4   :  { %v75_v7 = vmul.f32 0.0078125, %v71_v6 }
  0xb6   :  { %v77_v8 = vsub.f32 %v68_v0, %v75_v7 }
  0xb7   :  { %v73_v9 = vpop.xlane.xlu0 %72 }
  0xb8   :  { %v76_v10 = vmul.f32 0.0078125, %v73_v9  ;;  %v79_v11 = vmul.f32 %v77_v8, %v77_v8 }
  0xba   :  { %v78_v12 = vsub.f32 %v69_v1, %v76_v10  ;;  %81 = vadd.xlane.f32.xlu1 %v79_v11 }
  0xbc   :  { %v80_v13 = vmul.f32 %v78_v12, %v78_v12 }
  0xbe   :  { %83 = vadd.xlane.f32.xlu1 %v80_v13 }
 0x147   :  { %v82_v27 = vpop.xlane.xlu1 %81 }
 0x148   :  { %v85_v28 = vmul.f32 0.0078125, %v82_v27 }
 0x14a   :  { %v87_v29 = vadd.f32 1e-05, %v85_v28 }
 0x14b   :  { %v84_v30 = vpop.xlane.xlu1 %83 }
 0x14c   :  { %667 = vrsqrt.f32 %v87_v29  ;;  %v86_v31 = vmul.f32 0.0078125, %v84_v30 }
 0x14e   :  { %v88_v32 = vadd.f32 1e-05, %v86_v31 }
 0x150   :  { %669 = vrsqrt.f32 %v88_v32 }
 0x156   :  { %v668_v33 = vpop.eup %667 }
 0x157   :  { %v91_v34 = vmul.f32 %v668_v33, %v77_v8 }
 0x159   :  { %v100_v38 = vmul.f32 %v494_v35, %v91_v34 }
 0x15a   :  { %v670_v36 = vpop.eup %669 }
 0x15b   :  { %v92_v37 = vmul.f32 %v670_v36, %v78_v12  ;;  %v109_v41 = vadd.f32 %v495_v39, %v100_v38 }
 0x15d   :  { %v101_v40 = vmul.f32 %v494_v35, %v92_v37 }
 0x15f   :  { %v110_v42 = vadd.f32 %v495_v39, %v101_v40 }
 0x161   :  { %v111_v44 = vpack.c.bf16 %v110_v42, %v109_v41 }
 0x163   :  { %594 = vmatmul.mubr.bf16.vlgmr.msra.gmra.mrb[0].mxu0 %v111_v44  ;;  %614 = vmatmul.mubr.bf16.vlgmr.msra.gmra.mrb[0].mxu1 %v111_v44 }
 0x164   :  { %618 = vmatpush3.bf16.msra.mxu0 %v659_v43  ;;  %633 = vmatprep.mubr.msk.bf16.mxu0 %vm724_vm0, %v723_v4 }
 0x165   :  { %619 = vmatprep.subr.bf16.mxu0 %v723_v4 }
 0x168   :  { %620 = vmatpush3.bf16.msra.mxu0 %v660_v45 }
 0x169   :  { %621 = vmatprep.subr.bf16.mxu0 %v723_v4 }
 0x16c   :  { %622 = vmatpush3.bf16.msra.mxu0 %v661_v46 }
 0x16d   :  { %623 = vmatprep.subr.bf16.mxu0 %v723_v4 }
 0x170   :  { %624 = vmatpush3.bf16.msra.mxu0 %v662_v47 }
 0x171   :  { %625 = vmatprep.subr.bf16.mxu0 %v723_v4 }
 0x174   :  { %626 = vmatpush3.bf16.msra.mxu0 %v663_v48 }
 0x175   :  { %627 = vmatprep.subr.bf16.mxu0 %v723_v4 }
 0x178   :  { %628 = vmatpush3.bf16.msra.mxu0 %v664_v49 }
 0x179   :  { %629 = vmatprep.subr.bf16.mxu0 %v723_v4 }
 0x17c   :  { %630 = vmatpush3.bf16.msra.mxu0 %v665_v50 }
 0x17d   :  { %631 = vmatprep.subr.bf16.mxu0 %v723_v4  ;;  %v518_v4 = vld [vmem:[%s901_s8] ss:$0 sm:$0xff] }
 0x180   :  { %632 = vmatpush3.bf16.msra.mxu0 %v666_v51 }
 0x183   :  { %634 = vmatmul.mubr.bf16.vlgmr.msra.gmra.mrb[4].mxu0 %v111_v44 }
 0x236   :  { %v219_v53 = vpop.f32.mrb[0].mxu0  ;;  %v341_v55 = vpop.f32.mrb[0].mxu1 }
 0x237   :  { %v595_v56 = vpop.f32.mrb[1].mxu0  ;;  %v615_v57 = vpop.f32.mrb[1].mxu1  ;;  %v220_v60 = vadd.f32 %v496_v52, %v219_v53  ;;  %v342_v61 = vadd.f32 %v507_v54, %v341_v55 }
 0x238   :  { %v222_v58 = vpop.f32.mrb[2].mxu0  ;;  %v344_v59 = vpop.f32.mrb[2].mxu1 }
 0x239   :  { %v223_v62 = vadd.f32 %v496_v52, %v222_v58  ;;  %v345_v63 = vadd.f32 %v507_v54, %v344_v59  ;;  %v596_v0 = vpop.f32.mrb[3].mxu0  ;;  %v616_v1 = vpop.f32.mrb[3].mxu1 }
 0x23b   :  { %v538_v2 = vpack.c.bf16 %v223_v62, %v220_v60  ;;  %v543_v3 = vpack.c.bf16 %v345_v63, %v342_v61 }
 0x23d   :  { %539 = vst [vmem:[%s902_s9] sm:$0xff] %v538_v2   ;;  %544 = vst [vmem:[%s903_s10] sm:$0xff] %v543_v3  }
 0x256   :  { %v463_v5 = vpop.f32.mrb[4].mxu0 }
 0x257   :  { %v635_v6 = vpop.f32.mrb[5].mxu0  ;;  %v464_v8 = vadd.f32 %v518_v4, %v463_v5 }
 0x258   :  { %v466_v7 = vpop.f32.mrb[6].mxu0 }
 0x259   :  { %v467_v9 = vadd.f32 %v518_v4, %v466_v7  ;;  %v636_v10 = vpop.f32.mrb[7].mxu0 }
 0x25b   :  { %v548_v11 = vpack.c.bf16 %v467_v9, %v464_v8 }
 0x25d   :  { %549 = vst [vmem:[%s904_s11] sm:$0xff] %v548_v11  }
 0x25e   :  { %492 = vsyncpa [#allocation4], 1 }
 0x25f   :  { %493 = vsyncpa [#allocation6], 1 }

// kernel: codify_forward.11
= control target key start
LH: loop header
LB: loop body
LE: loop exit
PB: predicated region body
PF: predicated region fallthrough
CT: control target
= control target key end

     0   :  { %s1441_s0 = inlined_call_operand.vmem [shape: s32[2], index: 0, kind: input, shape index: {}]   ;;  %s1442_s1 = inlined_call_operand.vmem [shape: bf16[2,8,128], index: 1, kind: input, shape index: {}]   ;;  %s1443_s2 = inlined_call_operand.vmem [shape: bf16[2,8,128], index: 2, kind: input, shape index: {}]   ;;  %s1444_s3 = inlined_call_operand.vmem [shape: bf16[2,8,128], index: 3, kind: input, shape index: {}]   ;;  %s1445_s4 = inlined_call_operand.vmem [shape: bf16[2,8,128], index: 4, kind: output, shape index: {}]  }
   0x1   :  { %s9_s17 = sshll.u32 %s1441_s0, 4  ;;  %s10_s17 = int_to_ptr.vmem [resolvable:$true] %s9_s17 }
   0x2   :  { %s1175_s18 = scalar_lea.vmem %s10_s17, 16  ;;  %p1180_p1 = scmp.lt.s32.totalorder %s10_s17, %s10_s17 }
   0x3   :  { %p1176_p0 = scmp.ne.s32.totalorder %s10_s17, %s1175_s18  ;;  %p1181_p2 = scmp.lt.s32.totalorder %s1175_s18, %s1175_s18 }
   0x5   :  { %p1182_p3 = por %p1181_p2, %p1180_p1 }
   0x7   :  { %p1183_p4 = pnand %p1182_p3, %p1176_p0 }
   0x9   :  { %1186 = shalt.err (!%p1183_p4)  }
   0xa   :  { %s1213_s19 = smov [#allocation6]  }
   0xb   :  { %12 = dma.vmem_to_smem %s10_s17, 16, %s1213_s19, [#allocation5] }
   0xc   :  { %1199 = dma.done.wait [#allocation5], 16 }
   0xd   :  { %1200 = vsyncadd [#allocation5], 4294967280 }
   0xe   :  { %14 = sfence }
   0xf   :  { %s1249_s20 = smov 0   ;;  %s1251_s21 = smov 0  }
  0x10   :  { %s1253_s22 = smov 0  }
  0x11 LB: > { %s39_s0 = sadd.s32 1, %s1207_s21  ;;  %p1033_p5 = scmp.ge.s32.totalorder %s1211_s22, 1  ;;  %s1211_s22 = sphi %s1253_s22, %s20_s22   ;;  %s1207_s21 = sphi %s1251_s21, %s1449_s21   ;;  %s1203_s20 = sphi %s1249_s20, %s1448_s20  }
  0x12   : > { %p41_p6 = scmp.ge.s32.totalorder %s39_s0, 2  ;;  %p197_p7 = scmp.lt.s32.totalorder %s1211_s22, 3 }
  0x14   : > { %s1451_s0 = smov (%p41_p6, %s39_s0), 0  ;;  %p198_p8 = pnand %p1033_p5, %p197_p7 }
  0x15   : > { %p239_p9 = scmp.lt.s32.totalorder (!%p198_p8), %s1203_s20, 1  ;;  %v1214_v0 = vmov (!%p198_p8), 0.0   ;;  %vm1215_vm0 = vmmov (!%p198_p8), 0   ;;  %vm305_vm1 = vcmask (!%p198_p8), 261120   ;;  %vm272_vm2 = vcmask (!%p198_p8), 7168   ;;  %s292_s5 = sld [smem:[#allocation6 + %s1203_s20]] (!%p198_p8) }
  0x16   : > { %201 = sbr.rel (%p198_p8) target bundleno = 1469 (0x5bd), region = 32  ;;  %1067 = vmatprep.subr.bf16.mxu0 (!%p198_p8), %v1214_v0  ;;  %281 = vst [vmem:[#allocation4] sm:$0xff] (!%p198_p8), %v1214_v0  ;;  %1069 = vmatprep.mubr.msk.bf16.mxu0 (!%p198_p8), %vm1215_vm0, %v1214_v0  ;;  %v1216_v4 = vmov (!%p198_p8), -inf   ;;  %277 = vst.msk [vmem:[#allocation3] sm:$0xff] (!%p198_p8), %vm272_vm2, %v1214_v0  ;;  %v293_v5 = vlaneseq (!%p198_p8)  ;;  %vm355_vm6 = vcmask (!%p198_p8), 64512   ;;  %v1217_v17 = vmov (!%p198_p8), 0  }
  0x17   : > { %1073 = vmatprep.subr.bf16.mxu1 (!%p198_p8), %v1214_v0  ;;  %1075 = vmatprep.mubr.msk.bf16.mxu1 (!%p198_p8), %vm1215_vm0, %v1214_v0  ;;  %273 = vst.msk [vmem:[#allocation2] sm:$0xff] (!%p198_p8), %vm272_vm2, %v1216_v4  ;;  %274 = vst.msk [vmem:[#allocation2 + $0x8] sm:$0xff] (!%p198_p8), %vm272_vm2, %v1216_v4  ;;  %s1218_s6 = smov (!%p198_p8), 96   ;;  %s1219_s7 = smov (!%p198_p8), 64   ;;  %vm390_vm7 = vcmask (!%p198_p8), 1043456   ;;  %vm584_vm8 = vcmask (!%p198_p8), 523520  }
  0x18   : > { %275 = vst.msk [vmem:[#allocation2 + $0x10] sm:$0xff] (!%p198_p8), %vm272_vm2, %v1216_v4  ;;  %276 = vst.msk [vmem:[#allocation2 + $0x18] sm:$0xff] (!%p198_p8), %vm272_vm2, %v1216_v4  ;;  %v294_v6 = vshrl.u32 (!%p198_p8), %v293_v5, 7  ;;  %v298_v7 = vand.u32 (!%p198_p8), 127, %v293_v5  ;;  %1147 = vset.pattern.permute.xlu0 (!%p198_p8), %v1217_v17  ;;  %1148 = vset.pattern.permute.xlu1 (!%p198_p8), %v1217_v17  ;;  %s1220_s8 = smov (!%p198_p8), 32   ;;  %vm725_vm9 = vcmask (!%p198_p8), 785920  }
  0x19   : > { %278 = vst.msk [vmem:[#allocation3 + $0x8] sm:$0xff] (!%p198_p8), %vm272_vm2, %v1214_v0  ;;  %279 = vst.msk [vmem:[#allocation3 + $0x10] sm:$0xff] (!%p198_p8), %vm272_vm2, %v1214_v0  ;;  %vm866_vm10 = vcmask (!%p198_p8), 1048320  }
  0x1a   : > { %280 = vst.msk [vmem:[#allocation3 + $0x18] sm:$0xff] (!%p198_p8), %vm272_vm2, %v1214_v0  ;;  %vm301_vm3 = vcmp.ge.s32.totalorder (!%p198_p8), %v294_v6, %v298_v7 }
  0x1b   : > { %v302_v8 = vstv (!%p198_p8), %s292_s5 }
  0x1c   : > { %vm303_vm4 = vcmp.lt.s32.totalorder (!%p198_p8), %v298_v7, %v302_v8 }
  0x1d   : > { %s240_s23 = scalar_select %p239_p9, %s1203_s20, 1  ;;  %vm1306_vm5 = vmand %vm301_vm3, %vm303_vm4 }
  0x1e   : > { %v1319_v20 = vld [vmem:[#allocation2] sm:$0xff] }
  0x1f   : > { %s1278_s24 = sshll.u32 %s240_s23, 2  ;;  %v640_v7 = vld [vmem:[#allocation2 + $0x10] sm:$0xff] }
  0x20   : > { %s252_s27 = scalar_lea.vmem %s1443_s2, %s1278_s24  ;;  %s245_s30 = scalar_lea.vmem %s1442_s1, %s1278_s24 }
  0x21   : > { %v290_v1 = vld [vmem:[%s252_s27] sm:$0xf]  ;;  %s259_s11 = scalar_lea.vmem %s1444_s3, %s1278_s24  ;;  %s266_s14 = scalar_lea.vmem %s1445_s4, %s1278_s24 }
  0x22   : > { %v310_v2 = vsel %vm305_vm1, %v290_v1, 0  ;;  %v289_v3 = vld [vmem:[%s245_s30] sm:$0xf]  ;;  %v1041_v18 = vcombine.low %v290_v1, %v290_v1 }
  0x23   : > { %1068 = vmatpush3.bf16.xpose.msra.mxu0 %v310_v2  ;;  %v1040_v19 = vcombine.low %v289_v3, %v289_v3  ;;  %v1333_v24 = vld [vmem:[%s259_s11] sm:$0xf]  ;;  %v496_v2 = vld [vmem:[#allocation2 + $0x8] sm:$0xff] }
  0x24   : > { %1085 = vmatprep.subr.bf16.mxu0 %v1214_v0  ;;  %445 = vrot.lane.b32.xlu1 %v1041_v18, %s1218_s6  ;;  %v392_v25 = vsel %vm390_vm7, %v1333_v24, 0  ;;  %v1043_v6 = vcombine.low %v1333_v24, %v1333_v24 }
  0x25   : > { %1074 = vmatpush3.bf16.msra.mxu1 %v392_v25 }
  0x26   : > { %1079 = vmatprep.subr.bf16.mxu1 %v1214_v0 }
  0x28   : > { %440 = vrot.lane.b32.xlu1 %v1040_v19, %s1218_s6 }
  0x2a   : > { %1070 = vmatmul.mubr.msk.bf16.vlgmr.msra.gmra.mrb[0].mxu0 %vm305_vm1, %v289_v3 }
  0x2b   : > { %1087 = vmatprep.mubr.msk.bf16.mxu0 %vm1215_vm0, %v1214_v0 }
  0x2c   : > { %589 = vrot.lane.b32.xlu1 %v1041_v18, %s1219_s7 }
  0x30   : > { %587 = vrot.lane.b32.xlu1 %v1040_v19, %s1219_s7 }
  0x34   : > { %730 = vrot.lane.b32.xlu1 %v1041_v18, %s1220_s8 }
  0x38   : > { %728 = vrot.lane.b32.xlu1 %v1040_v19, %s1220_s8 }
  0x96   : > { %v446_v29 = vpop.permute.xlu1 %445 }
  0x97   : > { %v451_v32 = vsel %vm305_vm1, %v446_v29, 0 }
  0x9a   : > { %v441_v30 = vpop.permute.xlu1 %440 }
  0x9e   : > { %v590_v34 = vpop.permute.xlu1 %589 }
  0x9f   : > { %v595_v36 = vsel %vm305_vm1, %v590_v34, 0 }
  0xa2   : > { %v588_v35 = vpop.permute.xlu1 %587 }
  0xa6   : > { %v731_v37 = vpop.permute.xlu1 %730 }
  0xa7   : > { %v736_v38 = vsel %vm305_vm1, %v731_v37, 0 }
  0xaa   : > { %v729_v39 = vpop.permute.xlu1 %728 }
  0xfd   : > { %v346_v9 = vpop.f32.mrb[0].mxu0 }
  0xfe   : > { %v352_v11 = vmul.f32 0.17677669, %v346_v9  ;;  %v1071_v12 = vpop.f32.mrb[1].mxu0 }
  0xff   : > { %v349_v13 = vpop.f32.mrb[2].mxu0 }
 0x100   : > { %v1072_v14 = vpop.f32.mrb[3].mxu0  ;;  %v353_v15 = vsel %vm1306_vm5, %v352_v11, -1e+09  ;;  %v1378_v11 = vld [vmem:[#allocation2 + $0x18] sm:$0xff] }
 0x101   : > { %v356_v16 = vsel %vm355_vm6, %v353_v15, -inf }
 0x102   : > { %357 = vmax.xlane.f32.xlu0 %v356_v16 }
 0x18f   : > { %v358_v21 = vpop.xlane.xlu0 %357 }
 0x190   : > { %v1322_v22 = vmax.f32 %v1319_v20, %v358_v21 }
 0x192   : > { %v360_v23 = vsub.f32 %v1319_v20, %v1322_v22  ;;  %436 = vst.msk [vmem:[#allocation2] sm:$0xff] %vm272_vm2, %v1322_v22  ;;  %365 = vperm.xlu0 %1147, %v1322_v22  }
 0x194   : > { %v361_v3 = vmul.f32 1.442695, %v360_v23 }
 0x211   : > { %v366_v26 = vpop.permute.xlu0 %365 }
 0x212   : > { %v368_v27 = vsub.f32 %v353_v15, %v366_v26 }
 0x214   : > { %v369_v28 = vmul.f32 1.442695, %v368_v27 }
 0x216   : > { %1151 = vpow2.f32 %v369_v28 }
 0x217   : > { %1153 = vpow2.f32 %v361_v3 }
 0x220   : > { %v1338_v31 = vpop.eup %1151 }
 0x221   : > { %v386_v33 = vpack.c.bf16 %v1338_v31, %v1338_v31  ;;  %v1376_v10 = vpop.eup %1153  ;;  %v373_v16 = vsel %vm355_vm6, %v1338_v31, 0.0 }
 0x223   : > { %1076 = vmatmul.mubr.msk.bf16.vlgmr.msra.gmra.mrb[0].mxu1 %vm355_vm6, %v386_v33 }
 0x224   : > { %1080 = vmatpush3.bf16.xpose.msra.mxu1 %v451_v32  ;;  %1081 = vmatprep.mubr.msk.bf16.mxu1 %vm1215_vm0, %v1214_v0 }
 0x225   : > { %1091 = vmatprep.subr.bf16.mxu1 %v1214_v0 }
 0x22b   : > { %1082 = vmatmul.mubr.msk.bf16.vlgmr.msra.gmra.mrb[4].mxu1 %vm305_vm1, %v441_v30 }
 0x22c   : > { %1092 = vmatpush3.bf16.xpose.msra.mxu1 %v595_v36  ;;  %1093 = vmatprep.mubr.msk.bf16.mxu1 %vm1215_vm0, %v1214_v0 }
 0x22d   : > { %1103 = vmatprep.subr.bf16.mxu1 %v1214_v0 }
 0x233   : > { %1094 = vmatmul.mubr.msk.bf16.vlgmr.msra.gmra.mrb[8].mxu1 %vm305_vm1, %v588_v35 }
 0x234   : > { %1104 = vmatpush3.bf16.xpose.msra.mxu1 %v736_v38  ;;  %1105 = vmatprep.mubr.msk.bf16.mxu1 %vm1215_vm0, %v1214_v0 }
 0x23b   : > { %1106 = vmatmul.mubr.msk.bf16.vlgmr.msra.gmra.mrb[12].mxu1 %vm305_vm1, %v729_v39 }
 0x2f6   : > { %v1357_v40 = vpop.f32.mrb[0].mxu1 }
 0x2f7   : > { %v1077_v41 = vpop.f32.mrb[1].mxu1 }
 0x2f8   : > { %v431_v42 = vpop.f32.mrb[2].mxu1 }
 0x2f9   : > { %v1078_v43 = vpop.f32.mrb[3].mxu1 }
 0x2fe   : > { %v487_v44 = vpop.f32.mrb[4].mxu1 }
 0x2ff   : > { %v493_v45 = vmul.f32 0.17677669, %v487_v44  ;;  %v1083_v46 = vpop.f32.mrb[5].mxu1 }
 0x300   : > { %v490_v47 = vpop.f32.mrb[6].mxu1 }
 0x301   : > { %v1084_v48 = vpop.f32.mrb[7].mxu1  ;;  %v494_v49 = vsel %vm1306_vm5, %v493_v45, -1e+09 }
 0x302   : > { %v497_v50 = vsel %vm355_vm6, %v494_v49, -inf }
 0x303   : > { %498 = vmax.xlane.f32.xlu1 %v497_v50 }
 0x306   : > { %v631_v51 = vpop.f32.mrb[8].mxu1 }
 0x307   : > { %v637_v52 = vmul.f32 0.17677669, %v631_v51  ;;  %v1095_v53 = vpop.f32.mrb[9].mxu1 }
 0x308   : > { %v634_v54 = vpop.f32.mrb[10].mxu1  ;;  %v513_v53 = vld [vmem:[#allocation3 + $0x8] sm:$0xff] }
 0x309   : > { %v1096_v55 = vpop.f32.mrb[11].mxu1  ;;  %v638_v56 = vsel %vm1306_vm5, %v637_v52, -1e+09 }
 0x30a   : > { %v641_v57 = vsel %vm355_vm6, %v638_v56, -inf }
 0x30b   : > { %642 = vmax.xlane.f32.xlu0 %v641_v57  ;;  %v657_v57 = vld [vmem:[#allocation3 + $0x10] sm:$0xff] }
 0x30e   : > { %v772_v58 = vpop.f32.mrb[12].mxu1 }
 0x30f   : > { %v778_v59 = vmul.f32 0.17677669, %v772_v58  ;;  %v1107_v60 = vpop.f32.mrb[13].mxu1 }
 0x310   : > { %v775_v61 = vpop.f32.mrb[14].mxu1 }
 0x311   : > { %v1108_v62 = vpop.f32.mrb[15].mxu1  ;;  %v779_v63 = vsel %vm1306_vm5, %v778_v59, -1e+09 }
 0x312   : > { %v782_v1 = vsel %vm355_vm6, %v779_v63, -inf  ;;  %v798_v62 = vld [vmem:[#allocation3 + $0x18] sm:$0xff] }
 0x313   : > { %783 = vmax.xlane.f32.xlu1 %v782_v1 }
 0x390   : > { %v499_v4 = vpop.xlane.xlu1 %498 }
 0x391   : > { %v500_v5 = vmax.f32 %v496_v2, %v499_v4 }
 0x393   : > { %586 = vst.msk [vmem:[#allocation2 + $0x8] sm:$0xff] %vm272_vm2, %v500_v5  ;;  %506 = vperm.xlu1 %1148, %v500_v5   ;;  %v501_v15 = vsub.f32 %v496_v2, %v500_v5 }
 0x395   : > { %v502_v17 = vmul.f32 1.442695, %v501_v15 }
 0x397   : > { %531 = vrot.lane.b32.xlu1 %v1043_v6, %s1218_s6  ;;  %1155 = vpow2.f32 %v502_v17 }
 0x398   : > { %v643_v8 = vpop.xlane.xlu0 %642 }
 0x399   : > { %v644_v9 = vmax.f32 %v640_v7, %v643_v8 }
 0x39b   : > { %727 = vst.msk [vmem:[#allocation2 + $0x10] sm:$0xff] %vm272_vm2, %v644_v9  ;;  %650 = vperm.xlu0 %1147, %v644_v9   ;;  %v645_v18 = vsub.f32 %v640_v7, %v644_v9 }
 0x39d   : > { %v646_v19 = vmul.f32 1.442695, %v645_v18 }
 0x39f   : > { %382 = vperm.xlu0 %1147, %v1376_v10   ;;  %1157 = vpow2.f32 %v646_v19 }
 0x3a0   : > { %v784_v12 = vpop.xlane.xlu1 %783 }
 0x3a1   : > { %v1382_v13 = vmax.f32 %v1378_v11, %v784_v12  ;;  %v1156_v20 = vpop.eup %1155 }
 0x3a3   : > { %v786_v14 = vsub.f32 %v1378_v11, %v1382_v13  ;;  %868 = vst.msk [vmem:[#allocation2 + $0x18] sm:$0xff] %vm272_vm2, %v1382_v13  ;;  %791 = vperm.xlu1 %1148, %v1382_v13  }
 0x3a5   : > { %v787_v54 = vmul.f32 1.442695, %v786_v14 }
 0x3a7   : > { %672 = vrot.lane.b32.xlu1 %v1043_v6, %s1219_s7 }
 0x3a9   : > { %v1158_v21 = vpop.eup %1157 }
 0x3aa   : > { %v658_v58 = vmul.f32 %v1158_v21, %v657_v57 }
 0x3ab   : > { %813 = vrot.lane.b32.xlu1 %v1043_v6, %s1220_s8 }
 0x3cf   : > { %374 = vadd.xlane.f32.xlu1 %v373_v16 }
 0x3e0   : > { %523 = vperm.xlu1 %1148, %v1156_v20  }
 0x3e4   : > { %667 = vperm.xlu1 %1148, %v1158_v21  }
 0x412   : > { %v507_v22 = vpop.permute.xlu1 %506 }
 0x413   : > { %v509_v23 = vsub.f32 %v494_v49, %v507_v22  ;;  %v371_v49 = vld [vmem:[#allocation3] sm:$0xff] }
 0x414   : > { %v372_v50 = vmul.f32 %v1376_v10, %v371_v49 }
 0x415   : > { %v510_v24 = vmul.f32 1.442695, %v509_v23 }
 0x416   : > { %v532_v25 = vpop.permute.xlu1 %531 }
 0x417   : > { %1159 = vpow2.f32 %v510_v24  ;;  %v537_v26 = vsel %vm390_vm7, %v532_v25, 0 }
 0x418   : > { %1086 = vmatpush3.bf16.msra.mxu0 %v537_v26 }
 0x419   : > { %1097 = vmatprep.subr.bf16.mxu0 %v1214_v0 }
 0x41a   : > { %v651_v27 = vpop.permute.xlu0 %650 }
 0x41b   : > { %v653_v28 = vsub.f32 %v638_v56, %v651_v27 }
 0x41d   : > { %v654_v29 = vmul.f32 1.442695, %v653_v28 }
 0x41e   : > { %v383_v30 = vpop.permute.xlu0 %382 }
 0x41f   : > { %1161 = vpow2.f32 %v654_v29  ;;  %v385_v31 = vmul.f32 0.0, %v383_v30 }
 0x421   : > { %v1160_v32 = vpop.eup %1159  ;;  %v434_v33 = vadd.f32 %v1357_v40, %v385_v31 }
 0x422   : > { %v792_v34 = vpop.permute.xlu1 %791  ;;  %v515_v35 = vsel %vm355_vm6, %v1160_v32, 0.0  ;;  %v527_v36 = vpack.c.bf16 %v1160_v32, %v1160_v32 }
 0x423   : > { %435 = vst.msk [vmem:[#allocation4] sm:$0xff] %vm305_vm1, %v434_v33  ;;  %v794_v37 = vsub.f32 %v779_v63, %v792_v34  ;;  %516 = vadd.xlane.f32.xlu0 %v515_v35 }
 0x424   : > { %1088 = vmatmul.mubr.msk.bf16.vlgmr.msra.gmra.mrb[4].mxu0 %vm355_vm6, %v527_v36 }
 0x425   : > { %v795_v38 = vmul.f32 1.442695, %v794_v37  ;;  %1099 = vmatprep.mubr.msk.bf16.mxu0 %vm1215_vm0, %v1214_v0 }
 0x426   : > { %v673_v39 = vpop.permute.xlu1 %672 }
 0x427   : > { %1163 = vpow2.f32 %v795_v38  ;;  %v678_v41 = vsel %vm390_vm7, %v673_v39, 0 }
 0x428   : > { %1098 = vmatpush3.bf16.msra.mxu0 %v678_v41  ;;  %1165 = vpow2.f32 %v787_v54 }
 0x429   : > { %v1162_v40 = vpop.eup %1161  ;;  %1109 = vmatprep.subr.bf16.mxu0 %v1214_v0 }
 0x42a   : > { %v659_v42 = vsel %vm355_vm6, %v1162_v40, 0.0  ;;  %v671_v43 = vpack.c.bf16 %v1162_v40, %v1162_v40  ;;  %v814_v44 = vpop.permute.xlu1 %813  ;;  %v520_v24 = vld [vmem:[#allocation4] sm:$0xff] }
 0x42b   : > { %660 = vadd.xlane.f32.xlu0 %v659_v42  ;;  %v819_v45 = vsel %vm390_vm7, %v814_v44, 0 }
 0x42c   : > { %1100 = vmatmul.mubr.msk.bf16.vlgmr.msra.gmra.mrb[8].mxu0 %vm355_vm6, %v671_v43 }
 0x42d   : > { %1110 = vmatpush3.bf16.msra.mxu0 %v819_v45  ;;  %1111 = vmatprep.mubr.msk.bf16.mxu0 %vm1215_vm0, %v1214_v0  ;;  %v514_v0 = vmul.f32 %v1156_v20, %v513_v53 }
 0x431   : > { %v1164_v46 = vpop.eup %1163 }
 0x432   : > { %v800_v47 = vsel %vm355_vm6, %v1164_v46, 0.0  ;;  %v812_v48 = vpack.c.bf16 %v1164_v46, %v1164_v46  ;;  %v1166_v61 = vpop.eup %1165 }
 0x433   : > { %801 = vadd.xlane.f32.xlu0 %v800_v47  ;;  %v799_v63 = vmul.f32 %v1166_v61, %v798_v62 }
 0x434   : > { %1112 = vmatmul.mubr.msk.bf16.vlgmr.msra.gmra.mrb[12].mxu0 %vm355_vm6, %v812_v48 }
 0x45c   : > { %v375_v51 = vpop.xlane.xlu1 %374 }
 0x45d   : > { %v376_v52 = vadd.f32 %v375_v51, %v372_v50 }
 0x45f   : > { %378 = vst.msk [vmem:[#allocation3] sm:$0xff] %vm272_vm2, %v376_v52 }
 0x460   : > { %v524_v23 = vpop.permute.xlu1 %523 }
 0x461   : > { %v526_v25 = vmul.f32 %v524_v23, %v520_v24 }
 0x464   : > { %v668_v28 = vpop.permute.xlu1 %667 }
 0x466   : > { %v872_v3 = vld [vmem:[#allocation3] sm:$0xff] }
 0x467   : > { %1167 = vrcp.f32 %v872_v3 }
 0x471   : > { %v1168_v9 = vpop.eup %1167 }
 0x4b0   : > { %v517_v55 = vpop.xlane.xlu0 %516 }
 0x4b1   : > { %v518_v56 = vadd.f32 %v517_v55, %v514_v0 }
 0x4b3   : > { %519 = vst.msk [vmem:[#allocation3 + $0x8] sm:$0xff] %vm272_vm2, %v518_v56 }
 0x4b8   : > { %v661_v59 = vpop.xlane.xlu0 %660 }
 0x4b9   : > { %v662_v60 = vadd.f32 %v661_v59, %v658_v58 }
 0x4ba   : > { %v884_v10 = vld [vmem:[#allocation3 + $0x8] sm:$0xff] }
 0x4bb   : > { %663 = vst.msk [vmem:[#allocation3 + $0x10] sm:$0xff] %vm272_vm2, %v662_v60 }
 0x4c0   : > { %v802_v1 = vpop.xlane.xlu0 %801 }
 0x4c1   : > { %v803_v2 = vadd.f32 %v802_v1, %v799_v63 }
 0x4c2   : > { %v896_v4 = vld [vmem:[#allocation3 + $0x10] sm:$0xff] }
 0x4c3   : > { %804 = vst.msk [vmem:[#allocation3 + $0x18] sm:$0xff] %vm272_vm2, %v803_v2  ;;  %1169 = vrcp.f32 %v896_v4 }
 0x4c4   : > { %1171 = vrcp.f32 %v884_v10 }
 0x4ca   : > { %v908_v16 = vld [vmem:[#allocation3 + $0x18] sm:$0xff] }
 0x4cb   : > { %1173 = vrcp.f32 %v908_v16 }
 0x4cd   : > { %v1170_v11 = vpop.eup %1169 }
 0x4ce   : > { %v1172_v21 = vpop.eup %1171 }
 0x4d5   : > { %v1174_v22 = vpop.eup %1173 }
 0x4f7   : > { %v573_v5 = vpop.f32.mrb[4].mxu0 }
 0x4f8   : > { %580 = vrot.lane.b32.xlu0 %v573_v5, %s1220_s8  ;;  %v1089_v6 = vpop.f32.mrb[5].mxu0 }
 0x4f9   : > { %v576_v7 = vpop.f32.mrb[6].mxu0 }
 0x4fa   : > { %v1090_v8 = vpop.f32.mrb[7].mxu0 }
 0x4fc   : > { %877 = vperm.xlu0 %1147, %v1168_v9  }
 0x4ff   : > { %v714_v12 = vpop.f32.mrb[8].mxu0 }
 0x500   : > { %901 = vperm.xlu0 %1147, %v1170_v11   ;;  %721 = vrot.lane.b32.xlu1 %v714_v12, %s1219_s7  ;;  %v1101_v13 = vpop.f32.mrb[9].mxu0 }
 0x501   : > { %v717_v14 = vpop.f32.mrb[10].mxu0 }
 0x502   : > { %v1102_v15 = vpop.f32.mrb[11].mxu0 }
 0x504   : > { %808 = vperm.xlu1 %1148, %v1166_v61  }
 0x507   : > { %v855_v17 = vpop.f32.mrb[12].mxu0 }
 0x508   : > { %862 = vrot.lane.b32.xlu1 %v855_v17, %s1218_s6  ;;  %v1113_v18 = vpop.f32.mrb[13].mxu0 }
 0x509   : > { %v858_v19 = vpop.f32.mrb[14].mxu0 }
 0x50a   : > { %v1114_v20 = vpop.f32.mrb[15].mxu0 }
 0x50c   : > { %889 = vperm.xlu1 %1148, %v1172_v21  }
 0x510   : > { %913 = vperm.xlu1 %1148, %v1174_v22  }
 0x56a   : > { %v581_v26 = vpop.permute.xlu0 %580 }
 0x56b   : > { %v583_v27 = vadd.f32 %v581_v26, %v526_v25 }
 0x56d   : > { %585 = vst.msk [vmem:[#allocation4] sm:$0xff] %vm584_vm8, %v583_v27 }
 0x572   : > { %v722_v31 = vpop.permute.xlu1 %721 }
 0x574   : > { %v664_v29 = vld [vmem:[#allocation4] sm:$0xff] }
 0x575   : > { %v670_v30 = vmul.f32 %v668_v28, %v664_v29 }
 0x577   : > { %v724_v32 = vadd.f32 %v722_v31, %v670_v30 }
 0x579   : > { %726 = vst.msk [vmem:[#allocation4] sm:$0xff] %vm725_vm9, %v724_v32 }
 0x57b   : > { %v878_v38 = vpop.permute.xlu0 %877 }
 0x57f   : > { %v902_v44 = vpop.permute.xlu0 %901 }
 0x580   : > { %v805_v34 = vld [vmem:[#allocation4] sm:$0xff] }
 0x583   : > { %v809_v33 = vpop.permute.xlu1 %808 }
 0x584   : > { %v811_v35 = vmul.f32 %v809_v33, %v805_v34 }
 0x587   : > { %v863_v36 = vpop.permute.xlu1 %862 }
 0x588   : > { %v865_v37 = vadd.f32 %v863_v36, %v811_v35 }
 0x58a   : > { %867 = vst.msk [vmem:[#allocation4] sm:$0xff] %vm866_vm10, %v865_v37 }
 0x58b   : > { %v890_v42 = vpop.permute.xlu1 %889 }
 0x58f   : > { %v914_v48 = vpop.permute.xlu1 %913 }
 0x591   : > { %v874_v39 = vld [vmem:[#allocation4] sm:$0xff] }
 0x592   : > { %v880_v41 = vmul.f32 %v878_v38, %v874_v39 }
 0x594   : > { %882 = vst.msk [vmem:[#allocation4] sm:$0xff] %vm305_vm1, %v880_v41 }
 0x59b   : > { %v886_v40 = vld [vmem:[#allocation4] sm:$0xff] }
 0x59c   : > { %v892_v43 = vmul.f32 %v890_v42, %v886_v40 }
 0x59e   : > { %894 = vst.msk [vmem:[#allocation4] sm:$0xff] %vm584_vm8, %v892_v43 }
 0x5a5   : > { %v898_v45 = vld [vmem:[#allocation4] sm:$0xff] }
 0x5a6   : > { %v904_v46 = vmul.f32 %v902_v44, %v898_v45 }
 0x5a8   : > { %906 = vst.msk [vmem:[#allocation4] sm:$0xff] %vm725_vm9, %v904_v46 }
 0x5af   : > { %v910_v47 = vld [vmem:[#allocation4] sm:$0xff] }
 0x5b0   : > { %v916_v49 = vmul.f32 %v914_v48, %v910_v47 }
 0x5b2   : > { %918 = vst.msk [vmem:[#allocation4] sm:$0xff] %vm866_vm10, %v916_v49 }
 0x5b9   : > { %v919_v50 = vld [vmem:[#allocation4] sm:$0xff] }
 0x5ba   : > { %v920_v51 = vpack.c.bf16 %v919_v50, %v919_v50 }
 0x5bc   : > { %921 = vst [vmem:[%s266_s14] sm:$0xf] %v920_v51 }
 0x5bd PF: > { %s20_s22 = sadd.s32 1, %s1211_s22   ;;  %s1448_s20 = smov %s1207_s21 }
 0x5be   : > { %p17_p10 = scmp.ge.s32.totalorder %s20_s22, 4   ;;  %s1449_s21 = smov %s1451_s0 }
 0x5c0   :  { %19 = sbr.rel (!%p17_p10) target bundleno = 17 (0x11), region = 89 }

// kernel: codify_forward.16
= control target key start
LH: loop header
LB: loop body
LE: loop exit
PB: predicated region body
PF: predicated region fallthrough
CT: control target
= control target key end

     0   :  { %v198_v0 = vmov 0.0   ;;  %vm199_vm0 = vmmov 0   ;;  %s267_s1 = inlined_call_operand.vmem [shape: bf16[128,128], index: 1, kind: input, shape index: {}]   ;;  %s268_s0 = inlined_call_operand.vmem [shape: bf16[16,128], index: 0, kind: input, shape index: {}]   ;;  %s269_s2 = inlined_call_operand.vmem [shape: f32[1,128], index: 2, kind: input, shape index: {}]   ;;  %s270_s3 = inlined_call_operand.vmem [shape: f32[16,128], index: 3, kind: input, shape index: {}, may-alias: {3,4}]   ;;  %s271_s4 = inlined_call_operand.vmem [shape: f32[16,128], index: 4, kind: output, shape index: {}, may-alias: {3,4}]  }
   0x1   :  { %167 = vmatprep.subr.bf16.mxu0 %v198_v0  ;;  %v189_v1 = vld [vmem:[%s267_s1] sm:$0xff]   ;;  %183 = vmatprep.mubr.msk.bf16.mxu0 %vm199_vm0, %v198_v0  ;;  %v190_v2 = vld [vmem:[%s267_s1 + $0x8] sm:$0xff]   ;;  %v191_v3 = vld [vmem:[%s267_s1 + $0x10] sm:$0xff]  }
   0x2   :  { %168 = vmatpush3.bf16.msra.mxu0 %v189_v1  ;;  %v192_v4 = vld [vmem:[%s267_s1 + $0x18] sm:$0xff]   ;;  %v193_v5 = vld [vmem:[%s267_s1 + $0x20] sm:$0xff]   ;;  %v194_v6 = vld [vmem:[%s267_s1 + $0x28] sm:$0xff]  }
   0x3   :  { %169 = vmatprep.subr.bf16.mxu0 %v198_v0  ;;  %v195_v7 = vld [vmem:[%s267_s1 + $0x30] sm:$0xff]   ;;  %v196_v8 = vld [vmem:[%s267_s1 + $0x38] sm:$0xff]   ;;  %v197_v9 = vld [vmem:[%s268_s0] sm:$0xff]  }
   0x4   :  { %v148_v10 = vld [vmem:[%s269_s2] ss:$0 sm:$0xff]  ;;  %v139_v16 = vld [vmem:[%s270_s3 + $0x8] sm:$0xff] }
   0x5   :  { %v138_v12 = vld [vmem:[%s270_s3] sm:$0xff] }
   0x6   :  { %170 = vmatpush3.bf16.msra.mxu0 %v190_v2 }
   0x7   :  { %171 = vmatprep.subr.bf16.mxu0 %v198_v0 }
   0xa   :  { %172 = vmatpush3.bf16.msra.mxu0 %v191_v3 }
   0xb   :  { %173 = vmatprep.subr.bf16.mxu0 %v198_v0 }
   0xe   :  { %174 = vmatpush3.bf16.msra.mxu0 %v192_v4 }
   0xf   :  { %175 = vmatprep.subr.bf16.mxu0 %v198_v0 }
  0x12   :  { %176 = vmatpush3.bf16.msra.mxu0 %v193_v5 }
  0x13   :  { %177 = vmatprep.subr.bf16.mxu0 %v198_v0 }
  0x16   :  { %178 = vmatpush3.bf16.msra.mxu0 %v194_v6 }
  0x17   :  { %179 = vmatprep.subr.bf16.mxu0 %v198_v0 }
  0x1a   :  { %180 = vmatpush3.bf16.msra.mxu0 %v195_v7 }
  0x1b   :  { %181 = vmatprep.subr.bf16.mxu0 %v198_v0 }
  0x1e   :  { %182 = vmatpush3.bf16.msra.mxu0 %v196_v8 }
  0x21   :  { %184 = vmatmul.mubr.bf16.vlgmr.msra.gmra.mrb[0].mxu0 %v197_v9 }
  0xf4   :  { %v131_v11 = vpop.f32.mrb[0].mxu0 }
  0xf5   :  { %v132_v13 = vadd.f32 %v148_v10, %v131_v11  ;;  %v185_v14 = vpop.f32.mrb[1].mxu0 }
  0xf6   :  { %v134_v15 = vpop.f32.mrb[2].mxu0 }
  0xf7   :  { %v140_v17 = vadd.f32 %v138_v12, %v132_v13  ;;  %v135_v18 = vadd.f32 %v148_v10, %v134_v15  ;;  %v186_v19 = vpop.f32.mrb[3].mxu0 }
  0xf9   :  { %142 = vst [vmem:[%s271_s4] sm:$0xff] %v140_v17  ;;  %v141_v20 = vadd.f32 %v139_v16, %v135_v18 }
  0xfb   :  { %143 = vst [vmem:[%s271_s4 + $0x8] sm:$0xff] %v141_v20 }

// kernel: codify_forward.14
= control target key start
LH: loop header
LB: loop body
LE: loop exit
PB: predicated region body
PF: predicated region fallthrough
CT: control target
= control target key end

     0   :  { %v637_v2 = vmov 0.0   ;;  %vm638_vm0 = vmmov 0   ;;  %s831_s0 = inlined_call_operand.vmem [shape: f32[16,128], index: 0, kind: input, shape index: {}]   ;;  %s832_s3 = inlined_call_operand.vmem [shape: bf16[128,128], index: 3, kind: input, shape index: {}]   ;;  %s833_s5 = inlined_call_operand.vmem [shape: bf16[128,128], index: 5, kind: input, shape index: {}]   ;;  %s834_s7 = inlined_call_operand.vmem [shape: bf16[128,128], index: 7, kind: input, shape index: {}]   ;;  %s835_s1 = inlined_call_operand.vmem [shape: f32[1,128], index: 1, kind: input, shape index: {}]   ;;  %s836_s2 = inlined_call_operand.vmem [shape: f32[1,128], index: 2, kind: input, shape index: {}]   ;;  %s837_s4 = inlined_call_operand.vmem [shape: f32[1,128], index: 4, kind: input, shape index: {}]   ;;  %s838_s6 = inlined_call_operand.vmem [shape: f32[1,128], index: 6, kind: input, shape index: {}]   ;;  %s839_s9 = inlined_call_operand.vmem [shape: bf16[16,128], index: 9, kind: output, shape index: {0}]   ;;  %s840_s10 = inlined_call_operand.vmem [shape: bf16[16,128], index: 10, kind: output, shape index: {1}]   ;;  %s841_s8 = inlined_call_operand.vmem [shape: f32[1,128], index: 8, kind: input, shape index: {}]   ;;  %s842_s11 = inlined_call_operand.vmem [shape: bf16[16,128], index: 11, kind: output, shape index: {2}]  }
   0x1   :  { %v40_v0 = vld [vmem:[%s831_s0] sm:$0xff]  ;;  %v41_v1 = vld [vmem:[%s831_s0 + $0x8] sm:$0xff]  ;;  %547 = vmatprep.subr.bf16.mxu0 %v637_v2  ;;  %567 = vmatprep.subr.bf16.mxu1 %v637_v2  ;;  %v613_v15 = vld [vmem:[%s832_s3 + $0x10] sm:$0xff]  }
   0x2   :  { %42 = vadd.xlane.f32.xlu0 %v40_v0  ;;  %v609_v3 = vld [vmem:[%s832_s3] sm:$0xff]   ;;  %v611_v5 = vld [vmem:[%s832_s3 + $0x8] sm:$0xff]   ;;  %v614_v16 = vld [vmem:[%s833_s5 + $0x10] sm:$0xff]   ;;  %563 = vmatprep.mubr.msk.bf16.mxu0 %vm638_vm0, %v637_v2 }
   0x3   :  { %v610_v4 = vld [vmem:[%s833_s5] sm:$0xff]   ;;  %548 = vmatpush3.bf16.msra.mxu0 %v609_v3  ;;  %v612_v14 = vld [vmem:[%s833_s5 + $0x8] sm:$0xff]   ;;  %v615_v17 = vld [vmem:[%s832_s3 + $0x18] sm:$0xff]   ;;  %583 = vmatprep.mubr.msk.bf16.mxu1 %vm638_vm0, %v637_v2 }
   0x4   :  { %568 = vmatpush3.bf16.msra.mxu1 %v610_v4  ;;  %549 = vmatprep.subr.bf16.mxu0 %v637_v2  ;;  %v616_v18 = vld [vmem:[%s833_s5 + $0x18] sm:$0xff]   ;;  %v617_v19 = vld [vmem:[%s832_s3 + $0x20] sm:$0xff]   ;;  %v619_v21 = vld [vmem:[%s832_s3 + $0x28] sm:$0xff]  }
   0x5   :  { %569 = vmatprep.subr.bf16.mxu1 %v637_v2  ;;  %v618_v20 = vld [vmem:[%s833_s5 + $0x20] sm:$0xff]   ;;  %v620_v22 = vld [vmem:[%s833_s5 + $0x28] sm:$0xff]   ;;  %v621_v23 = vld [vmem:[%s832_s3 + $0x30] sm:$0xff]  }
   0x6   :  { %44 = vadd.xlane.f32.xlu0 %v41_v1  ;;  %v622_v24 = vld [vmem:[%s833_s5 + $0x30] sm:$0xff]   ;;  %v623_v25 = vld [vmem:[%s832_s3 + $0x38] sm:$0xff]   ;;  %v464_v35 = vld [vmem:[%s835_s1] ss:$0 sm:$0xff] }
   0x7   :  { %550 = vmatpush3.bf16.msra.mxu0 %v611_v5  ;;  %v624_v26 = vld [vmem:[%s833_s5 + $0x38] sm:$0xff]   ;;  %v465_v39 = vld [vmem:[%s836_s2] ss:$0 sm:$0xff]  ;;  %v626_v45 = vld [vmem:[%s834_s7 + $0x8] sm:$0xff]  }
   0x8   :  { %551 = vmatprep.subr.bf16.mxu0 %v637_v2  ;;  %570 = vmatpush3.bf16.msra.mxu1 %v612_v14  ;;  %v625_v43 = vld [vmem:[%s834_s7] sm:$0xff]   ;;  %v627_v46 = vld [vmem:[%s834_s7 + $0x10] sm:$0xff]   ;;  %v628_v47 = vld [vmem:[%s834_s7 + $0x18] sm:$0xff]  }
   0x9   :  { %571 = vmatprep.subr.bf16.mxu1 %v637_v2  ;;  %v629_v48 = vld [vmem:[%s834_s7 + $0x20] sm:$0xff]   ;;  %v630_v49 = vld [vmem:[%s834_s7 + $0x28] sm:$0xff]   ;;  %v631_v50 = vld [vmem:[%s834_s7 + $0x30] sm:$0xff]  }
   0xa   :  { %v632_v51 = vld [vmem:[%s834_s7 + $0x38] sm:$0xff]   ;;  %v466_v52 = vld [vmem:[%s837_s4] ss:$0 sm:$0xff] }
   0xb   :  { %552 = vmatpush3.bf16.msra.mxu0 %v613_v15  ;;  %v477_v54 = vld [vmem:[%s838_s6] ss:$0 sm:$0xff] }
   0xc   :  { %572 = vmatpush3.bf16.msra.mxu1 %v614_v16  ;;  %553 = vmatprep.subr.bf16.mxu0 %v637_v2  ;;  %v488_v4 = vld [vmem:[%s841_s8] ss:$0 sm:$0xff] }
   0xd   :  { %573 = vmatprep.subr.bf16.mxu1 %v637_v2 }
   0xf   :  { %554 = vmatpush3.bf16.msra.mxu0 %v615_v17 }
  0x10   :  { %574 = vmatpush3.bf16.msra.mxu1 %v616_v18  ;;  %555 = vmatprep.subr.bf16.mxu0 %v637_v2 }
  0x11   :  { %575 = vmatprep.subr.bf16.mxu1 %v637_v2 }
  0x13   :  { %556 = vmatpush3.bf16.msra.mxu0 %v617_v19 }
  0x14   :  { %576 = vmatpush3.bf16.msra.mxu1 %v618_v20  ;;  %557 = vmatprep.subr.bf16.mxu0 %v637_v2 }
  0x15   :  { %577 = vmatprep.subr.bf16.mxu1 %v637_v2 }
  0x17   :  { %558 = vmatpush3.bf16.msra.mxu0 %v619_v21 }
  0x18   :  { %578 = vmatpush3.bf16.msra.mxu1 %v620_v22  ;;  %559 = vmatprep.subr.bf16.mxu0 %v637_v2 }
  0x19   :  { %579 = vmatprep.subr.bf16.mxu1 %v637_v2 }
  0x1b   :  { %560 = vmatpush3.bf16.msra.mxu0 %v621_v23 }
  0x1c   :  { %580 = vmatpush3.bf16.msra.mxu1 %v622_v24  ;;  %561 = vmatprep.subr.bf16.mxu0 %v637_v2 }
  0x1d   :  { %581 = vmatprep.subr.bf16.mxu1 %v637_v2 }
  0x1f   :  { %562 = vmatpush3.bf16.msra.mxu0 %v623_v25 }
  0x20   :  { %582 = vmatpush3.bf16.msra.mxu1 %v624_v26  ;;  %587 = vmatprep.subr.bf16.mxu0 %v637_v2 }
  0x8f   :  { %v43_v6 = vpop.xlane.xlu0 %42 }
  0x90   :  { %v47_v7 = vmul.f32 0.0078125, %v43_v6 }
  0x92   :  { %v49_v8 = vsub.f32 %v40_v0, %v47_v7 }
  0x93   :  { %v45_v9 = vpop.xlane.xlu0 %44 }
  0x94   :  { %v48_v10 = vmul.f32 0.0078125, %v45_v9  ;;  %v51_v11 = vmul.f32 %v49_v8, %v49_v8 }
  0x96   :  { %v50_v12 = vsub.f32 %v41_v1, %v48_v10  ;;  %53 = vadd.xlane.f32.xlu1 %v51_v11 }
  0x98   :  { %v52_v13 = vmul.f32 %v50_v12, %v50_v12 }
  0x9a   :  { %55 = vadd.xlane.f32.xlu1 %v52_v13 }
 0x123   :  { %v54_v27 = vpop.xlane.xlu1 %53 }
 0x124   :  { %v57_v28 = vmul.f32 0.0078125, %v54_v27 }
 0x126   :  { %v59_v29 = vadd.f32 1e-05, %v57_v28 }
 0x127   :  { %v56_v30 = vpop.xlane.xlu1 %55 }
 0x128   :  { %633 = vrsqrt.f32 %v59_v29  ;;  %v58_v31 = vmul.f32 0.0078125, %v56_v30 }
 0x12a   :  { %v60_v32 = vadd.f32 1e-05, %v58_v31 }
 0x12c   :  { %635 = vrsqrt.f32 %v60_v32 }
 0x132   :  { %v634_v33 = vpop.eup %633 }
 0x133   :  { %v63_v34 = vmul.f32 %v634_v33, %v49_v8 }
 0x135   :  { %v72_v38 = vmul.f32 %v464_v35, %v63_v34 }
 0x136   :  { %v636_v36 = vpop.eup %635 }
 0x137   :  { %v64_v37 = vmul.f32 %v636_v36, %v50_v12  ;;  %v81_v41 = vadd.f32 %v465_v39, %v72_v38 }
 0x139   :  { %v73_v40 = vmul.f32 %v464_v35, %v64_v37 }
 0x13b   :  { %v82_v42 = vadd.f32 %v465_v39, %v73_v40 }
 0x13d   :  { %v83_v44 = vpack.c.bf16 %v82_v42, %v81_v41 }
 0x13f   :  { %564 = vmatmul.mubr.bf16.vlgmr.msra.gmra.mrb[0].mxu0 %v83_v44  ;;  %584 = vmatmul.mubr.bf16.vlgmr.msra.gmra.mrb[0].mxu1 %v83_v44 }
 0x140   :  { %588 = vmatpush3.bf16.msra.mxu0 %v625_v43  ;;  %603 = vmatprep.mubr.msk.bf16.mxu0 %vm638_vm0, %v637_v2 }
 0x141   :  { %589 = vmatprep.subr.bf16.mxu0 %v637_v2 }
 0x144   :  { %590 = vmatpush3.bf16.msra.mxu0 %v626_v45 }
 0x145   :  { %591 = vmatprep.subr.bf16.mxu0 %v637_v2 }
 0x148   :  { %592 = vmatpush3.bf16.msra.mxu0 %v627_v46 }
 0x149   :  { %593 = vmatprep.subr.bf16.mxu0 %v637_v2 }
 0x14c   :  { %594 = vmatpush3.bf16.msra.mxu0 %v628_v47 }
 0x14d   :  { %595 = vmatprep.subr.bf16.mxu0 %v637_v2 }
 0x150   :  { %596 = vmatpush3.bf16.msra.mxu0 %v629_v48 }
 0x151   :  { %597 = vmatprep.subr.bf16.mxu0 %v637_v2 }
 0x154   :  { %598 = vmatpush3.bf16.msra.mxu0 %v630_v49 }
 0x155   :  { %599 = vmatprep.subr.bf16.mxu0 %v637_v2 }
 0x158   :  { %600 = vmatpush3.bf16.msra.mxu0 %v631_v50 }
 0x159   :  { %601 = vmatprep.subr.bf16.mxu0 %v637_v2 }
 0x15c   :  { %602 = vmatpush3.bf16.msra.mxu0 %v632_v51 }
 0x15f   :  { %604 = vmatmul.mubr.bf16.vlgmr.msra.gmra.mrb[4].mxu0 %v83_v44 }
 0x212   :  { %v191_v53 = vpop.f32.mrb[0].mxu0  ;;  %v313_v55 = vpop.f32.mrb[0].mxu1 }
 0x213   :  { %v565_v56 = vpop.f32.mrb[1].mxu0  ;;  %v585_v57 = vpop.f32.mrb[1].mxu1  ;;  %v192_v60 = vadd.f32 %v466_v52, %v191_v53  ;;  %v314_v61 = vadd.f32 %v477_v54, %v313_v55 }
 0x214   :  { %v194_v58 = vpop.f32.mrb[2].mxu0  ;;  %v316_v59 = vpop.f32.mrb[2].mxu1 }
 0x215   :  { %v195_v62 = vadd.f32 %v466_v52, %v194_v58  ;;  %v317_v63 = vadd.f32 %v477_v54, %v316_v59  ;;  %v566_v0 = vpop.f32.mrb[3].mxu0  ;;  %v586_v1 = vpop.f32.mrb[3].mxu1 }
 0x217   :  { %v508_v2 = vpack.c.bf16 %v195_v62, %v192_v60  ;;  %v513_v3 = vpack.c.bf16 %v317_v63, %v314_v61 }
 0x219   :  { %509 = vst [vmem:[%s839_s9] sm:$0xff] %v508_v2   ;;  %514 = vst [vmem:[%s840_s10] sm:$0xff] %v513_v3  }
 0x232   :  { %v435_v5 = vpop.f32.mrb[4].mxu0 }
 0x233   :  { %v605_v6 = vpop.f32.mrb[5].mxu0  ;;  %v436_v8 = vadd.f32 %v488_v4, %v435_v5 }
 0x234   :  { %v438_v7 = vpop.f32.mrb[6].mxu0 }
 0x235   :  { %v439_v9 = vadd.f32 %v488_v4, %v438_v7  ;;  %v606_v10 = vpop.f32.mrb[7].mxu0 }
 0x237   :  { %v518_v11 = vpack.c.bf16 %v439_v9, %v436_v8 }
 0x239   :  { %519 = vst [vmem:[%s842_s11] sm:$0xff] %v518_v11  }

// kernel: codify_forward.13
= control target key start
LH: loop header
LB: loop body
LE: loop exit
PB: predicated region body
PF: predicated region fallthrough
CT: control target
= control target key end

     0   :  { %v1035_v36 = vmov 0   ;;  %s1368_s0 = inlined_call_operand.vmem [shape: f32[16,128], index: 0, kind: input, shape index: {}]   ;;  %s1369_s3 = inlined_call_operand.vmem [shape: bf16[128,512], index: 3, kind: input, shape index: {}]   ;;  %s1370_s1 = inlined_call_operand.vmem [shape: f32[1,128], index: 1, kind: input, shape index: {}]   ;;  %s1371_s2 = inlined_call_operand.vmem [shape: f32[1,128], index: 2, kind: input, shape index: {}]   ;;  %s1372_s5 = inlined_call_operand.vmem [shape: bf16[512,128], index: 5, kind: input, shape index: {}]   ;;  %s1373_s4 = inlined_call_operand.vmem [shape: f32[1,512], index: 4, kind: input, shape index: {}]   ;;  %s1374_s6 = inlined_call_operand.vmem [shape: f32[1,128], index: 6, kind: input, shape index: {}]   ;;  %s1375_s7 = inlined_call_operand.vmem [shape: f32[16,128], index: 7, kind: output, shape index: {}]  }
   0x1   :  { %v1079_v0 = vld [vmem:[%s1368_s0] sm:$0xff]  ;;  %v1085_v1 = vld [vmem:[%s1368_s0 + $0x8] sm:$0xff]  ;;  %325 = vmatprep.mubr.bf16.mxu0 %v1035_v36  ;;  %368 = vmatprep.mubr.bf16.mxu1 %v1035_v36 }
   0x2   :  { %33 = vadd.xlane.f32.xlu0 %v1079_v0  ;;  %v935_v2 = vld [vmem:[%s1369_s3 + $0x4] ss:$16 sps:$4 sm:$0xff]   ;;  %v937_v3 = vld [vmem:[%s1369_s3 + $0xc] ss:$16 sps:$4 sm:$0xff]   ;;  %v939_v4 = vld [vmem:[%s1369_s3] ss:$16 sps:$4 sm:$0xff]  }
   0x3   :  { %293 = vmatprep.subr.bf16.mxu0 %v935_v2  ;;  %v940_v5 = vld [vmem:[%s1369_s3 + $0x8] ss:$16 sps:$4 sm:$0xff]   ;;  %336 = vmatprep.subr.bf16.mxu1 %v937_v3  ;;  %v941_v6 = vld [vmem:[%s1369_s3 + $0x24] ss:$16 sps:$4 sm:$0xff]   ;;  %v943_v7 = vld [vmem:[%s1369_s3 + $0x2c] ss:$16 sps:$4 sm:$0xff]  }
   0x4   :  { %294 = vmatpush1.bf16.msra.mxu0 %v939_v4  ;;  %337 = vmatpush1.bf16.msra.mxu1 %v940_v5  ;;  %v945_v16 = vld [vmem:[%s1369_s3 + $0x20] ss:$16 sps:$4 sm:$0xff]   ;;  %v946_v17 = vld [vmem:[%s1369_s3 + $0x28] ss:$16 sps:$4 sm:$0xff]   ;;  %v947_v18 = vld [vmem:[%s1369_s3 + $0x44] ss:$16 sps:$4 sm:$0xff]  }
   0x5   :  { %295 = vmatprep.subr.bf16.mxu0 %v941_v6  ;;  %338 = vmatprep.subr.bf16.mxu1 %v943_v7  ;;  %v949_v19 = vld [vmem:[%s1369_s3 + $0x4c] ss:$16 sps:$4 sm:$0xff]   ;;  %v951_v20 = vld [vmem:[%s1369_s3 + $0x40] ss:$16 sps:$4 sm:$0xff]   ;;  %v952_v21 = vld [vmem:[%s1369_s3 + $0x48] ss:$16 sps:$4 sm:$0xff]  }
   0x6   :  { %35 = vadd.xlane.f32.xlu0 %v1085_v1  ;;  %v953_v22 = vld [vmem:[%s1369_s3 + $0x64] ss:$16 sps:$4 sm:$0xff]   ;;  %v955_v23 = vld [vmem:[%s1369_s3 + $0x6c] ss:$16 sps:$4 sm:$0xff]   ;;  %v957_v24 = vld [vmem:[%s1369_s3 + $0x60] ss:$16 sps:$4 sm:$0xff]  }
   0x7   :  { %v958_v25 = vld [vmem:[%s1369_s3 + $0x68] ss:$16 sps:$4 sm:$0xff]   ;;  %v959_v26 = vld [vmem:[%s1369_s3 + $0x84] ss:$16 sps:$4 sm:$0xff]   ;;  %v961_v27 = vld [vmem:[%s1369_s3 + $0x8c] ss:$16 sps:$4 sm:$0xff]  }
   0x8   :  { %296 = vmatpush1.bf16.msra.mxu0 %v945_v16  ;;  %339 = vmatpush1.bf16.msra.mxu1 %v946_v17  ;;  %v963_v28 = vld [vmem:[%s1369_s3 + $0x80] ss:$16 sps:$4 sm:$0xff]   ;;  %v964_v29 = vld [vmem:[%s1369_s3 + $0x88] ss:$16 sps:$4 sm:$0xff]   ;;  %v965_v30 = vld [vmem:[%s1369_s3 + $0xa4] ss:$16 sps:$4 sm:$0xff]  }
   0x9   :  { %297 = vmatprep.subr.bf16.mxu0 %v947_v18  ;;  %340 = vmatprep.subr.bf16.mxu1 %v949_v19  ;;  %v967_v31 = vld [vmem:[%s1369_s3 + $0xac] ss:$16 sps:$4 sm:$0xff]   ;;  %v969_v32 = vld [vmem:[%s1369_s3 + $0xa0] ss:$16 sps:$4 sm:$0xff]   ;;  %v970_v33 = vld [vmem:[%s1369_s3 + $0xa8] ss:$16 sps:$4 sm:$0xff]  }
   0xa   :  { %v971_v34 = vld [vmem:[%s1369_s3 + $0xc4] ss:$16 sps:$4 sm:$0xff]   ;;  %v973_v35 = vld [vmem:[%s1369_s3 + $0xcc] ss:$16 sps:$4 sm:$0xff]   ;;  %v975_v37 = vld [vmem:[%s1369_s3 + $0xc0] ss:$16 sps:$4 sm:$0xff]  }
   0xb   :  { %v976_v38 = vld [vmem:[%s1369_s3 + $0xc8] ss:$16 sps:$4 sm:$0xff]   ;;  %v977_v39 = vld [vmem:[%s1369_s3 + $0xe4] ss:$16 sps:$4 sm:$0xff]   ;;  %v979_v40 = vld [vmem:[%s1369_s3 + $0xec] ss:$16 sps:$4 sm:$0xff]  }
   0xc   :  { %298 = vmatpush1.bf16.msra.mxu0 %v951_v20  ;;  %341 = vmatpush1.bf16.msra.mxu1 %v952_v21  ;;  %v981_v41 = vld [vmem:[%s1369_s3 + $0xe0] ss:$16 sps:$4 sm:$0xff]   ;;  %v982_v42 = vld [vmem:[%s1369_s3 + $0xe8] ss:$16 sps:$4 sm:$0xff]  }
   0xd   :  { %299 = vmatprep.subr.bf16.mxu0 %v953_v22  ;;  %342 = vmatprep.subr.bf16.mxu1 %v955_v23  ;;  %v823_v51 = vld [vmem:[%s1370_s1] ss:$0 sm:$0xff]  ;;  %v987_v2 = vld [vmem:[%s1372_s5 + $0x48] sm:$0xff]   ;;  %v991_v6 = vld [vmem:[%s1372_s5 + $0x50] sm:$0xff]  }
   0xe   :  { %v824_v55 = vld [vmem:[%s1371_s2] ss:$0 sm:$0xff]  ;;  %v988_v3 = vld [vmem:[%s1372_s5 + $0xc8] sm:$0xff]   ;;  %v992_v7 = vld [vmem:[%s1372_s5 + $0xd0] sm:$0xff]  }
   0xf   :  { %v983_v60 = vld [vmem:[%s1372_s5 + $0x40] sm:$0xff]   ;;  %v989_v4 = vld [vmem:[%s1372_s5 + $0x8] sm:$0xff]   ;;  %v1007_v22 = vld [vmem:[%s1372_s5 + $0x70] sm:$0xff]  }
  0x10   :  { %300 = vmatpush1.bf16.msra.mxu0 %v957_v24  ;;  %343 = vmatpush1.bf16.msra.mxu1 %v958_v25  ;;  %v984_v61 = vld [vmem:[%s1372_s5 + $0xc0] sm:$0xff]   ;;  %v990_v5 = vld [vmem:[%s1372_s5 + $0x88] sm:$0xff]   ;;  %v1008_v23 = vld [vmem:[%s1372_s5 + $0xf0] sm:$0xff]  }
  0x11   :  { %301 = vmatprep.subr.bf16.mxu0 %v959_v26  ;;  %344 = vmatprep.subr.bf16.mxu1 %v961_v27  ;;  %v985_v62 = vld [vmem:[%s1372_s5] sm:$0xff]   ;;  %v1003_v18 = vld [vmem:[%s1372_s5 + $0x68] sm:$0xff]   ;;  %v1009_v24 = vld [vmem:[%s1372_s5 + $0x30] sm:$0xff]  }
  0x12   :  { %v986_v63 = vld [vmem:[%s1372_s5 + $0x80] sm:$0xff]   ;;  %v1004_v19 = vld [vmem:[%s1372_s5 + $0xe8] sm:$0xff]   ;;  %v1010_v25 = vld [vmem:[%s1372_s5 + $0xb0] sm:$0xff]  }
  0x13   :  { %v1001_v16 = vld [vmem:[%s1372_s5 + $0x20] sm:$0xff]   ;;  %v1005_v20 = vld [vmem:[%s1372_s5 + $0x28] sm:$0xff]   ;;  %v1011_v26 = vld [vmem:[%s1372_s5 + $0x78] sm:$0xff]  }
  0x14   :  { %302 = vmatpush1.bf16.msra.mxu0 %v963_v28  ;;  %345 = vmatpush1.bf16.msra.mxu1 %v964_v29  ;;  %v1002_v17 = vld [vmem:[%s1372_s5 + $0xa0] sm:$0xff]   ;;  %v1006_v21 = vld [vmem:[%s1372_s5 + $0xa8] sm:$0xff]   ;;  %v1012_v27 = vld [vmem:[%s1372_s5 + $0xf8] sm:$0xff]  }
  0x15   :  { %303 = vmatprep.subr.bf16.mxu0 %v965_v30  ;;  %346 = vmatprep.subr.bf16.mxu1 %v967_v31  ;;  %v1013_v28 = vld [vmem:[%s1372_s5 + $0x38] sm:$0xff]   ;;  %v113_v30 = vlaneseq }
  0x16   :  { %v1014_v29 = vld [vmem:[%s1372_s5 + $0xb8] sm:$0xff]  }
  0x17   :  { %v114_v31 = vshrl.u32 %v113_v30, 7 }
  0x18   :  { %304 = vmatpush1.bf16.msra.mxu0 %v969_v32  ;;  %347 = vmatpush1.bf16.msra.mxu1 %v970_v33 }
  0x19   :  { %305 = vmatprep.subr.bf16.mxu0 %v971_v34  ;;  %348 = vmatprep.subr.bf16.mxu1 %v973_v35  ;;  %v115_v32 = vsub.s32 0, %v114_v31  ;;  %v123_v33 = vsub.s32 2, %v114_v31  ;;  %v111_v34 = vld [vmem:[%s1373_s4] sm:$0xf]  ;;  %v119_v35 = vsub.s32 1, %v114_v31  ;;  %v127_v36 = vsub.s32 3, %v114_v31 }
  0x1c   :  { %306 = vmatpush1.bf16.msra.mxu0 %v975_v37  ;;  %349 = vmatpush1.bf16.msra.mxu1 %v976_v38  ;;  %v116_v37 = vrot.slane %v111_v34, %v115_v32  ;;  %v124_v38 = vrot.slane %v111_v34, %v123_v33 }
  0x1d   :  { %307 = vmatprep.subr.bf16.mxu0 %v977_v39  ;;  %350 = vmatprep.subr.bf16.mxu1 %v979_v40  ;;  %v120_v39 = vrot.slane %v111_v34, %v119_v35  ;;  %v128_v40 = vrot.slane %v111_v34, %v127_v36 }
  0x20   :  { %308 = vmatpush1.bf16.msra.mxu0 %v981_v41  ;;  %351 = vmatpush1.bf16.msra.mxu1 %v982_v42 }
  0x21   :  { %890 = vmatprep.subr.bf16.mxu0 %v983_v60  ;;  %912 = vmatprep.subr.bf16.mxu1 %v984_v61 }
  0x8f   :  { %v34_v8 = vpop.xlane.xlu0 %33 }
  0x90   :  { %v38_v9 = vmul.f32 0.0078125, %v34_v8  ;;  %v993_v8 = vld [vmem:[%s1372_s5 + $0x10] sm:$0xff]  }
  0x92   :  { %v1107_v10 = vsub.f32 %v1079_v0, %v38_v9  ;;  %v994_v9 = vld [vmem:[%s1372_s5 + $0x90] sm:$0xff]  }
  0x93   :  { %v36_v11 = vpop.xlane.xlu0 %35 }
  0x94   :  { %v39_v12 = vmul.f32 0.0078125, %v36_v11  ;;  %v42_v13 = vmul.f32 %v1107_v10, %v1107_v10  ;;  %v996_v11 = vld [vmem:[%s1372_s5 + $0xd8] sm:$0xff]  }
  0x96   :  { %v1112_v14 = vsub.f32 %v1085_v1, %v39_v12  ;;  %44 = vadd.xlane.f32.xlu1 %v42_v13  ;;  %v997_v12 = vld [vmem:[%s1372_s5 + $0x18] sm:$0xff]  }
  0x97   :  { %v998_v13 = vld [vmem:[%s1372_s5 + $0x98] sm:$0xff]  }
  0x98   :  { %v43_v15 = vmul.f32 %v1112_v14, %v1112_v14 }
  0x9a   :  { %46 = vadd.xlane.f32.xlu1 %v43_v15  ;;  %v1000_v15 = vld [vmem:[%s1372_s5 + $0xe0] sm:$0xff]  }
 0x123   :  { %v45_v43 = vpop.xlane.xlu1 %44 }
 0x124   :  { %v48_v44 = vmul.f32 0.0078125, %v45_v43 }
 0x126   :  { %v50_v45 = vadd.f32 1e-05, %v48_v44 }
 0x127   :  { %v47_v46 = vpop.xlane.xlu1 %46 }
 0x128   :  { %1015 = vrsqrt.f32 %v50_v45  ;;  %v49_v47 = vmul.f32 0.0078125, %v47_v46 }
 0x12a   :  { %v51_v48 = vadd.f32 1e-05, %v49_v47 }
 0x12c   :  { %1017 = vrsqrt.f32 %v51_v48 }
 0x132   :  { %v1016_v49 = vpop.eup %1015 }
 0x133   :  { %v54_v50 = vmul.f32 %v1016_v49, %v1107_v10  ;;  %v995_v10 = vld [vmem:[%s1372_s5 + $0x58] sm:$0xff]  }
 0x135   :  { %v63_v54 = vmul.f32 %v823_v51, %v54_v50 }
 0x136   :  { %v1018_v52 = vpop.eup %1017 }
 0x137   :  { %v55_v53 = vmul.f32 %v1018_v52, %v1112_v14  ;;  %v72_v57 = vadd.f32 %v824_v55, %v63_v54  ;;  %v999_v14 = vld [vmem:[%s1372_s5 + $0x60] sm:$0xff]  }
 0x139   :  { %v64_v56 = vmul.f32 %v823_v51, %v55_v53 }
 0x13b   :  { %v73_v58 = vadd.f32 %v824_v55, %v64_v56 }
 0x13d   :  { %v74_v59 = vpack.c.bf16 %v73_v58, %v72_v57 }
 0x13f   :  { %326 = vmatmul.mubr.bf16.vlgmr.msra.gmra.mrb[0].mxu0 %v74_v59  ;;  %369 = vmatmul.mubr.bf16.vlgmr.msra.gmra.mrb[0].mxu1 %v74_v59 }
 0x140   :  { %891 = vmatpush3.bf16.msra.mxu0 %v985_v62  ;;  %913 = vmatpush3.bf16.msra.mxu1 %v986_v63 }
 0x141   :  { %892 = vmatprep.subr.bf16.mxu0 %v987_v2  ;;  %914 = vmatprep.subr.bf16.mxu1 %v988_v3 }
 0x144   :  { %893 = vmatpush3.bf16.msra.mxu0 %v989_v4  ;;  %915 = vmatpush3.bf16.msra.mxu1 %v990_v5 }
 0x145   :  { %894 = vmatprep.subr.bf16.mxu0 %v991_v6  ;;  %916 = vmatprep.subr.bf16.mxu1 %v992_v7 }
 0x148   :  { %895 = vmatpush3.bf16.msra.mxu0 %v993_v8  ;;  %917 = vmatpush3.bf16.msra.mxu1 %v994_v9 }
 0x149   :  { %896 = vmatprep.subr.bf16.mxu0 %v995_v10  ;;  %918 = vmatprep.subr.bf16.mxu1 %v996_v11 }
 0x14c   :  { %897 = vmatpush3.bf16.msra.mxu0 %v997_v12  ;;  %919 = vmatpush3.bf16.msra.mxu1 %v998_v13 }
 0x14d   :  { %898 = vmatprep.subr.bf16.mxu0 %v999_v14  ;;  %920 = vmatprep.subr.bf16.mxu1 %v1000_v15 }
 0x150   :  { %899 = vmatpush3.bf16.msra.mxu0 %v1001_v16  ;;  %921 = vmatpush3.bf16.msra.mxu1 %v1002_v17 }
 0x151   :  { %900 = vmatprep.subr.bf16.mxu0 %v1003_v18  ;;  %922 = vmatprep.subr.bf16.mxu1 %v1004_v19 }
 0x154   :  { %901 = vmatpush3.bf16.msra.mxu0 %v1005_v20  ;;  %923 = vmatpush3.bf16.msra.mxu1 %v1006_v21 }
 0x155   :  { %902 = vmatprep.subr.bf16.mxu0 %v1007_v22  ;;  %924 = vmatprep.subr.bf16.mxu1 %v1008_v23 }
 0x158   :  { %903 = vmatpush3.bf16.msra.mxu0 %v1009_v24  ;;  %925 = vmatpush3.bf16.msra.mxu1 %v1010_v25 }
 0x159   :  { %904 = vmatprep.subr.bf16.mxu0 %v1011_v26  ;;  %926 = vmatprep.subr.bf16.mxu1 %v1012_v27 }
 0x15c   :  { %905 = vmatpush3.bf16.msra.mxu0 %v1013_v28  ;;  %927 = vmatpush3.bf16.msra.mxu1 %v1014_v29 }
 0x212   :  { %v327_v41 = vpop.f32.mrb[0].mxu0  ;;  %v370_v42 = vpop.f32.mrb[0].mxu1 }
 0x213   :  { %v1301_v43 = vadd.f32 %v327_v41, %v116_v37  ;;  %v1303_v44 = vadd.f32 %v370_v42, %v124_v38  ;;  %v329_v45 = vpop.f32.mrb[1].mxu0  ;;  %v372_v46 = vpop.f32.mrb[1].mxu1 }
 0x214   :  { %v1305_v47 = vadd.f32 %v329_v45, %v120_v39  ;;  %v1307_v48 = vadd.f32 %v372_v46, %v128_v40  ;;  %v331_v49 = vpop.f32.mrb[2].mxu0  ;;  %v374_v50 = vpop.f32.mrb[2].mxu1 }
 0x215   :  { %v379_v51 = vmul.f32 %v1301_v43, %v1301_v43  ;;  %v381_v52 = vmul.f32 %v1303_v44, %v1303_v44  ;;  %v1313_v53 = vadd.f32 %v331_v49, %v116_v37  ;;  %v1315_v54 = vadd.f32 %v374_v50, %v124_v38  ;;  %v333_v55 = vpop.f32.mrb[3].mxu0  ;;  %v376_v56 = vpop.f32.mrb[3].mxu1 }
 0x216   :  { %v380_v57 = vmul.f32 %v1305_v47, %v1305_v47  ;;  %v382_v58 = vmul.f32 %v1307_v48, %v1307_v48  ;;  %v1321_v59 = vadd.f32 %v333_v55, %v120_v39  ;;  %v1323_v60 = vadd.f32 %v376_v56, %v128_v40 }
 0x217   :  { %v387_v61 = vmul.f32 %v379_v51, %v1301_v43  ;;  %v389_v62 = vmul.f32 %v381_v52, %v1303_v44  ;;  %v383_v63 = vmul.f32 %v1313_v53, %v1313_v53  ;;  %v385_v2 = vmul.f32 %v1315_v54, %v1315_v54 }
 0x218   :  { %v388_v3 = vmul.f32 %v380_v57, %v1305_v47  ;;  %v390_v4 = vmul.f32 %v382_v58, %v1307_v48  ;;  %v384_v5 = vmul.f32 %v1321_v59, %v1321_v59  ;;  %v386_v6 = vmul.f32 %v1323_v60, %v1323_v60 }
 0x219   :  { %v395_v7 = vmul.f32 0.044715, %v387_v61  ;;  %v397_v8 = vmul.f32 0.044715, %v389_v62  ;;  %v391_v9 = vmul.f32 %v383_v63, %v1313_v53  ;;  %v393_v10 = vmul.f32 %v385_v2, %v1315_v54 }
 0x21a   :  { %v396_v11 = vmul.f32 0.044715, %v388_v3  ;;  %v398_v12 = vmul.f32 0.044715, %v390_v4  ;;  %v392_v13 = vmul.f32 %v384_v5, %v1321_v59  ;;  %v394_v14 = vmul.f32 %v386_v6, %v1323_v60 }
 0x21b   :  { %v403_v15 = vadd.f32 %v395_v7, %v1301_v43  ;;  %v405_v16 = vadd.f32 %v397_v8, %v1303_v44  ;;  %v399_v17 = vmul.f32 0.044715, %v391_v9  ;;  %v401_v18 = vmul.f32 0.044715, %v393_v10 }
 0x21c   :  { %v404_v19 = vadd.f32 %v396_v11, %v1305_v47  ;;  %v406_v20 = vadd.f32 %v398_v12, %v1307_v48  ;;  %v400_v21 = vmul.f32 0.044715, %v392_v13  ;;  %v402_v22 = vmul.f32 0.044715, %v394_v14 }
 0x21d   :  { %v411_v23 = vmul.f32 0.7978846, %v403_v15  ;;  %v413_v24 = vmul.f32 0.7978846, %v405_v16  ;;  %v407_v25 = vadd.f32 %v399_v17, %v1313_v53  ;;  %v409_v26 = vadd.f32 %v401_v18, %v1315_v54 }
 0x21e   :  { %v412_v27 = vmul.f32 0.7978846, %v404_v19  ;;  %v414_v28 = vmul.f32 0.7978846, %v406_v20  ;;  %v408_v29 = vadd.f32 %v400_v21, %v1321_v59  ;;  %v410_v30 = vadd.f32 %v402_v22, %v1323_v60  ;;  %v889_v22 = vld [vmem:[%s1374_s6] ss:$0 sm:$0xff] }
 0x21f   :  { %1019 = vtanh.f32 %v411_v23  ;;  %v415_v31 = vmul.f32 0.7978846, %v407_v25  ;;  %v417_v32 = vmul.f32 0.7978846, %v409_v26 }
 0x220   :  { %1021 = vtanh.f32 %v413_v24  ;;  %v416_v33 = vmul.f32 0.7978846, %v408_v29  ;;  %v418_v34 = vmul.f32 0.7978846, %v410_v30 }
 0x221   :  { %1023 = vtanh.f32 %v412_v27 }
 0x222   :  { %1025 = vtanh.f32 %v414_v28 }
 0x223   :  { %1027 = vtanh.f32 %v415_v31 }
 0x224   :  { %1029 = vtanh.f32 %v417_v32 }
 0x225   :  { %1031 = vtanh.f32 %v416_v33 }
 0x226   :  { %1033 = vtanh.f32 %v418_v34 }
 0x229   :  { %v1020_v35 = vpop.eup %1019 }
 0x22a   :  { %v1022_v36 = vpop.eup %1021  ;;  %v427_v37 = vadd.f32 1.0, %v1020_v35 }
 0x22b   :  { %v1024_v38 = vpop.eup %1023  ;;  %v429_v39 = vadd.f32 1.0, %v1022_v36 }
 0x22c   :  { %v1026_v40 = vpop.eup %1025  ;;  %v428_v41 = vadd.f32 1.0, %v1024_v38  ;;  %v435_v49 = vmul.f32 0.5, %v427_v37 }
 0x22d   :  { %v1028_v42 = vpop.eup %1027  ;;  %v430_v45 = vadd.f32 1.0, %v1026_v40  ;;  %v437_v52 = vmul.f32 0.5, %v429_v39 }
 0x22e   :  { %v1030_v46 = vpop.eup %1029  ;;  %v431_v50 = vadd.f32 1.0, %v1028_v42  ;;  %v436_v61 = vmul.f32 0.5, %v428_v41  ;;  %v443_v3 = vmul.f32 %v435_v49, %v1301_v43 }
 0x22f   :  { %v1032_v51 = vpop.eup %1031  ;;  %v433_v55 = vadd.f32 1.0, %v1030_v46  ;;  %v438_v2 = vmul.f32 0.5, %v430_v45  ;;  %v445_v6 = vmul.f32 %v437_v52, %v1303_v44 }
 0x230   :  { %v1034_v56 = vpop.eup %1033  ;;  %v439_v57 = vmul.f32 0.5, %v431_v50  ;;  %v432_v58 = vadd.f32 1.0, %v1032_v51  ;;  %v444_v9 = vmul.f32 %v436_v61, %v1305_v47 }
 0x231   :  { %v441_v62 = vmul.f32 0.5, %v433_v55  ;;  %v434_v63 = vadd.f32 1.0, %v1034_v56  ;;  %v446_v12 = vmul.f32 %v438_v2, %v1307_v48 }
 0x232   :  { %v447_v4 = vmul.f32 %v439_v57, %v1313_v53  ;;  %v440_v5 = vmul.f32 0.5, %v432_v58 }
 0x233   :  { %v449_v7 = vmul.f32 %v441_v62, %v1315_v54  ;;  %v442_v8 = vmul.f32 0.5, %v434_v63 }
 0x234   :  { %v448_v10 = vmul.f32 %v440_v5, %v1321_v59  ;;  %v453_v11 = vpack.c.bf16 %v447_v4, %v443_v3 }
 0x235   :  { %v450_v13 = vmul.f32 %v442_v8, %v1323_v60  ;;  %v455_v14 = vpack.c.bf16 %v449_v7, %v445_v6 }
 0x236   :  { %v454_v15 = vpack.c.bf16 %v448_v10, %v444_v9 }
 0x237   :  { %v456_v43 = vpack.c.bf16 %v450_v13, %v446_v12 }
 0x238   :  { %745 = vmatprep.mubr.bf16.mxu0 %v454_v15 }
 0x239   :  { %786 = vmatprep.mubr.bf16.mxu1 %v456_v43  ;;  %746 = vmatmul.mubr.bf16.vlgmr.msra.gmra.mrb[4].mxu0 %v453_v11 }
 0x23a   :  { %787 = vmatmul.mubr.bf16.vlgmr.msra.gmra.mrb[4].mxu1 %v455_v14 }
 0x30c   :  { %v906_v44 = vpop.f32.mrb[4].mxu0 }
 0x30d   :  { %v928_v53 = vpop.f32.mrb[4].mxu1  ;;  %v907_v54 = vpop.f32.mrb[5].mxu0 }
 0x30e   :  { %v908_v16 = vadd.f32 %v907_v54, %v906_v44  ;;  %v929_v17 = vpop.f32.mrb[5].mxu1  ;;  %v909_v47 = vpop.f32.mrb[6].mxu0 }
 0x30f   :  { %v930_v18 = vadd.f32 %v929_v17, %v928_v53  ;;  %v931_v59 = vpop.f32.mrb[6].mxu1  ;;  %v910_v19 = vpop.f32.mrb[7].mxu0 }
 0x310   :  { %v911_v20 = vadd.f32 %v910_v19, %v909_v47  ;;  %v932_v48 = vpop.f32.mrb[7].mxu1 }
 0x311   :  { %v789_v21 = vadd.f32 %v930_v18, %v908_v16  ;;  %v933_v60 = vadd.f32 %v932_v48, %v931_v59 }
 0x313   :  { %v806_v23 = vadd.f32 %v789_v21, %v1079_v0  ;;  %v792_v24 = vadd.f32 %v933_v60, %v911_v20 }
 0x315   :  { %v815_v25 = vadd.f32 %v889_v22, %v806_v23  ;;  %v807_v26 = vadd.f32 %v792_v24, %v1085_v1 }
 0x317   :  { %817 = vst [vmem:[%s1375_s7] sm:$0xff] %v815_v25  ;;  %v816_v27 = vadd.f32 %v889_v22, %v807_v26 }
 0x319   :  { %818 = vst [vmem:[%s1375_s7 + $0x8] sm:$0xff] %v816_v27 }

// kernel: codify_forward.17
= control target key start
LH: loop header
LB: loop body
LE: loop exit
PB: predicated region body
PF: predicated region fallthrough
CT: control target
= control target key end

     0   :  { %s1417_s0 = inlined_call_operand.vmem [shape: f32[16,128], index: 0, kind: input, shape index: {}]   ;;  %s1418_s1 = inlined_call_operand.vmem [shape: f32[1,128], index: 1, kind: input, shape index: {}]   ;;  %s1419_s2 = inlined_call_operand.vmem [shape: f32[1,128], index: 2, kind: input, shape index: {}]   ;;  %s1420_s3 = inlined_call_operand.vmem [shape: bf16[128,512], index: 3, kind: input, shape index: {}]   ;;  %s1421_s4 = inlined_call_operand.vmem [shape: f32[1,512], index: 4, kind: input, shape index: {}]   ;;  %s1422_s5 = inlined_call_operand.vmem [shape: bf16[512,128], index: 5, kind: input, shape index: {}]   ;;  %s1423_s6 = inlined_call_operand.vmem [shape: f32[1,128], index: 6, kind: input, shape index: {}]   ;;  %s1424_s7 = inlined_call_operand.hbm [shape: f32[16,128], index: 7, kind: output, shape index: {}]  }
   0x1   :  { %v1122_v0 = vld [vmem:[%s1417_s0] sm:$0xff]  ;;  %v1127_v1 = vld [vmem:[%s1417_s0 + $0x8] sm:$0xff] }
   0x2   :  { %34 = vadd.xlane.f32.xlu0 %v1122_v0  ;;  %v951_v2 = vld [vmem:[%s1420_s3 + $0x4] ss:$16 sps:$4 sm:$0xff]   ;;  %v953_v3 = vld [vmem:[%s1420_s3 + $0xc] ss:$16 sps:$4 sm:$0xff]   ;;  %v955_v4 = vld [vmem:[%s1420_s3] ss:$16 sps:$4 sm:$0xff]  }
   0x3   :  { %v956_v5 = vld [vmem:[%s1420_s3 + $0x8] ss:$16 sps:$4 sm:$0xff]   ;;  %v957_v6 = vld [vmem:[%s1420_s3 + $0x24] ss:$16 sps:$4 sm:$0xff]   ;;  %v959_v7 = vld [vmem:[%s1420_s3 + $0x2c] ss:$16 sps:$4 sm:$0xff]   ;;  %294 = vmatprep.subr.bf16.mxu0 %v951_v2  ;;  %337 = vmatprep.subr.bf16.mxu1 %v953_v3 }
   0x4   :  { %295 = vmatpush1.bf16.msra.mxu0 %v955_v4  ;;  %338 = vmatpush1.bf16.msra.mxu1 %v956_v5 }
   0x5   :  { %296 = vmatprep.subr.bf16.mxu0 %v957_v6  ;;  %339 = vmatprep.subr.bf16.mxu1 %v959_v7 }
   0x6   :  { %36 = vadd.xlane.f32.xlu0 %v1127_v1 }
   0x7   :  { %12 = vsyncpa [#allocation5], 0  ;;  %v961_v16 = vld [vmem:[%s1420_s3 + $0x20] ss:$16 sps:$4 sm:$0xff]   ;;  %v962_v17 = vld [vmem:[%s1420_s3 + $0x28] ss:$16 sps:$4 sm:$0xff]  }
   0x8   :  { %297 = vmatpush1.bf16.msra.mxu0 %v961_v16  ;;  %340 = vmatpush1.bf16.msra.mxu1 %v962_v17  ;;  %v963_v18 = vld [vmem:[%s1420_s3 + $0x44] ss:$16 sps:$4 sm:$0xff]   ;;  %v965_v19 = vld [vmem:[%s1420_s3 + $0x4c] ss:$16 sps:$4 sm:$0xff]   ;;  %v967_v20 = vld [vmem:[%s1420_s3 + $0x40] ss:$16 sps:$4 sm:$0xff]  }
   0x9   :  { %v968_v21 = vld [vmem:[%s1420_s3 + $0x48] ss:$16 sps:$4 sm:$0xff]   ;;  %298 = vmatprep.subr.bf16.mxu0 %v963_v18  ;;  %341 = vmatprep.subr.bf16.mxu1 %v965_v19  ;;  %v969_v22 = vld [vmem:[%s1420_s3 + $0x64] ss:$16 sps:$4 sm:$0xff]   ;;  %v971_v23 = vld [vmem:[%s1420_s3 + $0x6c] ss:$16 sps:$4 sm:$0xff]  }
   0xa   :  { %v973_v24 = vld [vmem:[%s1420_s3 + $0x60] ss:$16 sps:$4 sm:$0xff]   ;;  %v974_v25 = vld [vmem:[%s1420_s3 + $0x68] ss:$16 sps:$4 sm:$0xff]   ;;  %v975_v26 = vld [vmem:[%s1420_s3 + $0x84] ss:$16 sps:$4 sm:$0xff]  }
   0xb   :  { %v977_v27 = vld [vmem:[%s1420_s3 + $0x8c] ss:$16 sps:$4 sm:$0xff]   ;;  %v979_v28 = vld [vmem:[%s1420_s3 + $0x80] ss:$16 sps:$4 sm:$0xff]   ;;  %v980_v29 = vld [vmem:[%s1420_s3 + $0x88] ss:$16 sps:$4 sm:$0xff]  }
   0xc   :  { %299 = vmatpush1.bf16.msra.mxu0 %v967_v20  ;;  %342 = vmatpush1.bf16.msra.mxu1 %v968_v21  ;;  %v981_v30 = vld [vmem:[%s1420_s3 + $0xa4] ss:$16 sps:$4 sm:$0xff]   ;;  %v983_v31 = vld [vmem:[%s1420_s3 + $0xac] ss:$16 sps:$4 sm:$0xff]   ;;  %v985_v32 = vld [vmem:[%s1420_s3 + $0xa0] ss:$16 sps:$4 sm:$0xff]  }
   0xd   :  { %300 = vmatprep.subr.bf16.mxu0 %v969_v22  ;;  %343 = vmatprep.subr.bf16.mxu1 %v971_v23  ;;  %v986_v33 = vld [vmem:[%s1420_s3 + $0xa8] ss:$16 sps:$4 sm:$0xff]   ;;  %v987_v34 = vld [vmem:[%s1420_s3 + $0xc4] ss:$16 sps:$4 sm:$0xff]   ;;  %v989_v35 = vld [vmem:[%s1420_s3 + $0xcc] ss:$16 sps:$4 sm:$0xff]  }
   0xe   :  { %v1075_v36 = vmov 0   ;;  %v991_v37 = vld [vmem:[%s1420_s3 + $0xc0] ss:$16 sps:$4 sm:$0xff]   ;;  %v992_v38 = vld [vmem:[%s1420_s3 + $0xc8] ss:$16 sps:$4 sm:$0xff]   ;;  %s1076_s10 = smov [#allocation4]  }
   0xf   :  { %326 = vmatprep.mubr.bf16.mxu0 %v1075_v36  ;;  %369 = vmatprep.mubr.bf16.mxu1 %v1075_v36  ;;  %v993_v39 = vld [vmem:[%s1420_s3 + $0xe4] ss:$16 sps:$4 sm:$0xff]   ;;  %v995_v40 = vld [vmem:[%s1420_s3 + $0xec] ss:$16 sps:$4 sm:$0xff]   ;;  %v997_v41 = vld [vmem:[%s1420_s3 + $0xe0] ss:$16 sps:$4 sm:$0xff]  }
  0x10   :  { %301 = vmatpush1.bf16.msra.mxu0 %v973_v24  ;;  %344 = vmatpush1.bf16.msra.mxu1 %v974_v25  ;;  %v998_v42 = vld [vmem:[%s1420_s3 + $0xe8] ss:$16 sps:$4 sm:$0xff]   ;;  %v836_v51 = vld [vmem:[%s1418_s1] ss:$0 sm:$0xff]  ;;  %v1007_v6 = vld [vmem:[%s1422_s5 + $0x50] sm:$0xff]   ;;  %s825_s11 = sshll.u32 %s1076_s10, 4  ;;  %s826_s11 = int_to_ptr.vmem [resolvable:$true] %s825_s11 }
  0x11   :  { %302 = vmatprep.subr.bf16.mxu0 %v975_v26  ;;  %345 = vmatprep.subr.bf16.mxu1 %v977_v27  ;;  %v837_v55 = vld [vmem:[%s1419_s2] ss:$0 sm:$0xff]  ;;  %v1003_v2 = vld [vmem:[%s1422_s5 + $0x48] sm:$0xff]   ;;  %v1008_v7 = vld [vmem:[%s1422_s5 + $0xd0] sm:$0xff]   ;;  %s1051_s12 = scalar_lea.vmem %s826_s11, 256  ;;  %p1056_p1 = scmp.lt.s32.totalorder %s826_s11, %s826_s11 }
  0x12   :  { %v999_v60 = vld [vmem:[%s1422_s5 + $0x40] sm:$0xff]   ;;  %v1004_v3 = vld [vmem:[%s1422_s5 + $0xc8] sm:$0xff]   ;;  %v1023_v22 = vld [vmem:[%s1422_s5 + $0x70] sm:$0xff]   ;;  %p1052_p0 = scmp.ne.s32.totalorder %s826_s11, %s1051_s12  ;;  %p1057_p2 = scmp.lt.s32.totalorder %s1051_s12, %s1051_s12 }
  0x13   :  { %v1000_v61 = vld [vmem:[%s1422_s5 + $0xc0] sm:$0xff]   ;;  %v1005_v4 = vld [vmem:[%s1422_s5 + $0x8] sm:$0xff]   ;;  %v1024_v23 = vld [vmem:[%s1422_s5 + $0xf0] sm:$0xff]  }
  0x14   :  { %303 = vmatpush1.bf16.msra.mxu0 %v979_v28  ;;  %346 = vmatpush1.bf16.msra.mxu1 %v980_v29  ;;  %v1001_v62 = vld [vmem:[%s1422_s5] sm:$0xff]   ;;  %v1006_v5 = vld [vmem:[%s1422_s5 + $0x88] sm:$0xff]   ;;  %v1025_v24 = vld [vmem:[%s1422_s5 + $0x30] sm:$0xff]   ;;  %p1058_p3 = por %p1057_p2, %p1056_p1 }
  0x15   :  { %304 = vmatprep.subr.bf16.mxu0 %v981_v30  ;;  %347 = vmatprep.subr.bf16.mxu1 %v983_v31  ;;  %v1002_v63 = vld [vmem:[%s1422_s5 + $0x80] sm:$0xff]   ;;  %v1019_v18 = vld [vmem:[%s1422_s5 + $0x68] sm:$0xff]   ;;  %v1026_v25 = vld [vmem:[%s1422_s5 + $0xb0] sm:$0xff]   ;;  %v114_v30 = vlaneseq }
  0x16   :  { %v1017_v16 = vld [vmem:[%s1422_s5 + $0x20] sm:$0xff]   ;;  %v1020_v19 = vld [vmem:[%s1422_s5 + $0xe8] sm:$0xff]   ;;  %v1027_v26 = vld [vmem:[%s1422_s5 + $0x78] sm:$0xff]   ;;  %p1059_p4 = pnand %p1058_p3, %p1052_p0 }
  0x17   :  { %v1018_v17 = vld [vmem:[%s1422_s5 + $0xa0] sm:$0xff]   ;;  %v1021_v20 = vld [vmem:[%s1422_s5 + $0x28] sm:$0xff]   ;;  %v1028_v27 = vld [vmem:[%s1422_s5 + $0xf8] sm:$0xff]   ;;  %v115_v31 = vshrl.u32 %v114_v30, 7 }
  0x18   :  { %305 = vmatpush1.bf16.msra.mxu0 %v985_v32  ;;  %348 = vmatpush1.bf16.msra.mxu1 %v986_v33  ;;  %v1022_v21 = vld [vmem:[%s1422_s5 + $0xa8] sm:$0xff]   ;;  %v1029_v28 = vld [vmem:[%s1422_s5 + $0x38] sm:$0xff]  }
  0x19   :  { %306 = vmatprep.subr.bf16.mxu0 %v987_v34  ;;  %349 = vmatprep.subr.bf16.mxu1 %v989_v35  ;;  %v1030_v29 = vld [vmem:[%s1422_s5 + $0xb8] sm:$0xff]   ;;  %v116_v32 = vsub.s32 0, %v115_v31  ;;  %v124_v33 = vsub.s32 2, %v115_v31  ;;  %v112_v34 = vld [vmem:[%s1421_s4] sm:$0xf]  ;;  %v120_v35 = vsub.s32 1, %v115_v31 }
  0x1a   :  { %v128_v36 = vsub.s32 3, %v115_v31 }
  0x1c   :  { %307 = vmatpush1.bf16.msra.mxu0 %v991_v37  ;;  %350 = vmatpush1.bf16.msra.mxu1 %v992_v38  ;;  %v117_v37 = vrot.slane %v112_v34, %v116_v32  ;;  %v125_v38 = vrot.slane %v112_v34, %v124_v33 }
  0x1d   :  { %308 = vmatprep.subr.bf16.mxu0 %v993_v39  ;;  %351 = vmatprep.subr.bf16.mxu1 %v995_v40  ;;  %v121_v39 = vrot.slane %v112_v34, %v120_v35  ;;  %v129_v40 = vrot.slane %v112_v34, %v128_v36 }
  0x20   :  { %309 = vmatpush1.bf16.msra.mxu0 %v997_v41  ;;  %352 = vmatpush1.bf16.msra.mxu1 %v998_v42 }
  0x21   :  { %903 = vmatprep.subr.bf16.mxu0 %v999_v60  ;;  %925 = vmatprep.subr.bf16.mxu1 %v1000_v61 }
  0x8f   :  { %v35_v8 = vpop.xlane.xlu0 %34 }
  0x90   :  { %v39_v9 = vmul.f32 0.0078125, %v35_v8  ;;  %v1009_v8 = vld [vmem:[%s1422_s5 + $0x10] sm:$0xff]  }
  0x92   :  { %v1150_v10 = vsub.f32 %v1122_v0, %v39_v9  ;;  %v1010_v9 = vld [vmem:[%s1422_s5 + $0x90] sm:$0xff]  }
  0x93   :  { %v37_v11 = vpop.xlane.xlu0 %36 }
  0x94   :  { %v40_v12 = vmul.f32 0.0078125, %v37_v11  ;;  %v43_v13 = vmul.f32 %v1150_v10, %v1150_v10  ;;  %v1012_v11 = vld [vmem:[%s1422_s5 + $0xd8] sm:$0xff]  }
  0x96   :  { %v1155_v14 = vsub.f32 %v1127_v1, %v40_v12  ;;  %45 = vadd.xlane.f32.xlu1 %v43_v13  ;;  %v1013_v12 = vld [vmem:[%s1422_s5 + $0x18] sm:$0xff]  }
  0x97   :  { %v1014_v13 = vld [vmem:[%s1422_s5 + $0x98] sm:$0xff]  }
  0x98   :  { %v44_v15 = vmul.f32 %v1155_v14, %v1155_v14 }
  0x9a   :  { %47 = vadd.xlane.f32.xlu1 %v44_v15  ;;  %v1016_v15 = vld [vmem:[%s1422_s5 + $0xe0] sm:$0xff]  }
 0x123   :  { %v46_v43 = vpop.xlane.xlu1 %45 }
 0x124   :  { %v49_v44 = vmul.f32 0.0078125, %v46_v43 }
 0x126   :  { %v51_v45 = vadd.f32 1e-05, %v49_v44 }
 0x127   :  { %v48_v46 = vpop.xlane.xlu1 %47 }
 0x128   :  { %1031 = vrsqrt.f32 %v51_v45  ;;  %v50_v47 = vmul.f32 0.0078125, %v48_v46 }
 0x12a   :  { %v52_v48 = vadd.f32 1e-05, %v50_v47 }
 0x12c   :  { %1033 = vrsqrt.f32 %v52_v48 }
 0x132   :  { %v1032_v49 = vpop.eup %1031 }
 0x133   :  { %v55_v50 = vmul.f32 %v1032_v49, %v1150_v10  ;;  %v1011_v10 = vld [vmem:[%s1422_s5 + $0x58] sm:$0xff]  }
 0x135   :  { %v64_v54 = vmul.f32 %v836_v51, %v55_v50 }
 0x136   :  { %v1034_v52 = vpop.eup %1033 }
 0x137   :  { %v56_v53 = vmul.f32 %v1034_v52, %v1155_v14  ;;  %v73_v57 = vadd.f32 %v837_v55, %v64_v54  ;;  %v1015_v14 = vld [vmem:[%s1422_s5 + $0x60] sm:$0xff]  }
 0x139   :  { %v65_v56 = vmul.f32 %v836_v51, %v56_v53 }
 0x13b   :  { %v74_v58 = vadd.f32 %v837_v55, %v65_v56 }
 0x13d   :  { %v75_v59 = vpack.c.bf16 %v74_v58, %v73_v57 }
 0x13f   :  { %327 = vmatmul.mubr.bf16.vlgmr.msra.gmra.mrb[0].mxu0 %v75_v59  ;;  %370 = vmatmul.mubr.bf16.vlgmr.msra.gmra.mrb[0].mxu1 %v75_v59 }
 0x140   :  { %904 = vmatpush3.bf16.msra.mxu0 %v1001_v62  ;;  %926 = vmatpush3.bf16.msra.mxu1 %v1002_v63 }
 0x141   :  { %905 = vmatprep.subr.bf16.mxu0 %v1003_v2  ;;  %927 = vmatprep.subr.bf16.mxu1 %v1004_v3 }
 0x144   :  { %906 = vmatpush3.bf16.msra.mxu0 %v1005_v4  ;;  %928 = vmatpush3.bf16.msra.mxu1 %v1006_v5 }
 0x145   :  { %907 = vmatprep.subr.bf16.mxu0 %v1007_v6  ;;  %929 = vmatprep.subr.bf16.mxu1 %v1008_v7 }
 0x148   :  { %908 = vmatpush3.bf16.msra.mxu0 %v1009_v8  ;;  %930 = vmatpush3.bf16.msra.mxu1 %v1010_v9 }
 0x149   :  { %909 = vmatprep.subr.bf16.mxu0 %v1011_v10  ;;  %931 = vmatprep.subr.bf16.mxu1 %v1012_v11 }
 0x14c   :  { %910 = vmatpush3.bf16.msra.mxu0 %v1013_v12  ;;  %932 = vmatpush3.bf16.msra.mxu1 %v1014_v13 }
 0x14d   :  { %911 = vmatprep.subr.bf16.mxu0 %v1015_v14  ;;  %933 = vmatprep.subr.bf16.mxu1 %v1016_v15 }
 0x150   :  { %912 = vmatpush3.bf16.msra.mxu0 %v1017_v16  ;;  %934 = vmatpush3.bf16.msra.mxu1 %v1018_v17 }
 0x151   :  { %913 = vmatprep.subr.bf16.mxu0 %v1019_v18  ;;  %935 = vmatprep.subr.bf16.mxu1 %v1020_v19 }
 0x154   :  { %914 = vmatpush3.bf16.msra.mxu0 %v1021_v20  ;;  %936 = vmatpush3.bf16.msra.mxu1 %v1022_v21 }
 0x155   :  { %915 = vmatprep.subr.bf16.mxu0 %v1023_v22  ;;  %937 = vmatprep.subr.bf16.mxu1 %v1024_v23 }
 0x158   :  { %916 = vmatpush3.bf16.msra.mxu0 %v1025_v24  ;;  %938 = vmatpush3.bf16.msra.mxu1 %v1026_v25 }
 0x159   :  { %917 = vmatprep.subr.bf16.mxu0 %v1027_v26  ;;  %939 = vmatprep.subr.bf16.mxu1 %v1028_v27 }
 0x15c   :  { %918 = vmatpush3.bf16.msra.mxu0 %v1029_v28  ;;  %940 = vmatpush3.bf16.msra.mxu1 %v1030_v29 }
 0x212   :  { %v328_v41 = vpop.f32.mrb[0].mxu0  ;;  %v371_v42 = vpop.f32.mrb[0].mxu1 }
 0x213   :  { %v1344_v43 = vadd.f32 %v328_v41, %v117_v37  ;;  %v1346_v44 = vadd.f32 %v371_v42, %v125_v38  ;;  %v330_v45 = vpop.f32.mrb[1].mxu0  ;;  %v373_v46 = vpop.f32.mrb[1].mxu1 }
 0x214   :  { %v1348_v47 = vadd.f32 %v330_v45, %v121_v39  ;;  %v1350_v48 = vadd.f32 %v373_v46, %v129_v40  ;;  %v332_v49 = vpop.f32.mrb[2].mxu0  ;;  %v375_v50 = vpop.f32.mrb[2].mxu1 }
 0x215   :  { %v380_v51 = vmul.f32 %v1344_v43, %v1344_v43  ;;  %v382_v52 = vmul.f32 %v1346_v44, %v1346_v44  ;;  %v1356_v53 = vadd.f32 %v332_v49, %v117_v37  ;;  %v1358_v54 = vadd.f32 %v375_v50, %v125_v38  ;;  %v334_v55 = vpop.f32.mrb[3].mxu0  ;;  %v377_v56 = vpop.f32.mrb[3].mxu1 }
 0x216   :  { %v381_v57 = vmul.f32 %v1348_v47, %v1348_v47  ;;  %v383_v58 = vmul.f32 %v1350_v48, %v1350_v48  ;;  %v1364_v59 = vadd.f32 %v334_v55, %v121_v39  ;;  %v1366_v60 = vadd.f32 %v377_v56, %v129_v40 }
 0x217   :  { %v388_v61 = vmul.f32 %v380_v51, %v1344_v43  ;;  %v390_v62 = vmul.f32 %v382_v52, %v1346_v44  ;;  %v384_v63 = vmul.f32 %v1356_v53, %v1356_v53  ;;  %v386_v2 = vmul.f32 %v1358_v54, %v1358_v54 }
 0x218   :  { %v389_v3 = vmul.f32 %v381_v57, %v1348_v47  ;;  %v391_v4 = vmul.f32 %v383_v58, %v1350_v48  ;;  %v385_v5 = vmul.f32 %v1364_v59, %v1364_v59  ;;  %v387_v6 = vmul.f32 %v1366_v60, %v1366_v60 }
 0x219   :  { %v396_v7 = vmul.f32 0.044715, %v388_v61  ;;  %v398_v8 = vmul.f32 0.044715, %v390_v62  ;;  %v392_v9 = vmul.f32 %v384_v63, %v1356_v53  ;;  %v394_v10 = vmul.f32 %v386_v2, %v1358_v54 }
 0x21a   :  { %v397_v11 = vmul.f32 0.044715, %v389_v3  ;;  %v399_v12 = vmul.f32 0.044715, %v391_v4  ;;  %v393_v13 = vmul.f32 %v385_v5, %v1364_v59  ;;  %v395_v14 = vmul.f32 %v387_v6, %v1366_v60 }
 0x21b   :  { %v404_v15 = vadd.f32 %v396_v7, %v1344_v43  ;;  %v406_v16 = vadd.f32 %v398_v8, %v1346_v44  ;;  %v400_v17 = vmul.f32 0.044715, %v392_v9  ;;  %v402_v18 = vmul.f32 0.044715, %v394_v10 }
 0x21c   :  { %v405_v19 = vadd.f32 %v397_v11, %v1348_v47  ;;  %v407_v20 = vadd.f32 %v399_v12, %v1350_v48  ;;  %v401_v21 = vmul.f32 0.044715, %v393_v13  ;;  %v403_v22 = vmul.f32 0.044715, %v395_v14 }
 0x21d   :  { %v412_v23 = vmul.f32 0.7978846, %v404_v15  ;;  %v414_v24 = vmul.f32 0.7978846, %v406_v16  ;;  %v408_v25 = vadd.f32 %v400_v17, %v1356_v53  ;;  %v410_v26 = vadd.f32 %v402_v18, %v1358_v54 }
 0x21e   :  { %v413_v27 = vmul.f32 0.7978846, %v405_v19  ;;  %v415_v28 = vmul.f32 0.7978846, %v407_v20  ;;  %v409_v29 = vadd.f32 %v401_v21, %v1364_v59  ;;  %v411_v30 = vadd.f32 %v403_v22, %v1366_v60  ;;  %v902_v22 = vld [vmem:[%s1423_s6] ss:$0 sm:$0xff] }
 0x21f   :  { %1035 = vtanh.f32 %v412_v23  ;;  %v416_v31 = vmul.f32 0.7978846, %v408_v25  ;;  %v418_v32 = vmul.f32 0.7978846, %v410_v26 }
 0x220   :  { %1037 = vtanh.f32 %v414_v24  ;;  %v417_v33 = vmul.f32 0.7978846, %v409_v29  ;;  %v419_v34 = vmul.f32 0.7978846, %v411_v30 }
 0x221   :  { %1039 = vtanh.f32 %v413_v27 }
 0x222   :  { %1041 = vtanh.f32 %v415_v28 }
 0x223   :  { %1043 = vtanh.f32 %v416_v31 }
 0x224   :  { %1045 = vtanh.f32 %v418_v32 }
 0x225   :  { %1047 = vtanh.f32 %v417_v33 }
 0x226   :  { %1049 = vtanh.f32 %v419_v34 }
 0x229   :  { %v1036_v35 = vpop.eup %1035 }
 0x22a   :  { %v1038_v36 = vpop.eup %1037  ;;  %v428_v37 = vadd.f32 1.0, %v1036_v35 }
 0x22b   :  { %v1040_v38 = vpop.eup %1039  ;;  %v430_v39 = vadd.f32 1.0, %v1038_v36 }
 0x22c   :  { %v1042_v40 = vpop.eup %1041  ;;  %v429_v41 = vadd.f32 1.0, %v1040_v38  ;;  %v436_v49 = vmul.f32 0.5, %v428_v37 }
 0x22d   :  { %v1044_v42 = vpop.eup %1043  ;;  %v431_v45 = vadd.f32 1.0, %v1042_v40  ;;  %v438_v52 = vmul.f32 0.5, %v430_v39 }
 0x22e   :  { %v1046_v46 = vpop.eup %1045  ;;  %v432_v50 = vadd.f32 1.0, %v1044_v42  ;;  %v437_v61 = vmul.f32 0.5, %v429_v41  ;;  %v444_v3 = vmul.f32 %v436_v49, %v1344_v43 }
 0x22f   :  { %v1048_v51 = vpop.eup %1047  ;;  %v434_v55 = vadd.f32 1.0, %v1046_v46  ;;  %v439_v2 = vmul.f32 0.5, %v431_v45  ;;  %v446_v6 = vmul.f32 %v438_v52, %v1346_v44 }
 0x230   :  { %v1050_v56 = vpop.eup %1049  ;;  %v440_v57 = vmul.f32 0.5, %v432_v50  ;;  %v433_v58 = vadd.f32 1.0, %v1048_v51  ;;  %v445_v9 = vmul.f32 %v437_v61, %v1348_v47 }
 0x231   :  { %v442_v62 = vmul.f32 0.5, %v434_v55  ;;  %v435_v63 = vadd.f32 1.0, %v1050_v56  ;;  %v447_v12 = vmul.f32 %v439_v2, %v1350_v48 }
 0x232   :  { %v448_v4 = vmul.f32 %v440_v57, %v1356_v53  ;;  %v441_v5 = vmul.f32 0.5, %v433_v58 }
 0x233   :  { %v450_v7 = vmul.f32 %v442_v62, %v1358_v54  ;;  %v443_v8 = vmul.f32 0.5, %v435_v63 }
 0x234   :  { %v449_v10 = vmul.f32 %v441_v5, %v1364_v59  ;;  %v454_v11 = vpack.c.bf16 %v448_v4, %v444_v3 }
 0x235   :  { %v451_v13 = vmul.f32 %v443_v8, %v1366_v60  ;;  %v456_v14 = vpack.c.bf16 %v450_v7, %v446_v6 }
 0x236   :  { %v455_v15 = vpack.c.bf16 %v449_v10, %v445_v9 }
 0x237   :  { %v457_v43 = vpack.c.bf16 %v451_v13, %v447_v12 }
 0x238   :  { %746 = vmatprep.mubr.bf16.mxu0 %v455_v15 }
 0x239   :  { %787 = vmatprep.mubr.bf16.mxu1 %v457_v43  ;;  %747 = vmatmul.mubr.bf16.vlgmr.msra.gmra.mrb[4].mxu0 %v454_v11 }
 0x23a   :  { %788 = vmatmul.mubr.bf16.vlgmr.msra.gmra.mrb[4].mxu1 %v456_v14 }
 0x30c   :  { %v919_v44 = vpop.f32.mrb[4].mxu0 }
 0x30d   :  { %v941_v53 = vpop.f32.mrb[4].mxu1  ;;  %v920_v54 = vpop.f32.mrb[5].mxu0 }
 0x30e   :  { %v921_v16 = vadd.f32 %v920_v54, %v919_v44  ;;  %v942_v17 = vpop.f32.mrb[5].mxu1  ;;  %v922_v47 = vpop.f32.mrb[6].mxu0 }
 0x30f   :  { %v943_v18 = vadd.f32 %v942_v17, %v941_v53  ;;  %v944_v59 = vpop.f32.mrb[6].mxu1  ;;  %v923_v19 = vpop.f32.mrb[7].mxu0 }
 0x310   :  { %v924_v20 = vadd.f32 %v923_v19, %v922_v47  ;;  %v945_v48 = vpop.f32.mrb[7].mxu1 }
 0x311   :  { %v790_v21 = vadd.f32 %v943_v18, %v921_v16  ;;  %v946_v60 = vadd.f32 %v945_v48, %v944_v59 }
 0x313   :  { %v807_v23 = vadd.f32 %v790_v21, %v1122_v0  ;;  %v793_v24 = vadd.f32 %v946_v60, %v924_v20 }
 0x315   :  { %v816_v25 = vadd.f32 %v902_v22, %v807_v23  ;;  %v808_v26 = vadd.f32 %v793_v24, %v1127_v1 }
 0x317   :  { %818 = vst [vmem:[#allocation4] sm:$0xff] %v816_v25  ;;  %v817_v27 = vadd.f32 %v902_v22, %v808_v26 }
 0x319   :  { %819 = vst [vmem:[#allocation4 + $0x8] sm:$0xff] %v817_v27 }
 0x31a   :  { %1062 = shalt.err (!%p1059_p4)
}
 0x31b   :  { %s1063_s13 = scalar_lea.hbm %s1424_s7, 256 }
 0x31c   :  { %p1064_p5 = scmp.ne.s32.totalorder %s1424_s7, %s1063_s13  ;;  %p1067_p6 = scmp.lt.u32.totalorder %s1063_s13, %s1424_s7 }
 0x31e   :  { %p1069_p7 = pnand %p1067_p6, %p1064_p5 }
 0x320   :  { %1072 = shalt.err (!%p1069_p7)
}
 0x321   :  { %s1077_s18 = smov 128   ;;  %s1078_s19 = smov 8  }
 0x322   :  { %831 = dma.vmem_to_hbm [thread:$0]  %s826_s11, 256, %s1424_s7, [#allocation5], %s1077_s18, %s1077_s18, %s1078_s19  }
 0x323   :  { %1073 = dma.done.wait [#allocation5], 256  }
 0x324   :  { %1074 = vsyncadd [#allocation5], 4294967040 }
 0x325   :  { %835 = vsyncpa [#allocation5], 1 }

</bundles_post_ra>
